<compile_context>
chip_gen: v7x
topology: tpu7x:2x2x1
jax: 0.10.0
libtpu: 0.0.40
codegen_flags: <defaults>
</compile_context>

<pallas_src>
import functools

import jax
import jax.numpy as jnp
import numpy as np
from jax import lax
from jax.experimental import pallas as pl
from jax.experimental.pallas import tpu as pltpu


# ------------------------------- Pallas kernel --------------------------------

def _patch_embed_gemm_kernel(p_ref, w_ref, b_ref, o_ref):
    """out tile = (tm x K) patch tile @ (K x tn) weight tile + (1 x tn) bias tile."""
    acc = jnp.dot(
        p_ref[...].astype(jnp.float32),
        w_ref[...].astype(jnp.float32),
        preferred_element_type=jnp.float32,
        precision=lax.Precision.HIGHEST,
    )
    o_ref[...] = (acc + b_ref[...].astype(jnp.float32)).astype(o_ref.dtype)


def _pick_tile(dim, candidates=(512, 256, 128)):
    """Largest MXU/lane-friendly tile that divides `dim`, else the full extent (always legal)."""
    for c in candidates:
        if dim >= c and dim % c == 0:
            return c
    return dim


# --------------------------------- wrapper ------------------------------------

def patch_embed_forward(x, w, b, *, kernel_size=(16, 16), stride=(16, 16), padding=(0, 0)):
    """x: [B, C_in, H, W] (NCHW, like torch), w: [E, C_in, kh, kw], b: [E] -> [B, Hp, Wp, E]."""
    kh, kw = kernel_size
    sh, sw = stride
    ph, pw = padding
    # TODO(synk): overlapping patches (stride != kernel_size) need a true im2col-with-duplication /
    # conv formulation; SAM's PatchEmbed always uses stride == kernel_size so it is not implemented.
    assert (sh, sw) == (kh, kw), "only stride == kernel_size is supported"

    B, C, H, W = x.shape
    E = w.shape[0]

    if ph or pw:
        x = jnp.pad(x, ((0, 0), (0, 0), (ph, ph), (pw, pw)))
        H, W = H + 2 * ph, W + 2 * pw

    Hp, Wp = H // kh, W // kw
    # Conv with stride == kernel drops any spatial remainder.
    x = x[:, :, : Hp * kh, : Wp * kw]

    K = C * kh * kw
    M = B * Hp * Wp

    # Non-overlapping patchify: pure permutation, done once in XLA.
    # patches[b*Hp*Wp + i*Wp + j, c*kh*kw + p*kw + q] = x[b, c, i*kh + p, j*kw + q]
    patches = (
        x.reshape(B, C, Hp, kh, Wp, kw)
        .transpose(0, 2, 4, 1, 3, 5)
        .reshape(M, K)
    )
    # Conv weight (E, C, kh, kw) -> GEMM weight (K, E) with matching (c, p, q) flatten order.
    w2d = w.reshape(E, K).T
    b2d = b.reshape(1, E)

    tm = _pick_tile(M)   # patch-row tile
    tn = _pick_tile(E)   # embed-dim tile (lane axis)

    # Pad M so every grid block is full (padded rows are dropped after the call).
    m_pad = pl.cdiv(M, tm) * tm
    if m_pad != M:
        patches = jnp.pad(patches, ((0, m_pad - M), (0, 0)))

    grid = (m_pad // tm, E // tn)

    flops = 2 * M * K * E
    bytes_accessed = (patches.size + w2d.size + b2d.size + M * E) * 4

    out2d = pl.pallas_call(
        _patch_embed_gemm_kernel,
        out_shape=jax.ShapeDtypeStruct((m_pad, E), x.dtype),
        grid=grid,
        in_specs=[
            pl.BlockSpec((tm, K), lambda i, j: (i, 0)),    # patch tile
            pl.BlockSpec((K, tn), lambda i, j: (0, j)),    # weight tile (resident across i)
            pl.BlockSpec((1, tn), lambda i, j: (0, j)),    # bias tile
        ],
        out_specs=pl.BlockSpec((tm, tn), lambda i, j: (i, j)),
        compiler_params=pltpu.CompilerParams(
            dimension_semantics=("parallel", "parallel"),
            vmem_limit_bytes=32 * 1024 * 1024,
        ),
        cost_estimate=pl.CostEstimate(
            flops=flops, transcendentals=0, bytes_accessed=bytes_accessed
        ),
    )(patches, w2d, b2d)

    return out2d[:M].reshape(B, Hp, Wp, E)


# ----------------------------- pure-JAX reference ------------------------------

def patch_embed_reference(x, w, b, *, stride, padding):
    y = lax.conv_general_dilated(
        x,
        w,
        window_strides=stride,
        padding=[(padding[0], padding[0]), (padding[1], padding[1])],
        dimension_numbers=("NCHW", "OIHW", "NCHW"),
        precision=lax.Precision.HIGHEST,
    )
    y = y + b.reshape(1, -1, 1, 1)
    return jnp.transpose(y, (0, 2, 3, 1))  # .permute(0, 2, 3, 1)


# ------------------------------------ main -------------------------------------

if __name__ == "__main__":
    # SAM PatchEmbed defaults: kernel 16x16, stride 16x16, padding (0,0), in_chans 3, embed_dim 768.
    kernel_size = (16, 16)
    stride = (16, 16)
    padding = (0, 0)
    in_chans = 3
    embed_dim = 768
    B, H, W = 2, 64, 64          # -> 4x4 grid of patches per image

    key = jax.random.PRNGKey(0)
    kx, kw_, kb = jax.random.split(key, 3)
    x = jax.random.normal(kx, (B, in_chans, H, W), jnp.float32)
    w = 0.05 * jax.random.normal(kw_, (embed_dim, in_chans) + kernel_size, jnp.float32)
    b = 0.05 * jax.random.normal(kb, (embed_dim,), jnp.float32)

    fwd = jax.jit(
        functools.partial(
            patch_embed_forward, kernel_size=kernel_size, stride=stride, padding=padding
        )
    )
    out = jax.block_until_ready(fwd(x, w, b))

    ref = jax.block_until_ready(
        patch_embed_reference(x, w, b, stride=stride, padding=padding)
    )
    assert out.shape == ref.shape == (B, H // 16, W // 16, embed_dim), (out.shape, ref.shape)
    np.testing.assert_allclose(np.asarray(out), np.asarray(ref), rtol=1e-3, atol=1e-3)

    print("KERNEL_OK")
</pallas_src>

<mosaic_0001>
module attributes {stable_mosaic.version = 11 : i64} {
  func.func @_patch_embed_gemm_kernel(%arg0: i32, %arg1: i32, %arg2: memref<32x768xf32, #tpu.memory_space<vmem>>, %arg3: memref<768x256xf32, #tpu.memory_space<vmem>>, %arg4: memref<1x256xf32, #tpu.memory_space<vmem>>, %arg5: memref<32x256xf32, #tpu.memory_space<vmem>>) attributes {dimension_semantics = [#tpu.dimension_semantics<parallel>, #tpu.dimension_semantics<parallel>], iteration_bounds = array<i64: 1, 3>, scalar_prefetch = 0 : i64, scratch_operands = 0 : i64, tpu.core_type = #tpu.core_type<tc>, window_params = [{transform_indices = @transform_0, window_bounds = array<i64: 32, 768>}, {transform_indices = @transform_1, window_bounds = array<i64: 768, 256>}, {transform_indices = @transform_2, window_bounds = array<i64: 1, 256>}, {transform_indices = @transform_3, window_bounds = array<i64: 32, 256>}]} {
    %c0 = arith.constant 0 : index
    %c0_0 = arith.constant 0 : index
    %0 = vector.load %arg2[%c0, %c0_0] : memref<32x768xf32, #tpu.memory_space<vmem>>, vector<32x768xf32>
    %c0_1 = arith.constant 0 : index
    %c0_2 = arith.constant 0 : index
    %1 = vector.load %arg3[%c0_1, %c0_2] : memref<768x256xf32, #tpu.memory_space<vmem>>, vector<768x256xf32>
    %cst = arith.constant dense<0.000000e+00> : vector<32x256xf32>
    %2 = tpu.matmul %0, %1, %cst {dimension_numbers = #tpu.dot_dimension_numbers<[1], [0], [0], [1], [0, 0, 1, 1], [], []>, precision = #tpu.contract_precision<fp32>} : vector<32x768xf32>, vector<768x256xf32>, vector<32x256xf32> -> vector<32x256xf32>
    %c0_3 = arith.constant 0 : index
    %c0_4 = arith.constant 0 : index
    %3 = vector.load %arg4[%c0_3, %c0_4] : memref<1x256xf32, #tpu.memory_space<vmem>>, vector<1x256xf32>
    %4 = vector.broadcast %3 : vector<1x256xf32> to vector<32x256xf32>
    %5 = arith.addf %2, %4 : vector<32x256xf32>
    %c0_5 = arith.constant 0 : index
    %c0_6 = arith.constant 0 : index
    %6 = vector.load %arg5[%c0_5, %c0_6] : memref<32x256xf32, #tpu.memory_space<vmem>>, vector<32x256xf32>
    tpu.vector_store %arg5[%c0_5, %c0_6], %5 {strides = array<i32>} : memref<32x256xf32, #tpu.memory_space<vmem>>, vector<32x256xf32>,
    return
  }
  func.func @transform_0(%arg0: i32, %arg1: i32) -> (i32, i32) {
    %c0_i32 = arith.constant 0 : i32
    %c0_i32_0 = arith.constant 0 : i32
    return %arg0, %c0_i32 : i32, i32
  }
  func.func @transform_1(%arg0: i32, %arg1: i32) -> (i32, i32) {
    %c0_i32 = arith.constant 0 : i32
    %c0_i32_0 = arith.constant 0 : i32
    return %c0_i32, %arg1 : i32, i32
  }
  func.func @transform_2(%arg0: i32, %arg1: i32) -> (i32, i32) {
    %c0_i32 = arith.constant 0 : i32
    %c0_i32_0 = arith.constant 0 : i32
    return %c0_i32, %arg1 : i32, i32
  }
  func.func @transform_3(%arg0: i32, %arg1: i32) -> (i32, i32) {
    %c0_i32 = arith.constant 0 : i32
    return %arg0, %arg1 : i32, i32
  }
}

</mosaic_0001>

<bundles_post_ra>
// kernel: patch_embed_forward.1
= control target key start
LH: loop header
LB: loop body
LE: loop exit
PB: predicated region body
PF: predicated region fallthrough
CT: control target
= control target key end

     0   :  { %s6825_s12 = smov 0   ;;  %s6827_s13 = smov 0   ;;  %s10347_s0 = inlined_call_operand.vmem [shape: f32[32,768], index: 0, kind: input, shape index: {}]   ;;  %s10348_s1 = inlined_call_operand.vmem [shape: f32[768,768], index: 1, kind: input, shape index: {}]   ;;  %s10349_s2 = inlined_call_operand.vmem [shape: f32[1,768], index: 2, kind: input, shape index: {}]   ;;  %s10350_s3 = inlined_call_operand.vmem [shape: f32[32,768], index: 3, kind: output, shape index: {}]  }
   0x1   :  { %s6829_s14 = smov 0   ;;  %s6831_s15 = smov 0  }
   0x2   :  { %s6833_s16 = smov 0  }
   0x3 LB: > { %s22_s17 = sadd.s32 1, %s6799_s15  ;;  %s5410_s18 = sadd.s32 4294967295, %s6803_s16   ;;  %s6803_s16 = sphi %s6833_s16, %s13_s16   ;;  %s6799_s15 = sphi %s6831_s15, %s12503_s15   ;;  %s6795_s14 = sphi %s6829_s14, %s12502_s14   ;;  %s6791_s13 = sphi %s6827_s13, %s12501_s13   ;;  %s6787_s12 = sphi %s6825_s12, %s12500_s12  }
   0x4   : > { %p23_p0 = scmp.ge.s32.totalorder %s22_s17, 3  ;;  %p65_p1 = scmp.ne.s32.totalorder %s6791_s13, %s6787_s12 }
   0x5   : > { %p66_p2 = scmp.eq.s32.totalorder %s6803_s16, 0  ;;  %p123_p4 = scmp.eq.s32.totalorder %s5410_s18, 2 }
   0x6   : > { %s12505_s17 = smov (%p23_p0, %s22_s17), 0  ;;  %s58_s20 = sadd.s32 1, %s6791_s13 }
   0x7   : > { %p67_p3 = por %p66_p2, %p65_p1  ;;  %s55_s19 = ssub.s32 %s6799_s15, %s12505_s17 }
   0x8   : > { %p56_p5 = scmp.eq.s32.totalorder %s55_s19, 0  ;;  %p6860_p6 = por %p123_p4, %p65_p1 }
   0x9   : > { %p5414_p7 = scmp.ge.s32.totalorder %s6803_s16, 3 }
   0xa   : > { %s6865_s22 = scalar_select %p56_p5, %s6791_s13, %s58_s20  }
   0xb   : > { %155 = sbr.rel (%p5414_p7) target bundleno = 119 (0x77), region = 20 }
  0x12   : > { %158 = sbr.rel (!%p67_p3) target bundleno = 119 (0x77), region = 24  ;;  %s160_s23 = sand.u32 (%p67_p3), 1, %s6791_s13  }
  0x13   : > { %s5425_s24 = sshll.u32 (%p67_p3), %s6799_s15, 4  ;;  %s6723_s25 = smul.u32 (%p67_p3), 1536, %s160_s23 }
  0x14   : > { %s6873_s28 = scalar_lea.vmem (%p67_p3), %s10348_s1, %s5425_s24 }
  0x15   : > { %v178_v0 = vld [vmem:[%s6873_s28] sm:$0xff] (%p67_p3)  ;;  %v180_v1 = vld [vmem:[%s6873_s28 + $0x8] sm:$0xff] (%p67_p3)  ;;  %v182_v2 = vld [vmem:[%s6873_s28 + $0x30] sm:$0xff] (%p67_p3)  ;;  %s6881_s29 = scalar_lea.vmem (%p67_p3), [#allocation2], %s6723_s25 }
  0x16   : > { %v184_v3 = vld [vmem:[%s6873_s28 + $0x38] sm:$0xff] (%p67_p3)  ;;  %v186_v4 = vld [vmem:[%s6873_s28 + $0x60] sm:$0xff] (%p67_p3)  ;;  %v188_v5 = vld [vmem:[%s6873_s28 + $0x68] sm:$0xff] (%p67_p3)  ;;  %179 = vst [vmem:[%s6881_s29] sm:$0xff] (%p67_p3), %v178_v0 }
  0x17   : > { %181 = vst [vmem:[%s6881_s29 + $0x8] sm:$0xff] (%p67_p3), %v180_v1  ;;  %183 = vst [vmem:[%s6881_s29 + $0x10] sm:$0xff] (%p67_p3), %v182_v2  ;;  %v190_v6 = vld [vmem:[%s6873_s28 + $0x90] sm:$0xff] (%p67_p3)  ;;  %v192_v7 = vld [vmem:[%s6873_s28 + $0x98] sm:$0xff] (%p67_p3) }
  0x18   : > { %185 = vst [vmem:[%s6881_s29 + $0x18] sm:$0xff] (%p67_p3), %v184_v3  ;;  %187 = vst [vmem:[%s6881_s29 + $0x20] sm:$0xff] (%p67_p3), %v186_v4  ;;  %v194_v8 = vld [vmem:[%s6873_s28 + $0xc0] sm:$0xff] (%p67_p3)  ;;  %v196_v9 = vld [vmem:[%s6873_s28 + $0xc8] sm:$0xff] (%p67_p3) }
  0x19   : > { %189 = vst [vmem:[%s6881_s29 + $0x28] sm:$0xff] %v188_v5  ;;  %191 = vst [vmem:[%s6881_s29 + $0x30] sm:$0xff] %v190_v6  ;;  %v198_v10 = vld [vmem:[%s6873_s28 + $0xf0] sm:$0xff]  ;;  %v200_v11 = vld [vmem:[%s6873_s28 + $0xf8] sm:$0xff] }
  0x1a   : > { %193 = vst [vmem:[%s6881_s29 + $0x38] sm:$0xff] %v192_v7  ;;  %195 = vst [vmem:[%s6881_s29 + $0x40] sm:$0xff] %v194_v8  ;;  %v202_v12 = vld [vmem:[%s6873_s28 + $0x120] sm:$0xff]  ;;  %v204_v13 = vld [vmem:[%s6873_s28 + $0x128] sm:$0xff] }
  0x1b   : > { %197 = vst [vmem:[%s6881_s29 + $0x48] sm:$0xff] %v196_v9  ;;  %199 = vst [vmem:[%s6881_s29 + $0x50] sm:$0xff] %v198_v10  ;;  %v206_v14 = vld [vmem:[%s6873_s28 + $0x150] sm:$0xff]  ;;  %v208_v15 = vld [vmem:[%s6873_s28 + $0x158] sm:$0xff] }
  0x1c   : > { %201 = vst [vmem:[%s6881_s29 + $0x58] sm:$0xff] %v200_v11  ;;  %203 = vst [vmem:[%s6881_s29 + $0x60] sm:$0xff] %v202_v12  ;;  %v210_v16 = vld [vmem:[%s6873_s28 + $0x180] sm:$0xff]  ;;  %v212_v17 = vld [vmem:[%s6873_s28 + $0x188] sm:$0xff] }
  0x1d   : > { %205 = vst [vmem:[%s6881_s29 + $0x68] sm:$0xff] %v204_v13  ;;  %207 = vst [vmem:[%s6881_s29 + $0x70] sm:$0xff] %v206_v14  ;;  %v214_v18 = vld [vmem:[%s6873_s28 + $0x1b0] sm:$0xff]  ;;  %v216_v19 = vld [vmem:[%s6873_s28 + $0x1b8] sm:$0xff] }
  0x1e   : > { %209 = vst [vmem:[%s6881_s29 + $0x78] sm:$0xff] %v208_v15  ;;  %211 = vst [vmem:[%s6881_s29 + $0x80] sm:$0xff] %v210_v16  ;;  %v218_v20 = vld [vmem:[%s6873_s28 + $0x1e0] sm:$0xff]  ;;  %v220_v21 = vld [vmem:[%s6873_s28 + $0x1e8] sm:$0xff] }
  0x1f   : > { %213 = vst [vmem:[%s6881_s29 + $0x88] sm:$0xff] %v212_v17  ;;  %215 = vst [vmem:[%s6881_s29 + $0x90] sm:$0xff] %v214_v18  ;;  %v222_v22 = vld [vmem:[%s6873_s28 + $0x210] sm:$0xff]  ;;  %v224_v23 = vld [vmem:[%s6873_s28 + $0x218] sm:$0xff] }
  0x20   : > { %217 = vst [vmem:[%s6881_s29 + $0x98] sm:$0xff] %v216_v19  ;;  %219 = vst [vmem:[%s6881_s29 + $0xa0] sm:$0xff] %v218_v20  ;;  %v226_v24 = vld [vmem:[%s6873_s28 + $0x240] sm:$0xff]  ;;  %v228_v25 = vld [vmem:[%s6873_s28 + $0x248] sm:$0xff] }
  0x21   : > { %221 = vst [vmem:[%s6881_s29 + $0xa8] sm:$0xff] %v220_v21  ;;  %223 = vst [vmem:[%s6881_s29 + $0xb0] sm:$0xff] %v222_v22  ;;  %v230_v26 = vld [vmem:[%s6873_s28 + $0x270] sm:$0xff]  ;;  %v232_v27 = vld [vmem:[%s6873_s28 + $0x278] sm:$0xff] }
  0x22   : > { %225 = vst [vmem:[%s6881_s29 + $0xb8] sm:$0xff] %v224_v23  ;;  %227 = vst [vmem:[%s6881_s29 + $0xc0] sm:$0xff] %v226_v24  ;;  %v234_v28 = vld [vmem:[%s6873_s28 + $0x2a0] sm:$0xff]  ;;  %v236_v29 = vld [vmem:[%s6873_s28 + $0x2a8] sm:$0xff] }
  0x23   : > { %229 = vst [vmem:[%s6881_s29 + $0xc8] sm:$0xff] %v228_v25  ;;  %231 = vst [vmem:[%s6881_s29 + $0xd0] sm:$0xff] %v230_v26  ;;  %v238_v30 = vld [vmem:[%s6873_s28 + $0x2d0] sm:$0xff]  ;;  %v240_v31 = vld [vmem:[%s6873_s28 + $0x2d8] sm:$0xff] }
  0x24   : > { %233 = vst [vmem:[%s6881_s29 + $0xd8] sm:$0xff] %v232_v27  ;;  %235 = vst [vmem:[%s6881_s29 + $0xe0] sm:$0xff] %v234_v28  ;;  %v242_v32 = vld [vmem:[%s6873_s28 + $0x300] sm:$0xff]  ;;  %v244_v33 = vld [vmem:[%s6873_s28 + $0x308] sm:$0xff] }
  0x25   : > { %237 = vst [vmem:[%s6881_s29 + $0xe8] sm:$0xff] %v236_v29  ;;  %239 = vst [vmem:[%s6881_s29 + $0xf0] sm:$0xff] %v238_v30  ;;  %v246_v34 = vld [vmem:[%s6873_s28 + $0x330] sm:$0xff]  ;;  %v248_v35 = vld [vmem:[%s6873_s28 + $0x338] sm:$0xff] }
  0x26   : > { %241 = vst [vmem:[%s6881_s29 + $0xf8] sm:$0xff] %v240_v31  ;;  %243 = vst [vmem:[%s6881_s29 + $0x100] sm:$0xff] %v242_v32  ;;  %v250_v36 = vld [vmem:[%s6873_s28 + $0x360] sm:$0xff]  ;;  %v252_v37 = vld [vmem:[%s6873_s28 + $0x368] sm:$0xff] }
  0x27   : > { %245 = vst [vmem:[%s6881_s29 + $0x108] sm:$0xff] %v244_v33  ;;  %247 = vst [vmem:[%s6881_s29 + $0x110] sm:$0xff] %v246_v34  ;;  %v254_v38 = vld [vmem:[%s6873_s28 + $0x390] sm:$0xff]  ;;  %v256_v39 = vld [vmem:[%s6873_s28 + $0x398] sm:$0xff] }
  0x28   : > { %249 = vst [vmem:[%s6881_s29 + $0x118] sm:$0xff] %v248_v35  ;;  %251 = vst [vmem:[%s6881_s29 + $0x120] sm:$0xff] %v250_v36  ;;  %v258_v40 = vld [vmem:[%s6873_s28 + $0x3c0] sm:$0xff]  ;;  %v260_v41 = vld [vmem:[%s6873_s28 + $0x3c8] sm:$0xff] }
  0x29   : > { %253 = vst [vmem:[%s6881_s29 + $0x128] sm:$0xff] %v252_v37  ;;  %255 = vst [vmem:[%s6881_s29 + $0x130] sm:$0xff] %v254_v38  ;;  %v262_v42 = vld [vmem:[%s6873_s28 + $0x3f0] sm:$0xff]  ;;  %v264_v43 = vld [vmem:[%s6873_s28 + $0x3f8] sm:$0xff] }
  0x2a   : > { %257 = vst [vmem:[%s6881_s29 + $0x138] sm:$0xff] %v256_v39  ;;  %259 = vst [vmem:[%s6881_s29 + $0x140] sm:$0xff] %v258_v40  ;;  %v266_v44 = vld [vmem:[%s6873_s28 + $0x420] sm:$0xff]  ;;  %v268_v45 = vld [vmem:[%s6873_s28 + $0x428] sm:$0xff] }
  0x2b   : > { %261 = vst [vmem:[%s6881_s29 + $0x148] sm:$0xff] %v260_v41  ;;  %263 = vst [vmem:[%s6881_s29 + $0x150] sm:$0xff] %v262_v42  ;;  %v270_v46 = vld [vmem:[%s6873_s28 + $0x450] sm:$0xff]  ;;  %v272_v47 = vld [vmem:[%s6873_s28 + $0x458] sm:$0xff] }
  0x2c   : > { %265 = vst [vmem:[%s6881_s29 + $0x158] sm:$0xff] %v264_v43  ;;  %267 = vst [vmem:[%s6881_s29 + $0x160] sm:$0xff] %v266_v44  ;;  %v274_v48 = vld [vmem:[%s6873_s28 + $0x480] sm:$0xff]  ;;  %v276_v49 = vld [vmem:[%s6873_s28 + $0x488] sm:$0xff] }
  0x2d   : > { %269 = vst [vmem:[%s6881_s29 + $0x168] sm:$0xff] %v268_v45  ;;  %271 = vst [vmem:[%s6881_s29 + $0x170] sm:$0xff] %v270_v46  ;;  %v278_v50 = vld [vmem:[%s6873_s28 + $0x4b0] sm:$0xff]  ;;  %v280_v51 = vld [vmem:[%s6873_s28 + $0x4b8] sm:$0xff] }
  0x2e   : > { %273 = vst [vmem:[%s6881_s29 + $0x178] sm:$0xff] %v272_v47  ;;  %275 = vst [vmem:[%s6881_s29 + $0x180] sm:$0xff] %v274_v48  ;;  %v282_v52 = vld [vmem:[%s6873_s28 + $0x4e0] sm:$0xff]  ;;  %v284_v53 = vld [vmem:[%s6873_s28 + $0x4e8] sm:$0xff] }
  0x2f   : > { %277 = vst [vmem:[%s6881_s29 + $0x188] sm:$0xff] %v276_v49  ;;  %279 = vst [vmem:[%s6881_s29 + $0x190] sm:$0xff] %v278_v50  ;;  %v286_v54 = vld [vmem:[%s6873_s28 + $0x510] sm:$0xff]  ;;  %v288_v55 = vld [vmem:[%s6873_s28 + $0x518] sm:$0xff] }
  0x30   : > { %281 = vst [vmem:[%s6881_s29 + $0x198] sm:$0xff] %v280_v51  ;;  %283 = vst [vmem:[%s6881_s29 + $0x1a0] sm:$0xff] %v282_v52  ;;  %v290_v56 = vld [vmem:[%s6873_s28 + $0x540] sm:$0xff]  ;;  %v292_v57 = vld [vmem:[%s6873_s28 + $0x548] sm:$0xff] }
  0x31   : > { %285 = vst [vmem:[%s6881_s29 + $0x1a8] sm:$0xff] %v284_v53  ;;  %287 = vst [vmem:[%s6881_s29 + $0x1b0] sm:$0xff] %v286_v54  ;;  %v294_v58 = vld [vmem:[%s6873_s28 + $0x570] sm:$0xff]  ;;  %v296_v59 = vld [vmem:[%s6873_s28 + $0x578] sm:$0xff] }
  0x32   : > { %289 = vst [vmem:[%s6881_s29 + $0x1b8] sm:$0xff] %v288_v55  ;;  %291 = vst [vmem:[%s6881_s29 + $0x1c0] sm:$0xff] %v290_v56  ;;  %v298_v60 = vld [vmem:[%s6873_s28 + $0x5a0] sm:$0xff]  ;;  %v300_v61 = vld [vmem:[%s6873_s28 + $0x5a8] sm:$0xff] }
  0x33   : > { %293 = vst [vmem:[%s6881_s29 + $0x1c8] sm:$0xff] %v292_v57  ;;  %295 = vst [vmem:[%s6881_s29 + $0x1d0] sm:$0xff] %v294_v58  ;;  %v302_v62 = vld [vmem:[%s6873_s28 + $0x5d0] sm:$0xff]  ;;  %v304_v63 = vld [vmem:[%s6873_s28 + $0x5d8] sm:$0xff] }
  0x34   : > { %297 = vst [vmem:[%s6881_s29 + $0x1d8] sm:$0xff] %v296_v59  ;;  %299 = vst [vmem:[%s6881_s29 + $0x1e0] sm:$0xff] %v298_v60  ;;  %v306_v0 = vld [vmem:[%s6873_s28 + $0x600] sm:$0xff]  ;;  %v308_v1 = vld [vmem:[%s6873_s28 + $0x608] sm:$0xff] }
  0x35   : > { %301 = vst [vmem:[%s6881_s29 + $0x1e8] sm:$0xff] %v300_v61  ;;  %303 = vst [vmem:[%s6881_s29 + $0x1f0] sm:$0xff] %v302_v62  ;;  %v310_v2 = vld [vmem:[%s6873_s28 + $0x630] sm:$0xff]  ;;  %v312_v3 = vld [vmem:[%s6873_s28 + $0x638] sm:$0xff] }
  0x36   : > { %305 = vst [vmem:[%s6881_s29 + $0x1f8] sm:$0xff] %v304_v63  ;;  %307 = vst [vmem:[%s6881_s29 + $0x200] sm:$0xff] %v306_v0  ;;  %v314_v4 = vld [vmem:[%s6873_s28 + $0x660] sm:$0xff]  ;;  %v316_v5 = vld [vmem:[%s6873_s28 + $0x668] sm:$0xff] }
  0x37   : > { %309 = vst [vmem:[%s6881_s29 + $0x208] sm:$0xff] %v308_v1  ;;  %311 = vst [vmem:[%s6881_s29 + $0x210] sm:$0xff] %v310_v2  ;;  %v318_v6 = vld [vmem:[%s6873_s28 + $0x690] sm:$0xff]  ;;  %v320_v7 = vld [vmem:[%s6873_s28 + $0x698] sm:$0xff] }
  0x38   : > { %313 = vst [vmem:[%s6881_s29 + $0x218] sm:$0xff] %v312_v3  ;;  %315 = vst [vmem:[%s6881_s29 + $0x220] sm:$0xff] %v314_v4  ;;  %v322_v8 = vld [vmem:[%s6873_s28 + $0x6c0] sm:$0xff]  ;;  %v324_v9 = vld [vmem:[%s6873_s28 + $0x6c8] sm:$0xff] }
  0x39   : > { %317 = vst [vmem:[%s6881_s29 + $0x228] sm:$0xff] %v316_v5  ;;  %319 = vst [vmem:[%s6881_s29 + $0x230] sm:$0xff] %v318_v6  ;;  %v326_v10 = vld [vmem:[%s6873_s28 + $0x6f0] sm:$0xff]  ;;  %v328_v11 = vld [vmem:[%s6873_s28 + $0x6f8] sm:$0xff] }
  0x3a   : > { %321 = vst [vmem:[%s6881_s29 + $0x238] sm:$0xff] %v320_v7  ;;  %323 = vst [vmem:[%s6881_s29 + $0x240] sm:$0xff] %v322_v8  ;;  %v330_v12 = vld [vmem:[%s6873_s28 + $0x720] sm:$0xff]  ;;  %v332_v13 = vld [vmem:[%s6873_s28 + $0x728] sm:$0xff] }
  0x3b   : > { %325 = vst [vmem:[%s6881_s29 + $0x248] sm:$0xff] %v324_v9  ;;  %327 = vst [vmem:[%s6881_s29 + $0x250] sm:$0xff] %v326_v10  ;;  %v334_v14 = vld [vmem:[%s6873_s28 + $0x750] sm:$0xff]  ;;  %v336_v15 = vld [vmem:[%s6873_s28 + $0x758] sm:$0xff] }
  0x3c   : > { %329 = vst [vmem:[%s6881_s29 + $0x258] sm:$0xff] %v328_v11  ;;  %331 = vst [vmem:[%s6881_s29 + $0x260] sm:$0xff] %v330_v12  ;;  %v338_v16 = vld [vmem:[%s6873_s28 + $0x780] sm:$0xff]  ;;  %v340_v17 = vld [vmem:[%s6873_s28 + $0x788] sm:$0xff] }
  0x3d   : > { %333 = vst [vmem:[%s6881_s29 + $0x268] sm:$0xff] %v332_v13  ;;  %335 = vst [vmem:[%s6881_s29 + $0x270] sm:$0xff] %v334_v14  ;;  %v342_v18 = vld [vmem:[%s6873_s28 + $0x7b0] sm:$0xff]  ;;  %v344_v19 = vld [vmem:[%s6873_s28 + $0x7b8] sm:$0xff] }
  0x3e   : > { %337 = vst [vmem:[%s6881_s29 + $0x278] sm:$0xff] %v336_v15  ;;  %339 = vst [vmem:[%s6881_s29 + $0x280] sm:$0xff] %v338_v16  ;;  %v346_v20 = vld [vmem:[%s6873_s28 + $0x7e0] sm:$0xff]  ;;  %v348_v21 = vld [vmem:[%s6873_s28 + $0x7e8] sm:$0xff] }
  0x3f   : > { %341 = vst [vmem:[%s6881_s29 + $0x288] sm:$0xff] %v340_v17  ;;  %343 = vst [vmem:[%s6881_s29 + $0x290] sm:$0xff] %v342_v18  ;;  %v350_v22 = vld [vmem:[%s6873_s28 + $0x810] sm:$0xff]  ;;  %v352_v23 = vld [vmem:[%s6873_s28 + $0x818] sm:$0xff] }
  0x40   : > { %345 = vst [vmem:[%s6881_s29 + $0x298] sm:$0xff] %v344_v19  ;;  %347 = vst [vmem:[%s6881_s29 + $0x2a0] sm:$0xff] %v346_v20  ;;  %v354_v24 = vld [vmem:[%s6873_s28 + $0x840] sm:$0xff]  ;;  %v356_v25 = vld [vmem:[%s6873_s28 + $0x848] sm:$0xff] }
  0x41   : > { %349 = vst [vmem:[%s6881_s29 + $0x2a8] sm:$0xff] %v348_v21  ;;  %351 = vst [vmem:[%s6881_s29 + $0x2b0] sm:$0xff] %v350_v22  ;;  %v358_v26 = vld [vmem:[%s6873_s28 + $0x870] sm:$0xff]  ;;  %v360_v27 = vld [vmem:[%s6873_s28 + $0x878] sm:$0xff] }
  0x42   : > { %353 = vst [vmem:[%s6881_s29 + $0x2b8] sm:$0xff] %v352_v23  ;;  %355 = vst [vmem:[%s6881_s29 + $0x2c0] sm:$0xff] %v354_v24  ;;  %v362_v28 = vld [vmem:[%s6873_s28 + $0x8a0] sm:$0xff]  ;;  %v364_v29 = vld [vmem:[%s6873_s28 + $0x8a8] sm:$0xff] }
  0x43   : > { %357 = vst [vmem:[%s6881_s29 + $0x2c8] sm:$0xff] %v356_v25  ;;  %359 = vst [vmem:[%s6881_s29 + $0x2d0] sm:$0xff] %v358_v26  ;;  %v366_v30 = vld [vmem:[%s6873_s28 + $0x8d0] sm:$0xff]  ;;  %v368_v31 = vld [vmem:[%s6873_s28 + $0x8d8] sm:$0xff] }
  0x44   : > { %361 = vst [vmem:[%s6881_s29 + $0x2d8] sm:$0xff] %v360_v27  ;;  %363 = vst [vmem:[%s6881_s29 + $0x2e0] sm:$0xff] %v362_v28  ;;  %v370_v32 = vld [vmem:[%s6873_s28 + $0x900] sm:$0xff]  ;;  %v372_v33 = vld [vmem:[%s6873_s28 + $0x908] sm:$0xff] }
  0x45   : > { %365 = vst [vmem:[%s6881_s29 + $0x2e8] sm:$0xff] %v364_v29  ;;  %367 = vst [vmem:[%s6881_s29 + $0x2f0] sm:$0xff] %v366_v30  ;;  %v374_v34 = vld [vmem:[%s6873_s28 + $0x930] sm:$0xff]  ;;  %v376_v35 = vld [vmem:[%s6873_s28 + $0x938] sm:$0xff] }
  0x46   : > { %369 = vst [vmem:[%s6881_s29 + $0x2f8] sm:$0xff] %v368_v31  ;;  %371 = vst [vmem:[%s6881_s29 + $0x300] sm:$0xff] %v370_v32  ;;  %v378_v36 = vld [vmem:[%s6873_s28 + $0x960] sm:$0xff]  ;;  %v380_v37 = vld [vmem:[%s6873_s28 + $0x968] sm:$0xff] }
  0x47   : > { %373 = vst [vmem:[%s6881_s29 + $0x308] sm:$0xff] %v372_v33  ;;  %375 = vst [vmem:[%s6881_s29 + $0x310] sm:$0xff] %v374_v34  ;;  %v382_v38 = vld [vmem:[%s6873_s28 + $0x990] sm:$0xff]  ;;  %v384_v39 = vld [vmem:[%s6873_s28 + $0x998] sm:$0xff] }
  0x48   : > { %377 = vst [vmem:[%s6881_s29 + $0x318] sm:$0xff] %v376_v35  ;;  %379 = vst [vmem:[%s6881_s29 + $0x320] sm:$0xff] %v378_v36  ;;  %v386_v40 = vld [vmem:[%s6873_s28 + $0x9c0] sm:$0xff]  ;;  %v388_v41 = vld [vmem:[%s6873_s28 + $0x9c8] sm:$0xff] }
  0x49   : > { %381 = vst [vmem:[%s6881_s29 + $0x328] sm:$0xff] %v380_v37  ;;  %383 = vst [vmem:[%s6881_s29 + $0x330] sm:$0xff] %v382_v38  ;;  %v390_v42 = vld [vmem:[%s6873_s28 + $0x9f0] sm:$0xff]  ;;  %v392_v43 = vld [vmem:[%s6873_s28 + $0x9f8] sm:$0xff] }
  0x4a   : > { %385 = vst [vmem:[%s6881_s29 + $0x338] sm:$0xff] %v384_v39  ;;  %387 = vst [vmem:[%s6881_s29 + $0x340] sm:$0xff] %v386_v40  ;;  %v394_v44 = vld [vmem:[%s6873_s28 + $0xa20] sm:$0xff]  ;;  %v396_v45 = vld [vmem:[%s6873_s28 + $0xa28] sm:$0xff] }
  0x4b   : > { %389 = vst [vmem:[%s6881_s29 + $0x348] sm:$0xff] %v388_v41  ;;  %391 = vst [vmem:[%s6881_s29 + $0x350] sm:$0xff] %v390_v42  ;;  %v398_v46 = vld [vmem:[%s6873_s28 + $0xa50] sm:$0xff]  ;;  %v400_v47 = vld [vmem:[%s6873_s28 + $0xa58] sm:$0xff] }
  0x4c   : > { %393 = vst [vmem:[%s6881_s29 + $0x358] sm:$0xff] %v392_v43  ;;  %395 = vst [vmem:[%s6881_s29 + $0x360] sm:$0xff] %v394_v44  ;;  %v402_v48 = vld [vmem:[%s6873_s28 + $0xa80] sm:$0xff]  ;;  %v404_v49 = vld [vmem:[%s6873_s28 + $0xa88] sm:$0xff] }
  0x4d   : > { %397 = vst [vmem:[%s6881_s29 + $0x368] sm:$0xff] %v396_v45  ;;  %399 = vst [vmem:[%s6881_s29 + $0x370] sm:$0xff] %v398_v46  ;;  %v406_v50 = vld [vmem:[%s6873_s28 + $0xab0] sm:$0xff]  ;;  %v408_v51 = vld [vmem:[%s6873_s28 + $0xab8] sm:$0xff] }
  0x4e   : > { %401 = vst [vmem:[%s6881_s29 + $0x378] sm:$0xff] %v400_v47  ;;  %403 = vst [vmem:[%s6881_s29 + $0x380] sm:$0xff] %v402_v48  ;;  %v410_v52 = vld [vmem:[%s6873_s28 + $0xae0] sm:$0xff]  ;;  %v412_v53 = vld [vmem:[%s6873_s28 + $0xae8] sm:$0xff] }
  0x4f   : > { %405 = vst [vmem:[%s6881_s29 + $0x388] sm:$0xff] %v404_v49  ;;  %407 = vst [vmem:[%s6881_s29 + $0x390] sm:$0xff] %v406_v50  ;;  %v414_v54 = vld [vmem:[%s6873_s28 + $0xb10] sm:$0xff]  ;;  %v416_v55 = vld [vmem:[%s6873_s28 + $0xb18] sm:$0xff] }
  0x50   : > { %409 = vst [vmem:[%s6881_s29 + $0x398] sm:$0xff] %v408_v51  ;;  %411 = vst [vmem:[%s6881_s29 + $0x3a0] sm:$0xff] %v410_v52  ;;  %v418_v56 = vld [vmem:[%s6873_s28 + $0xb40] sm:$0xff]  ;;  %v420_v57 = vld [vmem:[%s6873_s28 + $0xb48] sm:$0xff] }
  0x51   : > { %413 = vst [vmem:[%s6881_s29 + $0x3a8] sm:$0xff] %v412_v53  ;;  %415 = vst [vmem:[%s6881_s29 + $0x3b0] sm:$0xff] %v414_v54  ;;  %v422_v58 = vld [vmem:[%s6873_s28 + $0xb70] sm:$0xff]  ;;  %v424_v59 = vld [vmem:[%s6873_s28 + $0xb78] sm:$0xff] }
  0x52   : > { %417 = vst [vmem:[%s6881_s29 + $0x3b8] sm:$0xff] %v416_v55  ;;  %419 = vst [vmem:[%s6881_s29 + $0x3c0] sm:$0xff] %v418_v56  ;;  %v426_v60 = vld [vmem:[%s6873_s28 + $0xba0] sm:$0xff]  ;;  %v428_v61 = vld [vmem:[%s6873_s28 + $0xba8] sm:$0xff] }
  0x53   : > { %421 = vst [vmem:[%s6881_s29 + $0x3c8] sm:$0xff] %v420_v57  ;;  %423 = vst [vmem:[%s6881_s29 + $0x3d0] sm:$0xff] %v422_v58  ;;  %v430_v62 = vld [vmem:[%s6873_s28 + $0xbd0] sm:$0xff]  ;;  %v432_v63 = vld [vmem:[%s6873_s28 + $0xbd8] sm:$0xff] }
  0x54   : > { %425 = vst [vmem:[%s6881_s29 + $0x3d8] sm:$0xff] %v424_v59  ;;  %427 = vst [vmem:[%s6881_s29 + $0x3e0] sm:$0xff] %v426_v60  ;;  %v434_v0 = vld [vmem:[%s6873_s28 + $0xc00] sm:$0xff]  ;;  %v436_v1 = vld [vmem:[%s6873_s28 + $0xc08] sm:$0xff] }
  0x55   : > { %429 = vst [vmem:[%s6881_s29 + $0x3e8] sm:$0xff] %v428_v61  ;;  %431 = vst [vmem:[%s6881_s29 + $0x3f0] sm:$0xff] %v430_v62  ;;  %v438_v2 = vld [vmem:[%s6873_s28 + $0xc30] sm:$0xff]  ;;  %v440_v3 = vld [vmem:[%s6873_s28 + $0xc38] sm:$0xff] }
  0x56   : > { %433 = vst [vmem:[%s6881_s29 + $0x3f8] sm:$0xff] %v432_v63  ;;  %435 = vst [vmem:[%s6881_s29 + $0x400] sm:$0xff] %v434_v0  ;;  %v442_v4 = vld [vmem:[%s6873_s28 + $0xc60] sm:$0xff]  ;;  %v444_v5 = vld [vmem:[%s6873_s28 + $0xc68] sm:$0xff] }
  0x57   : > { %437 = vst [vmem:[%s6881_s29 + $0x408] sm:$0xff] %v436_v1  ;;  %439 = vst [vmem:[%s6881_s29 + $0x410] sm:$0xff] %v438_v2  ;;  %v446_v6 = vld [vmem:[%s6873_s28 + $0xc90] sm:$0xff]  ;;  %v448_v7 = vld [vmem:[%s6873_s28 + $0xc98] sm:$0xff] }
  0x58   : > { %441 = vst [vmem:[%s6881_s29 + $0x418] sm:$0xff] %v440_v3  ;;  %443 = vst [vmem:[%s6881_s29 + $0x420] sm:$0xff] %v442_v4  ;;  %v450_v8 = vld [vmem:[%s6873_s28 + $0xcc0] sm:$0xff]  ;;  %v452_v9 = vld [vmem:[%s6873_s28 + $0xcc8] sm:$0xff] }
  0x59   : > { %445 = vst [vmem:[%s6881_s29 + $0x428] sm:$0xff] %v444_v5  ;;  %447 = vst [vmem:[%s6881_s29 + $0x430] sm:$0xff] %v446_v6  ;;  %v454_v10 = vld [vmem:[%s6873_s28 + $0xcf0] sm:$0xff]  ;;  %v456_v11 = vld [vmem:[%s6873_s28 + $0xcf8] sm:$0xff] }
  0x5a   : > { %449 = vst [vmem:[%s6881_s29 + $0x438] sm:$0xff] %v448_v7  ;;  %451 = vst [vmem:[%s6881_s29 + $0x440] sm:$0xff] %v450_v8  ;;  %v458_v12 = vld [vmem:[%s6873_s28 + $0xd20] sm:$0xff]  ;;  %v460_v13 = vld [vmem:[%s6873_s28 + $0xd28] sm:$0xff] }
  0x5b   : > { %453 = vst [vmem:[%s6881_s29 + $0x448] sm:$0xff] %v452_v9  ;;  %455 = vst [vmem:[%s6881_s29 + $0x450] sm:$0xff] %v454_v10  ;;  %v462_v14 = vld [vmem:[%s6873_s28 + $0xd50] sm:$0xff]  ;;  %v464_v15 = vld [vmem:[%s6873_s28 + $0xd58] sm:$0xff] }
  0x5c   : > { %457 = vst [vmem:[%s6881_s29 + $0x458] sm:$0xff] %v456_v11  ;;  %459 = vst [vmem:[%s6881_s29 + $0x460] sm:$0xff] %v458_v12  ;;  %v466_v16 = vld [vmem:[%s6873_s28 + $0xd80] sm:$0xff]  ;;  %v468_v17 = vld [vmem:[%s6873_s28 + $0xd88] sm:$0xff] }
  0x5d   : > { %461 = vst [vmem:[%s6881_s29 + $0x468] sm:$0xff] %v460_v13  ;;  %463 = vst [vmem:[%s6881_s29 + $0x470] sm:$0xff] %v462_v14  ;;  %v470_v18 = vld [vmem:[%s6873_s28 + $0xdb0] sm:$0xff]  ;;  %v472_v19 = vld [vmem:[%s6873_s28 + $0xdb8] sm:$0xff] }
  0x5e   : > { %465 = vst [vmem:[%s6881_s29 + $0x478] sm:$0xff] %v464_v15  ;;  %467 = vst [vmem:[%s6881_s29 + $0x480] sm:$0xff] %v466_v16  ;;  %v474_v20 = vld [vmem:[%s6873_s28 + $0xde0] sm:$0xff]  ;;  %v476_v21 = vld [vmem:[%s6873_s28 + $0xde8] sm:$0xff] }
  0x5f   : > { %469 = vst [vmem:[%s6881_s29 + $0x488] sm:$0xff] %v468_v17  ;;  %471 = vst [vmem:[%s6881_s29 + $0x490] sm:$0xff] %v470_v18  ;;  %v478_v22 = vld [vmem:[%s6873_s28 + $0xe10] sm:$0xff]  ;;  %v480_v23 = vld [vmem:[%s6873_s28 + $0xe18] sm:$0xff] }
  0x60   : > { %473 = vst [vmem:[%s6881_s29 + $0x498] sm:$0xff] %v472_v19  ;;  %475 = vst [vmem:[%s6881_s29 + $0x4a0] sm:$0xff] %v474_v20  ;;  %v482_v24 = vld [vmem:[%s6873_s28 + $0xe40] sm:$0xff]  ;;  %v484_v25 = vld [vmem:[%s6873_s28 + $0xe48] sm:$0xff] }
  0x61   : > { %477 = vst [vmem:[%s6881_s29 + $0x4a8] sm:$0xff] %v476_v21  ;;  %479 = vst [vmem:[%s6881_s29 + $0x4b0] sm:$0xff] %v478_v22  ;;  %v486_v26 = vld [vmem:[%s6873_s28 + $0xe70] sm:$0xff]  ;;  %v488_v27 = vld [vmem:[%s6873_s28 + $0xe78] sm:$0xff] }
  0x62   : > { %481 = vst [vmem:[%s6881_s29 + $0x4b8] sm:$0xff] %v480_v23  ;;  %483 = vst [vmem:[%s6881_s29 + $0x4c0] sm:$0xff] %v482_v24  ;;  %v490_v28 = vld [vmem:[%s6873_s28 + $0xea0] sm:$0xff]  ;;  %v492_v29 = vld [vmem:[%s6873_s28 + $0xea8] sm:$0xff] }
  0x63   : > { %485 = vst [vmem:[%s6881_s29 + $0x4c8] sm:$0xff] %v484_v25  ;;  %487 = vst [vmem:[%s6881_s29 + $0x4d0] sm:$0xff] %v486_v26  ;;  %v494_v30 = vld [vmem:[%s6873_s28 + $0xed0] sm:$0xff]  ;;  %v496_v31 = vld [vmem:[%s6873_s28 + $0xed8] sm:$0xff] }
  0x64   : > { %489 = vst [vmem:[%s6881_s29 + $0x4d8] sm:$0xff] %v488_v27  ;;  %491 = vst [vmem:[%s6881_s29 + $0x4e0] sm:$0xff] %v490_v28  ;;  %v498_v32 = vld [vmem:[%s6873_s28 + $0xf00] sm:$0xff]  ;;  %v500_v33 = vld [vmem:[%s6873_s28 + $0xf08] sm:$0xff] }
  0x65   : > { %493 = vst [vmem:[%s6881_s29 + $0x4e8] sm:$0xff] %v492_v29  ;;  %495 = vst [vmem:[%s6881_s29 + $0x4f0] sm:$0xff] %v494_v30  ;;  %v502_v34 = vld [vmem:[%s6873_s28 + $0xf30] sm:$0xff]  ;;  %v504_v35 = vld [vmem:[%s6873_s28 + $0xf38] sm:$0xff] }
  0x66   : > { %497 = vst [vmem:[%s6881_s29 + $0x4f8] sm:$0xff] %v496_v31  ;;  %499 = vst [vmem:[%s6881_s29 + $0x500] sm:$0xff] %v498_v32  ;;  %v506_v36 = vld [vmem:[%s6873_s28 + $0xf60] sm:$0xff]  ;;  %v508_v37 = vld [vmem:[%s6873_s28 + $0xf68] sm:$0xff] }
  0x67   : > { %501 = vst [vmem:[%s6881_s29 + $0x508] sm:$0xff] %v500_v33  ;;  %503 = vst [vmem:[%s6881_s29 + $0x510] sm:$0xff] %v502_v34  ;;  %v510_v38 = vld [vmem:[%s6873_s28 + $0xf90] sm:$0xff]  ;;  %v512_v39 = vld [vmem:[%s6873_s28 + $0xf98] sm:$0xff] }
  0x68   : > { %505 = vst [vmem:[%s6881_s29 + $0x518] sm:$0xff] %v504_v35  ;;  %507 = vst [vmem:[%s6881_s29 + $0x520] sm:$0xff] %v506_v36  ;;  %v514_v40 = vld [vmem:[%s6873_s28 + $0xfc0] sm:$0xff]  ;;  %v516_v41 = vld [vmem:[%s6873_s28 + $0xfc8] sm:$0xff] }
  0x69   : > { %509 = vst [vmem:[%s6881_s29 + $0x528] sm:$0xff] %v508_v37  ;;  %511 = vst [vmem:[%s6881_s29 + $0x530] sm:$0xff] %v510_v38  ;;  %v518_v42 = vld [vmem:[%s6873_s28 + $0xff0] sm:$0xff]  ;;  %v520_v43 = vld [vmem:[%s6873_s28 + $0xff8] sm:$0xff] }
  0x6a   : > { %513 = vst [vmem:[%s6881_s29 + $0x538] sm:$0xff] %v512_v39  ;;  %515 = vst [vmem:[%s6881_s29 + $0x540] sm:$0xff] %v514_v40  ;;  %v522_v44 = vld [vmem:[%s6873_s28 + $0x1020] sm:$0xff]  ;;  %v524_v45 = vld [vmem:[%s6873_s28 + $0x1028] sm:$0xff] }
  0x6b   : > { %517 = vst [vmem:[%s6881_s29 + $0x548] sm:$0xff] %v516_v41  ;;  %519 = vst [vmem:[%s6881_s29 + $0x550] sm:$0xff] %v518_v42  ;;  %v526_v46 = vld [vmem:[%s6873_s28 + $0x1050] sm:$0xff]  ;;  %v528_v47 = vld [vmem:[%s6873_s28 + $0x1058] sm:$0xff] }
  0x6c   : > { %521 = vst [vmem:[%s6881_s29 + $0x558] sm:$0xff] %v520_v43  ;;  %523 = vst [vmem:[%s6881_s29 + $0x560] sm:$0xff] %v522_v44  ;;  %v530_v48 = vld [vmem:[%s6873_s28 + $0x1080] sm:$0xff]  ;;  %v532_v49 = vld [vmem:[%s6873_s28 + $0x1088] sm:$0xff] }
  0x6d   : > { %525 = vst [vmem:[%s6881_s29 + $0x568] sm:$0xff] %v524_v45  ;;  %527 = vst [vmem:[%s6881_s29 + $0x570] sm:$0xff] %v526_v46  ;;  %v534_v50 = vld [vmem:[%s6873_s28 + $0x10b0] sm:$0xff]  ;;  %v536_v51 = vld [vmem:[%s6873_s28 + $0x10b8] sm:$0xff] }
  0x6e   : > { %529 = vst [vmem:[%s6881_s29 + $0x578] sm:$0xff] %v528_v47  ;;  %531 = vst [vmem:[%s6881_s29 + $0x580] sm:$0xff] %v530_v48  ;;  %v538_v52 = vld [vmem:[%s6873_s28 + $0x10e0] sm:$0xff]  ;;  %v540_v53 = vld [vmem:[%s6873_s28 + $0x10e8] sm:$0xff] }
  0x6f   : > { %533 = vst [vmem:[%s6881_s29 + $0x588] sm:$0xff] %v532_v49  ;;  %535 = vst [vmem:[%s6881_s29 + $0x590] sm:$0xff] %v534_v50  ;;  %v542_v54 = vld [vmem:[%s6873_s28 + $0x1110] sm:$0xff]  ;;  %v544_v55 = vld [vmem:[%s6873_s28 + $0x1118] sm:$0xff] }
  0x70   : > { %537 = vst [vmem:[%s6881_s29 + $0x598] sm:$0xff] %v536_v51  ;;  %539 = vst [vmem:[%s6881_s29 + $0x5a0] sm:$0xff] %v538_v52  ;;  %v546_v56 = vld [vmem:[%s6873_s28 + $0x1140] sm:$0xff]  ;;  %v548_v57 = vld [vmem:[%s6873_s28 + $0x1148] sm:$0xff] }
  0x71   : > { %541 = vst [vmem:[%s6881_s29 + $0x5a8] sm:$0xff] %v540_v53  ;;  %543 = vst [vmem:[%s6881_s29 + $0x5b0] sm:$0xff] %v542_v54  ;;  %v550_v58 = vld [vmem:[%s6873_s28 + $0x1170] sm:$0xff]  ;;  %v552_v59 = vld [vmem:[%s6873_s28 + $0x1178] sm:$0xff] }
  0x72   : > { %545 = vst [vmem:[%s6881_s29 + $0x5b8] sm:$0xff] %v544_v55  ;;  %547 = vst [vmem:[%s6881_s29 + $0x5c0] sm:$0xff] %v546_v56  ;;  %v554_v60 = vld [vmem:[%s6873_s28 + $0x11a0] sm:$0xff]  ;;  %v556_v61 = vld [vmem:[%s6873_s28 + $0x11a8] sm:$0xff] }
  0x73   : > { %549 = vst [vmem:[%s6881_s29 + $0x5c8] sm:$0xff] %v548_v57  ;;  %551 = vst [vmem:[%s6881_s29 + $0x5d0] sm:$0xff] %v550_v58  ;;  %v558_v62 = vld [vmem:[%s6873_s28 + $0x11d0] sm:$0xff]  ;;  %v560_v63 = vld [vmem:[%s6873_s28 + $0x11d8] sm:$0xff] }
  0x74   : > { %553 = vst [vmem:[%s6881_s29 + $0x5d8] sm:$0xff] %v552_v59  ;;  %555 = vst [vmem:[%s6881_s29 + $0x5e0] sm:$0xff] %v554_v60 }
  0x75   : > { %557 = vst [vmem:[%s6881_s29 + $0x5e8] sm:$0xff] %v556_v61  ;;  %559 = vst [vmem:[%s6881_s29 + $0x5f0] sm:$0xff] %v558_v62 }
  0x76   : > { %561 = vst [vmem:[%s6881_s29 + $0x5f8] sm:$0xff] %v560_v63 }
  0x77 PF: > { %p5417_p8 = scmp.ge.s32.totalorder %s6803_s16, 1  ;;  %p574_p9 = scmp.lt.s32.totalorder %s6803_s16, 4 }
  0x79   : > { %p575_p10 = pnand %p5417_p8, %p574_p9 }
  0x7b   : > { %578 = sbr.rel (%p575_p10) target bundleno = 1039 (0x40f), region = 51 }
  0x82   : > { %s581_s30 = sand.u32 1, %s6787_s12   ;;  %v629_v0 = vld [vmem:[%s10347_s0 + $0x8] sm:$0xff]  ;;  %v631_v1 = vld [vmem:[%s10347_s0 + $0x18] sm:$0xff]  ;;  %v628_v2 = vld [vmem:[%s10347_s0] sm:$0xff]  ;;  %s5419_s27 = sshll.u32 %s6795_s14, 1 }
  0x83   : > { %s6724_s10 = smul.u32 1536, %s581_s30  ;;  %v7275_v3 = vand.u32 4294901760, %v629_v0  ;;  %v7277_v4 = vand.u32 4294901760, %v631_v1  ;;  %v7279_v5 = vand.u32 4294901760, %v628_v2  ;;  %v630_v6 = vld [vmem:[%s10347_s0 + $0x10] sm:$0xff]  ;;  %p622_p11 = scmp.lt.s32.totalorder %s5419_s27, 5 }
  0x84   : > { %v7284_v7 = vand.u32 4294901760, %v630_v6  ;;  %s5418_s5 = sshll.u32 %s581_s30, 6  ;;  %s5426_s12 = sshll.u32 (%p6860_p6), %s6795_s14, 4 }
  0x85   : > { %11173 = vst [vmem:[#allocation4_spill] sm:$0xff] %v7275_v3  ;;  %11174 = vst [vmem:[#allocation5_spill] sm:$0xff] %v7277_v4  ;;  %s7286_s19 = scalar_lea.vmem [#allocation2], %s6724_s10  ;;  %v7292_v11 = vsub.f32 %v629_v0, %v7275_v3  ;;  %v7295_v12 = vsub.f32 %v631_v1, %v7277_v4  ;;  %v7301_v19 = vsub.f32 %v628_v2, %v7279_v5  ;;  %s12507_s27 = smov (!%p622_p11, %s5419_s27), 5 }
  0x86   : > { %11175 = vst [vmem:[#allocation6_spill] sm:$0xff] %v7279_v5  ;;  %11176 = vst [vmem:[#allocation7_spill] sm:$0xff] %v7284_v7  ;;  %v653_v8 = vld [vmem:[%s7286_s19 + $0x8] sm:$0xff]  ;;  %v655_v9 = vld [vmem:[%s7286_s19 + $0x18] sm:$0xff]  ;;  %v7307_v26 = vsub.f32 %v630_v6, %v7284_v7  ;;  %s624_s4 = scalar_lea.vmem %s10349_s2, %s12507_s27  ;;  %s10308_s6 = scalar_lea.vmem [#allocation3], %s5418_s5 }
  0x87   : > { %v717_v10 = vld [vmem:[%s7286_s19 + $0x208] sm:$0xff]  ;;  %11177 = vst [vmem:[#allocation8_spill] sm:$0xff] %v7292_v11  ;;  %11178 = vst [vmem:[#allocation9_spill] sm:$0xff] %v7295_v12  ;;  %v856_v13 = vand.u32 4294901760, %v653_v8  ;;  %v860_v14 = vand.u32 4294901760, %v655_v9  ;;  %v719_v15 = vld [vmem:[%s7286_s19 + $0x218] sm:$0xff]  ;;  %s5286_s7 = scalar_lea.vmem (%p6860_p6), %s10350_s3, %s5426_s12 }
  0x88   : > { %v2326_v16 = vand.u32 4294901760, %v717_v10  ;;  %v652_v17 = vld [vmem:[%s7286_s19] sm:$0xff]  ;;  %v654_v18 = vld [vmem:[%s7286_s19 + $0x10] sm:$0xff]  ;;  %11179 = vst [vmem:[#allocation10_spill] sm:$0xff] %v7301_v19  ;;  %v2330_v20 = vand.u32 4294901760, %v719_v15  ;;  %v657_v25 = vld [vmem:[%s7286_s19 + $0x28] sm:$0xff] }
  0x89   : > { %v858_v21 = vand.u32 4294901760, %v652_v17  ;;  %v862_v22 = vand.u32 4294901760, %v654_v18  ;;  %v716_v23 = vld [vmem:[%s7286_s19 + $0x200] sm:$0xff]  ;;  %v718_v24 = vld [vmem:[%s7286_s19 + $0x210] sm:$0xff]  ;;  %11180 = vst [vmem:[#allocation11_spill] sm:$0xff] %v7307_v26  ;;  %v7309_v27 = vpack.c.bf16 %v860_v14, %v856_v13  ;;  %v7311_v28 = vsub.f32 %v653_v8, %v856_v13  ;;  %v659_v31 = vld [vmem:[%s7286_s19 + $0x38] sm:$0xff] }
  0x8a   : > { %v7313_v29 = vsub.f32 %v655_v9, %v860_v14  ;;  %v7315_v30 = vsub.f32 %v717_v10, %v2326_v16  ;;  %v721_v32 = vld [vmem:[%s7286_s19 + $0x228] sm:$0xff]  ;;  %v723_v33 = vld [vmem:[%s7286_s19 + $0x238] sm:$0xff]  ;;  %v7320_v34 = vpack.c.bf16 %v2330_v20, %v2326_v16  ;;  %v7322_v35 = vsub.f32 %v719_v15, %v2330_v20  ;;  %v656_v38 = vld [vmem:[%s7286_s19 + $0x20] sm:$0xff] }
  0x8b   : > { %11181 = vst [vmem:[#allocation12_spill] sm:$0xff] %v7309_v27  ;;  %v7324_v36 = vpack.c.bf16 %v862_v22, %v858_v21  ;;  %v7326_v37 = vsub.f32 %v652_v17, %v858_v21  ;;  %5428 = vmatprep.subr.bf16.mxu1 %v7309_v27  ;;  %v7330_v39 = vsub.f32 %v654_v18, %v862_v22  ;;  %v2328_v40 = vand.u32 4294901760, %v716_v23  ;;  %v658_v43 = vld [vmem:[%s7286_s19 + $0x30] sm:$0xff]  ;;  %v720_v48 = vld [vmem:[%s7286_s19 + $0x220] sm:$0xff]  ;;  %v661_v54 = vld [vmem:[%s7286_s19 + $0x48] sm:$0xff] }
  0x8c   : > { %11182 = vst [vmem:[#allocation13_spill] sm:$0xff] %v7315_v30  ;;  %11183 = vst [vmem:[#allocation14_spill] sm:$0xff] %v7320_v34  ;;  %v2332_v41 = vand.u32 4294901760, %v718_v24  ;;  %v864_v42 = vand.u32 4294901760, %v657_v25  ;;  %6004 = vmatprep.subr.bf16.mxu0 %v7320_v34  ;;  %v868_v44 = vand.u32 4294901760, %v659_v31  ;;  %v2334_v45 = vand.u32 4294901760, %v721_v32 }
  0x8d   : > { %11184 = vst [vmem:[#allocation15_spill] sm:$0xff] %v7322_v35  ;;  %11185 = vst [vmem:[#allocation16_spill] sm:$0xff] %v7324_v36  ;;  %5430 = vmatpush1.bf16.msra.mxu1 %v7324_v36  ;;  %v2338_v46 = vand.u32 4294901760, %v723_v33  ;;  %v866_v47 = vand.u32 4294901760, %v656_v38  ;;  %v722_v49 = vld [vmem:[%s7286_s19 + $0x230] sm:$0xff]  ;;  %v7339_v51 = vsub.f32 %v716_v23, %v2328_v40  ;;  %v663_v55 = vld [vmem:[%s7286_s19 + $0x58] sm:$0xff] }
  0x8e   : > { %11186 = vst [vmem:[#allocation17_spill] sm:$0xff] %v7326_v37  ;;  %11187 = vst [vmem:[#allocation18_spill] sm:$0xff] %v7330_v39  ;;  %v7337_v50 = vpack.c.bf16 %v2332_v41, %v2328_v40  ;;  %v7341_v52 = vsub.f32 %v718_v24, %v2332_v41  ;;  %v7343_v53 = vsub.f32 %v657_v25, %v864_v42  ;;  %v725_v56 = vld [vmem:[%s7286_s19 + $0x248] sm:$0xff]  ;;  %v727_v61 = vld [vmem:[%s7286_s19 + $0x258] sm:$0xff]  ;;  %v870_v63 = vand.u32 4294901760, %v658_v43 }
  0x8f   : > { %11189 = vst [vmem:[#allocation20_spill] sm:$0xff] %v7339_v51  ;;  %v7348_v57 = vpack.c.bf16 %v868_v44, %v864_v42  ;;  %v7350_v58 = vsub.f32 %v659_v31, %v868_v44  ;;  %v7352_v59 = vpack.c.bf16 %v2338_v46, %v2334_v45  ;;  %v7354_v60 = vsub.f32 %v721_v32, %v2334_v45  ;;  %v660_v10 = vld [vmem:[%s7286_s19 + $0x40] sm:$0xff]  ;;  %v662_v13 = vld [vmem:[%s7286_s19 + $0x50] sm:$0xff]  ;;  %v665_v21 = vld [vmem:[%s7286_s19 + $0x68] sm:$0xff] }
  0x90   : > { %11188 = vst [vmem:[#allocation19_spill] sm:$0xff] %v7337_v50  ;;  %11190 = vst [vmem:[#allocation21_spill] sm:$0xff] %v7341_v52  ;;  %6006 = vmatpush1.bf16.msra.mxu0 %v7337_v50  ;;  %v7358_v62 = vsub.f32 %v723_v33, %v2338_v46  ;;  %v7360_v0 = vsub.f32 %v656_v38, %v866_v47  ;;  %v2336_v1 = vand.u32 4294901760, %v720_v48  ;;  %v2340_v2 = vand.u32 4294901760, %v722_v49  ;;  %v724_v18 = vld [vmem:[%s7286_s19 + $0x240] sm:$0xff]  ;;  %v726_v20 = vld [vmem:[%s7286_s19 + $0x250] sm:$0xff] }
  0x91   : > { %11191 = vst [vmem:[#allocation22_spill] sm:$0xff] %v7343_v53  ;;  %11192 = vst [vmem:[#allocation23_spill] sm:$0xff] %v7348_v57  ;;  %5432 = vmatprep.subr.bf16.mxu1 %v7348_v57  ;;  %6008 = vmatprep.subr.bf16.mxu0 %v7352_v59  ;;  %v872_v6 = vand.u32 4294901760, %v661_v54  ;;  %v876_v8 = vand.u32 4294901760, %v663_v55  ;;  %v2342_v9 = vand.u32 4294901760, %v725_v56  ;;  %v7366_v14 = vpack.c.bf16 %v870_v63, %v866_v47  ;;  %v667_v31 = vld [vmem:[%s7286_s19 + $0x78] sm:$0xff] }
  0x92   : > { %11193 = vst [vmem:[#allocation24_spill] sm:$0xff] %v7350_v58  ;;  %11194 = vst [vmem:[#allocation25_spill] sm:$0xff] %v7352_v59  ;;  %v7368_v15 = vsub.f32 %v658_v43, %v870_v63  ;;  %v7370_v16 = vsub.f32 %v720_v48, %v2336_v1  ;;  %v2346_v17 = vand.u32 4294901760, %v727_v61  ;;  %v7375_v22 = vpack.c.bf16 %v2340_v2, %v2336_v1  ;;  %v729_v32 = vld [vmem:[%s7286_s19 + $0x268] sm:$0xff]  ;;  %v731_v33 = vld [vmem:[%s7286_s19 + $0x278] sm:$0xff] }
  0x93   : > { %11195 = vst [vmem:[#allocation26_spill] sm:$0xff] %v7354_v60  ;;  %11196 = vst [vmem:[#allocation27_spill] sm:$0xff] %v7358_v62  ;;  %v7377_v23 = vsub.f32 %v722_v49, %v2340_v2  ;;  %v7379_v24 = vpack.c.bf16 %v876_v8, %v872_v6  ;;  %v7381_v25 = vsub.f32 %v661_v54, %v872_v6  ;;  %5434 = vmatpush1.bf16.msra.mxu1 %v7366_v14  ;;  %v666_v2 = vld [vmem:[%s7286_s19 + $0x70] sm:$0xff]  ;;  %v728_v6 = vld [vmem:[%s7286_s19 + $0x260] sm:$0xff] }
  0x94   : > { %11197 = vst [vmem:[#allocation28_spill] sm:$0xff] %v7360_v0  ;;  %11198 = vst [vmem:[#allocation29_spill] sm:$0xff] %v7366_v14  ;;  %v7387_v38 = vsub.f32 %v663_v55, %v876_v8  ;;  %v7389_v40 = vpack.c.bf16 %v2346_v17, %v2342_v9  ;;  %v7391_v41 = vsub.f32 %v725_v56, %v2342_v9  ;;  %6010 = vmatpush1.bf16.msra.mxu0 %v7375_v22  ;;  %v664_v55 = vld [vmem:[%s7286_s19 + $0x60] sm:$0xff]  ;;  %v730_v8 = vld [vmem:[%s7286_s19 + $0x270] sm:$0xff] }
  0x95   : > { %11199 = vst [vmem:[#allocation30_spill] sm:$0xff] %v7368_v15  ;;  %11200 = vst [vmem:[#allocation31_spill] sm:$0xff] %v7370_v16  ;;  %v7393_v42 = vsub.f32 %v727_v61, %v2346_v17  ;;  %5436 = vmatprep.subr.bf16.mxu1 %v7379_v24  ;;  %v874_v43 = vand.u32 4294901760, %v660_v10  ;;  %v878_v44 = vand.u32 4294901760, %v662_v13  ;;  %v2344_v45 = vand.u32 4294901760, %v724_v18  ;;  %v669_v57 = vld [vmem:[%s7286_s19 + $0x88] sm:$0xff] }
  0x96   : > { %11201 = vst [vmem:[#allocation32_spill] sm:$0xff] %v7375_v22  ;;  %11202 = vst [vmem:[#allocation33_spill] sm:$0xff] %v7377_v23  ;;  %v2348_v46 = vand.u32 4294901760, %v726_v20  ;;  %6012 = vmatprep.subr.bf16.mxu0 %v7389_v40  ;;  %v880_v47 = vand.u32 4294901760, %v665_v21  ;;  %v884_v48 = vand.u32 4294901760, %v667_v31  ;;  %v2350_v49 = vand.u32 4294901760, %v729_v32 }
  0x97   : > { %11203 = vst [vmem:[#allocation34_spill] sm:$0xff] %v7379_v24  ;;  %11204 = vst [vmem:[#allocation35_spill] sm:$0xff] %v7381_v25  ;;  %v2354_v54 = vand.u32 4294901760, %v731_v33  ;;  %v7399_v56 = vpack.c.bf16 %v878_v44, %v874_v43  ;;  %v7401_v61 = vsub.f32 %v660_v10, %v874_v43  ;;  %v7403_v63 = vsub.f32 %v662_v13, %v878_v44  ;;  %v671_v36 = vld [vmem:[%s7286_s19 + $0x98] sm:$0xff]  ;;  %v733_v10 = vld [vmem:[%s7286_s19 + $0x288] sm:$0xff] }
  0x98   : > { %11205 = vst [vmem:[#allocation36_spill] sm:$0xff] %v7387_v38  ;;  %11206 = vst [vmem:[#allocation37_spill] sm:$0xff] %v7389_v40  ;;  %v7405_v1 = vpack.c.bf16 %v2348_v46, %v2344_v45  ;;  %v7410_v9 = vsub.f32 %v724_v18, %v2344_v45  ;;  %v7412_v17 = vsub.f32 %v726_v20, %v2348_v46  ;;  %v882_v43 = vand.u32 4294901760, %v664_v55  ;;  %v670_v27 = vld [vmem:[%s7286_s19 + $0x90] sm:$0xff]  ;;  %v673_v59 = vld [vmem:[%s7286_s19 + $0xa8] sm:$0xff] }
  0x99   : > { %11207 = vst [vmem:[#allocation38_spill] sm:$0xff] %v7391_v41  ;;  %11208 = vst [vmem:[#allocation39_spill] sm:$0xff] %v7393_v42  ;;  %v7414_v24 = vpack.c.bf16 %v884_v48, %v880_v47  ;;  %v7416_v14 = vsub.f32 %v665_v21, %v880_v47  ;;  %5438 = vmatpush1.bf16.msra.mxu1 %v7399_v56  ;;  %v7423_v13 = vsub.f32 %v667_v31, %v884_v48  ;;  %v735_v47 = vld [vmem:[%s7286_s19 + $0x298] sm:$0xff]  ;;  %v734_v22 = vld [vmem:[%s7286_s19 + $0x290] sm:$0xff] }
  0x9a   : > { %11209 = vst [vmem:[#allocation40_spill] sm:$0xff] %v7399_v56  ;;  %11210 = vst [vmem:[#allocation41_spill] sm:$0xff] %v7401_v61  ;;  %6014 = vmatpush1.bf16.msra.mxu0 %v7405_v1  ;;  %v7425_v18 = vpack.c.bf16 %v2354_v54, %v2350_v49  ;;  %v7427_v20 = vsub.f32 %v729_v32, %v2350_v49  ;;  %v7430_v21 = vsub.f32 %v731_v33, %v2354_v54  ;;  %v668_v49 = vld [vmem:[%s7286_s19 + $0x80] sm:$0xff]  ;;  %v675_v50 = vld [vmem:[%s7286_s19 + $0xb8] sm:$0xff] }
  0x9b   : > { %11211 = vst [vmem:[#allocation42_spill] sm:$0xff] %v7403_v63  ;;  %11212 = vst [vmem:[#allocation43_spill] sm:$0xff] %v7405_v1  ;;  %5440 = vmatprep.subr.bf16.mxu1 %v7414_v24  ;;  %v886_v44 = vand.u32 4294901760, %v666_v2  ;;  %v2352_v45 = vand.u32 4294901760, %v728_v6  ;;  %v2356_v46 = vand.u32 4294901760, %v730_v8  ;;  %v7434_v31 = vsub.f32 %v664_v55, %v882_v43  ;;  %v732_v1 = vld [vmem:[%s7286_s19 + $0x280] sm:$0xff] }
  0x9c   : > { %11213 = vst [vmem:[#allocation44_spill] sm:$0xff] %v7410_v9  ;;  %11214 = vst [vmem:[#allocation45_spill] sm:$0xff] %v7412_v17  ;;  %6016 = vmatprep.subr.bf16.mxu0 %v7425_v18  ;;  %v888_v48 = vand.u32 4294901760, %v669_v57  ;;  %v892_v56 = vand.u32 4294901760, %v671_v36  ;;  %v2358_v32 = vand.u32 4294901760, %v733_v10  ;;  %v672_v3 = vld [vmem:[%s7286_s19 + $0xa0] sm:$0xff] }
  0x9d   : > { %11215 = vst [vmem:[#allocation46_spill] sm:$0xff] %v7414_v24  ;;  %11216 = vst [vmem:[#allocation47_spill] sm:$0xff] %v7416_v14  ;;  %v7439_v24 = vpack.c.bf16 %v886_v44, %v882_v43  ;;  %v7441_v33 = vsub.f32 %v666_v2, %v886_v44  ;;  %v7443_v54 = vpack.c.bf16 %v2356_v46, %v2352_v45  ;;  %v2362_v2 = vand.u32 4294901760, %v735_v47  ;;  %v674_v4 = vld [vmem:[%s7286_s19 + $0xb0] sm:$0xff] }
  0x9e   : > { %11217 = vst [vmem:[#allocation48_spill] sm:$0xff] %v7423_v13  ;;  %11218 = vst [vmem:[#allocation49_spill] sm:$0xff] %v7425_v18  ;;  %v7445_v40 = vsub.f32 %v728_v6, %v2352_v45  ;;  %v7450_v55 = vsub.f32 %v730_v8, %v2356_v46  ;;  %v7452_v18 = vpack.c.bf16 %v892_v56, %v888_v48  ;;  %v890_v43 = vand.u32 4294901760, %v668_v49  ;;  %v739_v46 = vld [vmem:[%s7286_s19 + $0x2b8] sm:$0xff] }
  0x9f   : > { %11219 = vst [vmem:[#allocation50_spill] sm:$0xff] %v7427_v20  ;;  %11220 = vst [vmem:[#allocation51_spill] sm:$0xff] %v7430_v21  ;;  %v7454_v5 = vsub.f32 %v669_v57, %v888_v48  ;;  %v7456_v7 = vsub.f32 %v671_v36, %v892_v56  ;;  %5442 = vmatpush1.bf16.msra.mxu1 %v7439_v24  ;;  %6018 = vmatpush1.bf16.msra.mxu0 %v7443_v54  ;;  %v894_v8 = vand.u32 4294901760, %v670_v27  ;;  %v737_v56 = vld [vmem:[%s7286_s19 + $0x2a8] sm:$0xff] }
  0xa0   : > { %11221 = vst [vmem:[#allocation52_spill] sm:$0xff] %v7434_v31  ;;  %11222 = vst [vmem:[#allocation53_spill] sm:$0xff] %v7439_v24  ;;  %v7460_v6 = vsub.f32 %v733_v10, %v2358_v32  ;;  %5444 = vmatprep.subr.bf16.mxu1 %v7452_v18  ;;  %v2360_v44 = vand.u32 4294901760, %v732_v1  ;;  %v2364_v45 = vand.u32 4294901760, %v734_v22  ;;  %v896_v57 = vand.u32 4294901760, %v673_v59 }
  0xa1   : > { %11223 = vst [vmem:[#allocation54_spill] sm:$0xff] %v7441_v33  ;;  %11224 = vst [vmem:[#allocation55_spill] sm:$0xff] %v7443_v54  ;;  %v900_v36 = vand.u32 4294901760, %v675_v50  ;;  %v7465_v48 = vpack.c.bf16 %v2362_v2, %v2358_v32  ;;  %v7467_v24 = vsub.f32 %v735_v47, %v2362_v2  ;;  %v7469_v10 = vpack.c.bf16 %v894_v8, %v890_v43  ;;  %v677_v32 = vld [vmem:[%s7286_s19 + $0xc8] sm:$0xff] }
  0xa2   : > { %11225 = vst [vmem:[#allocation56_spill] sm:$0xff] %v7445_v40  ;;  %11226 = vst [vmem:[#allocation57_spill] sm:$0xff] %v7450_v55  ;;  %v7471_v54 = vsub.f32 %v668_v49, %v890_v43  ;;  %v7476_v34 = vsub.f32 %v670_v27, %v894_v8  ;;  %v738_v55 = vld [vmem:[%s7286_s19 + $0x2b0] sm:$0xff]  ;;  %v679_v40 = vld [vmem:[%s7286_s19 + $0xd8] sm:$0xff]  ;;  %v7491_v49 = vsub.f32 %v673_v59, %v896_v57  ;;  %v2366_v2 = vand.u32 4294901760, %v737_v56 }
  0xa3   : > { %11227 = vst [vmem:[#allocation58_spill] sm:$0xff] %v7452_v18  ;;  %11228 = vst [vmem:[#allocation59_spill] sm:$0xff] %v7454_v5  ;;  %v736_v18 = vld [vmem:[%s7286_s19 + $0x2a0] sm:$0xff]  ;;  %v7482_v5 = vsub.f32 %v734_v22, %v2364_v45  ;;  %6020 = vmatprep.subr.bf16.mxu0 %v7465_v48  ;;  %5446 = vmatpush1.bf16.msra.mxu1 %v7469_v10  ;;  %v7489_v47 = vpack.c.bf16 %v900_v36, %v896_v57  ;;  %v2370_v22 = vand.u32 4294901760, %v739_v46  ;;  %v741_v57 = vld [vmem:[%s7286_s19 + $0x2c8] sm:$0xff] }
  0xa4   : > { %11229 = vst [vmem:[#allocation60_spill] sm:$0xff] %v7456_v7  ;;  %11230 = vst [vmem:[#allocation61_spill] sm:$0xff] %v7460_v6  ;;  %v7478_v6 = vpack.c.bf16 %v2364_v45, %v2360_v44  ;;  %v7480_v7 = vsub.f32 %v732_v1, %v2360_v44  ;;  %v7493_v27 = vsub.f32 %v675_v50, %v900_v36  ;;  %v898_v1 = vand.u32 4294901760, %v672_v3  ;;  %v743_v36 = vld [vmem:[%s7286_s19 + $0x2d8] sm:$0xff] }
  0xa5   : > { %11231 = vst [vmem:[#allocation62_spill] sm:$0xff] %v7465_v48  ;;  %11232 = vst [vmem:[#allocation63_spill] sm:$0xff] %v7467_v24  ;;  %v902_v43 = vand.u32 4294901760, %v674_v4  ;;  %v2368_v8 = vand.u32 4294901760, %v736_v18  ;;  %5448 = vmatprep.subr.bf16.mxu1 %v7489_v47  ;;  %v7497_v44 = vsub.f32 %v737_v56, %v2366_v2  ;;  %v2372_v45 = vand.u32 4294901760, %v738_v55  ;;  %v740_v56 = vld [vmem:[%s7286_s19 + $0x2c0] sm:$0xff] }
  0xa6   : > { %11233 = vst [vmem:[#allocation64_spill] sm:$0xff] %v7469_v10  ;;  %11234 = vst [vmem:[#allocation65_spill] sm:$0xff] %v7471_v54  ;;  %6022 = vmatpush1.bf16.msra.mxu0 %v7478_v6  ;;  %v904_v59 = vand.u32 4294901760, %v677_v32  ;;  %v908_v50 = vand.u32 4294901760, %v679_v40  ;;  %v7501_v10 = vpack.c.bf16 %v2370_v22, %v2366_v2  ;;  %v742_v54 = vld [vmem:[%s7286_s19 + $0x2d0] sm:$0xff]  ;;  %v681_v2 = vld [vmem:[%s7286_s19 + $0xe8] sm:$0xff] }
  0xa7   : > { %11235 = vst [vmem:[#allocation66_spill] sm:$0xff] %v7476_v34  ;;  %11236 = vst [vmem:[#allocation67_spill] sm:$0xff] %v7478_v6  ;;  %v7503_v6 = vsub.f32 %v739_v46, %v2370_v22  ;;  %v7505_v48 = vpack.c.bf16 %v902_v43, %v898_v1  ;;  %v7518_v34 = vsub.f32 %v738_v55, %v2372_v45  ;;  %v683_v24 = vld [vmem:[%s7286_s19 + $0xf8] sm:$0xff]  ;;  %v2374_v22 = vand.u32 4294901760, %v741_v57 }
  0xa8   : > { %11237 = vst [vmem:[#allocation68_spill] sm:$0xff] %v7480_v7  ;;  %11238 = vst [vmem:[#allocation69_spill] sm:$0xff] %v7482_v5  ;;  %v7514_v5 = vpack.c.bf16 %v2372_v45, %v2368_v8  ;;  %v7516_v7 = vsub.f32 %v736_v18, %v2368_v8  ;;  %6024 = vmatprep.subr.bf16.mxu0 %v7501_v10  ;;  %v7527_v46 = vsub.f32 %v677_v32, %v904_v59 }
  0xa9   : > { %11239 = vst [vmem:[#allocation70_spill] sm:$0xff] %v7489_v47  ;;  %11240 = vst [vmem:[#allocation71_spill] sm:$0xff] %v7491_v49  ;;  %v676_v49 = vld [vmem:[%s7286_s19 + $0xc0] sm:$0xff]  ;;  %v678_v47 = vld [vmem:[%s7286_s19 + $0xd0] sm:$0xff]  ;;  %5450 = vmatpush1.bf16.msra.mxu1 %v7505_v48  ;;  %v2378_v18 = vand.u32 4294901760, %v743_v36  ;;  %v7533_v8 = vsub.f32 %v741_v57, %v2374_v22  ;;  %v2380_v45 = vand.u32 4294901760, %v742_v54 }
  0xaa   : > { %11241 = vst [vmem:[#allocation72_spill] sm:$0xff] %v7493_v27  ;;  %11242 = vst [vmem:[#allocation73_spill] sm:$0xff] %v7497_v44  ;;  %v7507_v27 = vsub.f32 %v672_v3, %v898_v1  ;;  %v7512_v44 = vsub.f32 %v674_v4, %v902_v43  ;;  %v7525_v3 = vpack.c.bf16 %v908_v50, %v904_v59  ;;  %6026 = vmatpush1.bf16.msra.mxu0 %v7514_v5  ;;  %v745_v59 = vld [vmem:[%s7286_s19 + $0x2e8] sm:$0xff]  ;;  %v744_v57 = vld [vmem:[%s7286_s19 + $0x2e0] sm:$0xff] }
  0xab   : > { %11243 = vst [vmem:[#allocation74_spill] sm:$0xff] %v7501_v10  ;;  %11244 = vst [vmem:[#allocation75_spill] sm:$0xff] %v7503_v6  ;;  %v7529_v4 = vsub.f32 %v679_v40, %v908_v50  ;;  %v906_v55 = vand.u32 4294901760, %v676_v49  ;;  %v910_v1 = vand.u32 4294901760, %v678_v47  ;;  %v2376_v43 = vand.u32 4294901760, %v740_v56  ;;  %v747_v50 = vld [vmem:[%s7286_s19 + $0x2f8] sm:$0xff] }
  0xac   : > { %11245 = vst [vmem:[#allocation76_spill] sm:$0xff] %v7505_v48  ;;  %11246 = vst [vmem:[#allocation77_spill] sm:$0xff] %v7507_v27  ;;  %5452 = vmatprep.subr.bf16.mxu1 %v7525_v3  ;;  %v912_v32 = vand.u32 4294901760, %v681_v2  ;;  %v916_v40 = vand.u32 4294901760, %v683_v24  ;;  %v7537_v48 = vpack.c.bf16 %v2378_v18, %v2374_v22  ;;  %v746_v27 = vld [vmem:[%s7286_s19 + $0x2f0] sm:$0xff]  ;;  %v685_v22 = vld [vmem:[%s7286_s19 + $0x108] sm:$0xff] }
  0xad   : > { %11247 = vst [vmem:[#allocation78_spill] sm:$0xff] %v7512_v44  ;;  %11248 = vst [vmem:[#allocation79_spill] sm:$0xff] %v7514_v5  ;;  %v7539_v5 = vsub.f32 %v743_v36, %v2378_v18  ;;  %v7541_v10 = vpack.c.bf16 %v910_v1, %v906_v55  ;;  %v7554_v44 = vsub.f32 %v742_v54, %v2380_v45  ;;  %v687_v6 = vld [vmem:[%s7286_s19 + $0x118] sm:$0xff]  ;;  %v2382_v18 = vand.u32 4294901760, %v745_v59 }
  0xae   : > { %11249 = vst [vmem:[#allocation80_spill] sm:$0xff] %v7516_v7  ;;  %11250 = vst [vmem:[#allocation81_spill] sm:$0xff] %v7518_v34  ;;  %v7550_v34 = vpack.c.bf16 %v2380_v45, %v2376_v43  ;;  %v7552_v7 = vsub.f32 %v740_v56, %v2376_v43  ;;  %6028 = vmatprep.subr.bf16.mxu0 %v7537_v48  ;;  %v7563_v36 = vsub.f32 %v681_v2, %v912_v32 }
  0xaf   : > { %11251 = vst [vmem:[#allocation82_spill] sm:$0xff] %v7525_v3  ;;  %11252 = vst [vmem:[#allocation83_spill] sm:$0xff] %v7527_v46  ;;  %v680_v46 = vld [vmem:[%s7286_s19 + $0xe0] sm:$0xff]  ;;  %v682_v3 = vld [vmem:[%s7286_s19 + $0xf0] sm:$0xff]  ;;  %5454 = vmatpush1.bf16.msra.mxu1 %v7541_v10  ;;  %v2386_v54 = vand.u32 4294901760, %v747_v50  ;;  %v7569_v43 = vsub.f32 %v745_v59, %v2382_v18  ;;  %v2388_v45 = vand.u32 4294901760, %v746_v27 }
  0xb0   : > { %11253 = vst [vmem:[#allocation84_spill] sm:$0xff] %v7529_v4  ;;  %11254 = vst [vmem:[#allocation85_spill] sm:$0xff] %v7533_v8  ;;  %v7543_v4 = vsub.f32 %v676_v49, %v906_v55  ;;  %v7548_v8 = vsub.f32 %v678_v47, %v910_v1  ;;  %v7561_v49 = vpack.c.bf16 %v916_v40, %v912_v32  ;;  %6030 = vmatpush1.bf16.msra.mxu0 %v7550_v34  ;;  %v749_v32 = vld [vmem:[%s7286_s19 + $0x308] sm:$0xff]  ;;  %v748_v59 = vld [vmem:[%s7286_s19 + $0x300] sm:$0xff] }
  0xb1   : > { %11255 = vst [vmem:[#allocation86_spill] sm:$0xff] %v7537_v48  ;;  %11256 = vst [vmem:[#allocation87_spill] sm:$0xff] %v7539_v5  ;;  %v7565_v47 = vsub.f32 %v683_v24, %v916_v40  ;;  %v914_v56 = vand.u32 4294901760, %v680_v46  ;;  %v918_v55 = vand.u32 4294901760, %v682_v3  ;;  %v2384_v1 = vand.u32 4294901760, %v744_v57  ;;  %v751_v40 = vld [vmem:[%s7286_s19 + $0x318] sm:$0xff] }
  0xb2   : > { %11257 = vst [vmem:[#allocation88_spill] sm:$0xff] %v7541_v10  ;;  %11258 = vst [vmem:[#allocation89_spill] sm:$0xff] %v7543_v4  ;;  %5456 = vmatprep.subr.bf16.mxu1 %v7561_v49  ;;  %v920_v2 = vand.u32 4294901760, %v685_v22  ;;  %v924_v24 = vand.u32 4294901760, %v687_v6  ;;  %v7573_v10 = vpack.c.bf16 %v2386_v54, %v2382_v18  ;;  %v750_v4 = vld [vmem:[%s7286_s19 + $0x310] sm:$0xff]  ;;  %v689_v18 = vld [vmem:[%s7286_s19 + $0x128] sm:$0xff] }
  0xb3   : > { %11259 = vst [vmem:[#allocation90_spill] sm:$0xff] %v7548_v8  ;;  %11260 = vst [vmem:[#allocation91_spill] sm:$0xff] %v7550_v34  ;;  %v7575_v34 = vsub.f32 %v747_v50, %v2386_v54  ;;  %v7577_v48 = vpack.c.bf16 %v918_v55, %v914_v56  ;;  %v7590_v8 = vsub.f32 %v746_v27, %v2388_v45  ;;  %v691_v5 = vld [vmem:[%s7286_s19 + $0x138] sm:$0xff]  ;;  %v2390_v54 = vand.u32 4294901760, %v749_v32 }
  0xb4   : > { %11261 = vst [vmem:[#allocation92_spill] sm:$0xff] %v7552_v7  ;;  %11262 = vst [vmem:[#allocation93_spill] sm:$0xff] %v7554_v44  ;;  %v7586_v44 = vpack.c.bf16 %v2388_v45, %v2384_v1  ;;  %v7588_v7 = vsub.f32 %v744_v57, %v2384_v1  ;;  %6032 = vmatprep.subr.bf16.mxu0 %v7573_v10  ;;  %v7599_v50 = vsub.f32 %v685_v22, %v920_v2 }
  0xb5   : > { %11263 = vst [vmem:[#allocation94_spill] sm:$0xff] %v7561_v49  ;;  %11264 = vst [vmem:[#allocation95_spill] sm:$0xff] %v7563_v36  ;;  %v684_v36 = vld [vmem:[%s7286_s19 + $0x100] sm:$0xff]  ;;  %v686_v49 = vld [vmem:[%s7286_s19 + $0x110] sm:$0xff]  ;;  %5458 = vmatpush1.bf16.msra.mxu1 %v7577_v48  ;;  %v2394_v27 = vand.u32 4294901760, %v751_v40  ;;  %v7605_v1 = vsub.f32 %v749_v32, %v2390_v54  ;;  %v2396_v45 = vand.u32 4294901760, %v750_v4 }
  0xb6   : > { %11265 = vst [vmem:[#allocation96_spill] sm:$0xff] %v7565_v47  ;;  %11266 = vst [vmem:[#allocation97_spill] sm:$0xff] %v7569_v43  ;;  %v7579_v47 = vsub.f32 %v680_v46, %v914_v56  ;;  %v7584_v43 = vsub.f32 %v682_v3, %v918_v55  ;;  %v7597_v46 = vpack.c.bf16 %v924_v24, %v920_v2  ;;  %6034 = vmatpush1.bf16.msra.mxu0 %v7586_v44  ;;  %v753_v2 = vld [vmem:[%s7286_s19 + $0x328] sm:$0xff]  ;;  %v752_v32 = vld [vmem:[%s7286_s19 + $0x320] sm:$0xff] }
  0xb7   : > { %11267 = vst [vmem:[#allocation98_spill] sm:$0xff] %v7573_v10  ;;  %11268 = vst [vmem:[#allocation99_spill] sm:$0xff] %v7575_v34  ;;  %v7601_v3 = vsub.f32 %v687_v6, %v924_v24  ;;  %v922_v57 = vand.u32 4294901760, %v684_v36  ;;  %v926_v56 = vand.u32 4294901760, %v686_v49  ;;  %v2392_v55 = vand.u32 4294901760, %v748_v59  ;;  %v755_v24 = vld [vmem:[%s7286_s19 + $0x338] sm:$0xff] }
  0xb8   : > { %11269 = vst [vmem:[#allocation100_spill] sm:$0xff] %v7577_v48  ;;  %11270 = vst [vmem:[#allocation101_spill] sm:$0xff] %v7579_v47  ;;  %5460 = vmatprep.subr.bf16.mxu1 %v7597_v46  ;;  %v928_v22 = vand.u32 4294901760, %v689_v18  ;;  %v932_v6 = vand.u32 4294901760, %v691_v5  ;;  %v7609_v48 = vpack.c.bf16 %v2394_v27, %v2390_v54  ;;  %v754_v47 = vld [vmem:[%s7286_s19 + $0x330] sm:$0xff]  ;;  %v693_v54 = vld [vmem:[%s7286_s19 + $0x148] sm:$0xff] }
  0xb9   : > { %11271 = vst [vmem:[#allocation102_spill] sm:$0xff] %v7584_v43  ;;  %11272 = vst [vmem:[#allocation103_spill] sm:$0xff] %v7586_v44  ;;  %v7611_v44 = vsub.f32 %v751_v40, %v2394_v27  ;;  %v7613_v10 = vpack.c.bf16 %v926_v56, %v922_v57  ;;  %v7626_v43 = vsub.f32 %v750_v4, %v2396_v45  ;;  %v695_v34 = vld [vmem:[%s7286_s19 + $0x158] sm:$0xff]  ;;  %v2398_v27 = vand.u32 4294901760, %v753_v2 }
  0xba   : > { %11273 = vst [vmem:[#allocation104_spill] sm:$0xff] %v7588_v7  ;;  %11274 = vst [vmem:[#allocation105_spill] sm:$0xff] %v7590_v8  ;;  %v7622_v8 = vpack.c.bf16 %v2396_v45, %v2392_v55  ;;  %v7624_v7 = vsub.f32 %v748_v59, %v2392_v55  ;;  %6036 = vmatprep.subr.bf16.mxu0 %v7609_v48  ;;  %v7635_v40 = vsub.f32 %v689_v18, %v928_v22 }
  0xbb   : > { %11275 = vst [vmem:[#allocation106_spill] sm:$0xff] %v7597_v46  ;;  %11276 = vst [vmem:[#allocation107_spill] sm:$0xff] %v7599_v50  ;;  %v688_v50 = vld [vmem:[%s7286_s19 + $0x120] sm:$0xff]  ;;  %v690_v46 = vld [vmem:[%s7286_s19 + $0x130] sm:$0xff]  ;;  %5462 = vmatpush1.bf16.msra.mxu1 %v7613_v10  ;;  %v2402_v4 = vand.u32 4294901760, %v755_v24  ;;  %v7641_v55 = vsub.f32 %v753_v2, %v2398_v27  ;;  %v2404_v45 = vand.u32 4294901760, %v754_v47 }
  0xbc   : > { %11277 = vst [vmem:[#allocation108_spill] sm:$0xff] %v7601_v3  ;;  %11278 = vst [vmem:[#allocation109_spill] sm:$0xff] %v7605_v1  ;;  %v7615_v3 = vsub.f32 %v684_v36, %v922_v57  ;;  %v7620_v1 = vsub.f32 %v686_v49, %v926_v56  ;;  %v7633_v36 = vpack.c.bf16 %v932_v6, %v928_v22  ;;  %6038 = vmatpush1.bf16.msra.mxu0 %v7622_v8  ;;  %v757_v22 = vld [vmem:[%s7286_s19 + $0x348] sm:$0xff]  ;;  %v756_v2 = vld [vmem:[%s7286_s19 + $0x340] sm:$0xff] }
  0xbd   : > { %11279 = vst [vmem:[#allocation110_spill] sm:$0xff] %v7609_v48  ;;  %11280 = vst [vmem:[#allocation111_spill] sm:$0xff] %v7611_v44  ;;  %v7637_v49 = vsub.f32 %v691_v5, %v932_v6  ;;  %v930_v59 = vand.u32 4294901760, %v688_v50  ;;  %v934_v57 = vand.u32 4294901760, %v690_v46  ;;  %v2400_v56 = vand.u32 4294901760, %v752_v32  ;;  %v759_v6 = vld [vmem:[%s7286_s19 + $0x358] sm:$0xff] }
  0xbe   : > { %11281 = vst [vmem:[#allocation112_spill] sm:$0xff] %v7613_v10  ;;  %11282 = vst [vmem:[#allocation113_spill] sm:$0xff] %v7615_v3  ;;  %5464 = vmatprep.subr.bf16.mxu1 %v7633_v36  ;;  %v936_v18 = vand.u32 4294901760, %v693_v54  ;;  %v940_v5 = vand.u32 4294901760, %v695_v34  ;;  %v7645_v10 = vpack.c.bf16 %v2402_v4, %v2398_v27  ;;  %v758_v3 = vld [vmem:[%s7286_s19 + $0x350] sm:$0xff]  ;;  %v697_v27 = vld [vmem:[%s7286_s19 + $0x168] sm:$0xff] }
  0xbf   : > { %11283 = vst [vmem:[#allocation114_spill] sm:$0xff] %v7620_v1  ;;  %11284 = vst [vmem:[#allocation115_spill] sm:$0xff] %v7622_v8  ;;  %v7647_v8 = vsub.f32 %v755_v24, %v2402_v4  ;;  %v7649_v48 = vpack.c.bf16 %v934_v57, %v930_v59  ;;  %v7662_v1 = vsub.f32 %v754_v47, %v2404_v45  ;;  %v699_v44 = vld [vmem:[%s7286_s19 + $0x178] sm:$0xff]  ;;  %v2406_v4 = vand.u32 4294901760, %v757_v22 }
  0xc0   : > { %11285 = vst [vmem:[#allocation116_spill] sm:$0xff] %v7624_v7  ;;  %11286 = vst [vmem:[#allocation117_spill] sm:$0xff] %v7626_v43  ;;  %v7658_v43 = vpack.c.bf16 %v2404_v45, %v2400_v56  ;;  %v7660_v7 = vsub.f32 %v752_v32, %v2400_v56  ;;  %6040 = vmatprep.subr.bf16.mxu0 %v7645_v10  ;;  %v7671_v24 = vsub.f32 %v693_v54, %v936_v18 }
  0xc1   : > { %11287 = vst [vmem:[#allocation118_spill] sm:$0xff] %v7633_v36  ;;  %11288 = vst [vmem:[#allocation119_spill] sm:$0xff] %v7635_v40  ;;  %v692_v40 = vld [vmem:[%s7286_s19 + $0x140] sm:$0xff]  ;;  %v694_v36 = vld [vmem:[%s7286_s19 + $0x150] sm:$0xff]  ;;  %5466 = vmatpush1.bf16.msra.mxu1 %v7649_v48  ;;  %v2410_v47 = vand.u32 4294901760, %v759_v6  ;;  %v7677_v56 = vsub.f32 %v757_v22, %v2406_v4  ;;  %v2412_v45 = vand.u32 4294901760, %v758_v3 }
  0xc2   : > { %11289 = vst [vmem:[#allocation120_spill] sm:$0xff] %v7637_v49  ;;  %11290 = vst [vmem:[#allocation121_spill] sm:$0xff] %v7641_v55  ;;  %v7651_v49 = vsub.f32 %v688_v50, %v930_v59  ;;  %v7656_v55 = vsub.f32 %v690_v46, %v934_v57  ;;  %v7669_v50 = vpack.c.bf16 %v940_v5, %v936_v18  ;;  %6042 = vmatpush1.bf16.msra.mxu0 %v7658_v43  ;;  %v761_v18 = vld [vmem:[%s7286_s19 + $0x368] sm:$0xff]  ;;  %v760_v22 = vld [vmem:[%s7286_s19 + $0x360] sm:$0xff] }
  0xc3   : > { %11291 = vst [vmem:[#allocation122_spill] sm:$0xff] %v7645_v10  ;;  %11292 = vst [vmem:[#allocation123_spill] sm:$0xff] %v7647_v8  ;;  %v7673_v46 = vsub.f32 %v695_v34, %v940_v5  ;;  %v938_v32 = vand.u32 4294901760, %v692_v40  ;;  %v942_v59 = vand.u32 4294901760, %v694_v36  ;;  %v2408_v57 = vand.u32 4294901760, %v756_v2  ;;  %v763_v5 = vld [vmem:[%s7286_s19 + $0x378] sm:$0xff] }
  0xc4   : > { %11293 = vst [vmem:[#allocation124_spill] sm:$0xff] %v7649_v48  ;;  %11294 = vst [vmem:[#allocation125_spill] sm:$0xff] %v7651_v49  ;;  %5468 = vmatprep.subr.bf16.mxu1 %v7669_v50  ;;  %v944_v54 = vand.u32 4294901760, %v697_v27  ;;  %v948_v34 = vand.u32 4294901760, %v699_v44  ;;  %v7681_v48 = vpack.c.bf16 %v2410_v47, %v2406_v4  ;;  %v762_v49 = vld [vmem:[%s7286_s19 + $0x370] sm:$0xff]  ;;  %v701_v4 = vld [vmem:[%s7286_s19 + $0x188] sm:$0xff] }
  0xc5   : > { %11295 = vst [vmem:[#allocation126_spill] sm:$0xff] %v7656_v55  ;;  %11296 = vst [vmem:[#allocation127_spill] sm:$0xff] %v7658_v43  ;;  %v7683_v43 = vsub.f32 %v759_v6, %v2410_v47  ;;  %v7685_v10 = vpack.c.bf16 %v942_v59, %v938_v32  ;;  %v7698_v55 = vsub.f32 %v758_v3, %v2412_v45  ;;  %v703_v8 = vld [vmem:[%s7286_s19 + $0x198] sm:$0xff]  ;;  %v2414_v47 = vand.u32 4294901760, %v761_v18 }
  0xc6   : > { %11297 = vst [vmem:[#allocation128_spill] sm:$0xff] %v7660_v7  ;;  %11298 = vst [vmem:[#allocation129_spill] sm:$0xff] %v7662_v1  ;;  %v7694_v1 = vpack.c.bf16 %v2412_v45, %v2408_v57  ;;  %v7696_v7 = vsub.f32 %v756_v2, %v2408_v57  ;;  %6044 = vmatprep.subr.bf16.mxu0 %v7681_v48  ;;  %v7707_v6 = vsub.f32 %v697_v27, %v944_v54 }
  0xc7   : > { %11299 = vst [vmem:[#allocation130_spill] sm:$0xff] %v7669_v50  ;;  %11300 = vst [vmem:[#allocation131_spill] sm:$0xff] %v7671_v24  ;;  %v696_v24 = vld [vmem:[%s7286_s19 + $0x160] sm:$0xff]  ;;  %v698_v50 = vld [vmem:[%s7286_s19 + $0x170] sm:$0xff]  ;;  %5470 = vmatpush1.bf16.msra.mxu1 %v7685_v10  ;;  %v2418_v3 = vand.u32 4294901760, %v763_v5  ;;  %v7713_v57 = vsub.f32 %v761_v18, %v2414_v47  ;;  %v2420_v45 = vand.u32 4294901760, %v762_v49 }
  0xc8   : > { %11301 = vst [vmem:[#allocation132_spill] sm:$0xff] %v7673_v46  ;;  %11302 = vst [vmem:[#allocation133_spill] sm:$0xff] %v7677_v56  ;;  %v7687_v46 = vsub.f32 %v692_v40, %v938_v32  ;;  %v7692_v56 = vsub.f32 %v694_v36, %v942_v59  ;;  %v7705_v40 = vpack.c.bf16 %v948_v34, %v944_v54  ;;  %6046 = vmatpush1.bf16.msra.mxu0 %v7694_v1  ;;  %v765_v54 = vld [vmem:[%s7286_s19 + $0x388] sm:$0xff]  ;;  %v764_v18 = vld [vmem:[%s7286_s19 + $0x380] sm:$0xff] }
  0xc9   : > { %11303 = vst [vmem:[#allocation134_spill] sm:$0xff] %v7681_v48  ;;  %11304 = vst [vmem:[#allocation135_spill] sm:$0xff] %v7683_v43  ;;  %v7709_v36 = vsub.f32 %v699_v44, %v948_v34  ;;  %v946_v2 = vand.u32 4294901760, %v696_v24  ;;  %v950_v32 = vand.u32 4294901760, %v698_v50  ;;  %v2416_v59 = vand.u32 4294901760, %v760_v22  ;;  %v767_v34 = vld [vmem:[%s7286_s19 + $0x398] sm:$0xff] }
  0xca   : > { %11305 = vst [vmem:[#allocation136_spill] sm:$0xff] %v7685_v10  ;;  %11306 = vst [vmem:[#allocation137_spill] sm:$0xff] %v7687_v46  ;;  %5472 = vmatprep.subr.bf16.mxu1 %v7705_v40  ;;  %v952_v27 = vand.u32 4294901760, %v701_v4  ;;  %v956_v44 = vand.u32 4294901760, %v703_v8  ;;  %v7717_v10 = vpack.c.bf16 %v2418_v3, %v2414_v47  ;;  %v766_v46 = vld [vmem:[%s7286_s19 + $0x390] sm:$0xff]  ;;  %v705_v47 = vld [vmem:[%s7286_s19 + $0x1a8] sm:$0xff] }
  0xcb   : > { %11307 = vst [vmem:[#allocation138_spill] sm:$0xff] %v7692_v56  ;;  %11308 = vst [vmem:[#allocation139_spill] sm:$0xff] %v7694_v1  ;;  %v7719_v1 = vsub.f32 %v763_v5, %v2418_v3  ;;  %v7721_v48 = vpack.c.bf16 %v950_v32, %v946_v2  ;;  %v7734_v56 = vsub.f32 %v762_v49, %v2420_v45  ;;  %v707_v43 = vld [vmem:[%s7286_s19 + $0x1b8] sm:$0xff]  ;;  %v2422_v3 = vand.u32 4294901760, %v765_v54 }
  0xcc   : > { %11309 = vst [vmem:[#allocation140_spill] sm:$0xff] %v7696_v7  ;;  %11310 = vst [vmem:[#allocation141_spill] sm:$0xff] %v7698_v55  ;;  %v7730_v55 = vpack.c.bf16 %v2420_v45, %v2416_v59  ;;  %v7732_v7 = vsub.f32 %v760_v22, %v2416_v59  ;;  %6048 = vmatprep.subr.bf16.mxu0 %v7717_v10  ;;  %v7743_v5 = vsub.f32 %v701_v4, %v952_v27 }
  0xcd   : > { %11311 = vst [vmem:[#allocation142_spill] sm:$0xff] %v7705_v40  ;;  %11312 = vst [vmem:[#allocation143_spill] sm:$0xff] %v7707_v6  ;;  %v700_v6 = vld [vmem:[%s7286_s19 + $0x180] sm:$0xff]  ;;  %v702_v40 = vld [vmem:[%s7286_s19 + $0x190] sm:$0xff]  ;;  %5474 = vmatpush1.bf16.msra.mxu1 %v7721_v48  ;;  %v2426_v49 = vand.u32 4294901760, %v767_v34  ;;  %v7749_v59 = vsub.f32 %v765_v54, %v2422_v3  ;;  %v2428_v45 = vand.u32 4294901760, %v766_v46 }
  0xce   : > { %11313 = vst [vmem:[#allocation144_spill] sm:$0xff] %v7709_v36  ;;  %11314 = vst [vmem:[#allocation145_spill] sm:$0xff] %v7713_v57  ;;  %v7723_v36 = vsub.f32 %v696_v24, %v946_v2  ;;  %v7728_v57 = vsub.f32 %v698_v50, %v950_v32  ;;  %v7741_v24 = vpack.c.bf16 %v956_v44, %v952_v27  ;;  %6050 = vmatpush1.bf16.msra.mxu0 %v7730_v55  ;;  %v769_v27 = vld [vmem:[%s7286_s19 + $0x3a8] sm:$0xff]  ;;  %v768_v54 = vld [vmem:[%s7286_s19 + $0x3a0] sm:$0xff] }
  0xcf   : > { %11315 = vst [vmem:[#allocation146_spill] sm:$0xff] %v7717_v10  ;;  %11316 = vst [vmem:[#allocation147_spill] sm:$0xff] %v7719_v1  ;;  %v7745_v50 = vsub.f32 %v703_v8, %v956_v44  ;;  %v954_v22 = vand.u32 4294901760, %v700_v6  ;;  %v958_v2 = vand.u32 4294901760, %v702_v40  ;;  %v2424_v32 = vand.u32 4294901760, %v764_v18  ;;  %v771_v44 = vld [vmem:[%s7286_s19 + $0x3b8] sm:$0xff] }
  0xd0   : > { %11317 = vst [vmem:[#allocation148_spill] sm:$0xff] %v7721_v48  ;;  %11318 = vst [vmem:[#allocation149_spill] sm:$0xff] %v7723_v36  ;;  %5476 = vmatprep.subr.bf16.mxu1 %v7741_v24  ;;  %v960_v4 = vand.u32 4294901760, %v705_v47  ;;  %v964_v8 = vand.u32 4294901760, %v707_v43  ;;  %v7753_v48 = vpack.c.bf16 %v2426_v49, %v2422_v3  ;;  %v770_v36 = vld [vmem:[%s7286_s19 + $0x3b0] sm:$0xff]  ;;  %v709_v3 = vld [vmem:[%s7286_s19 + $0x1c8] sm:$0xff] }
  0xd1   : > { %11319 = vst [vmem:[#allocation150_spill] sm:$0xff] %v7728_v57  ;;  %11320 = vst [vmem:[#allocation151_spill] sm:$0xff] %v7730_v55  ;;  %v7755_v55 = vsub.f32 %v767_v34, %v2426_v49  ;;  %v7757_v10 = vpack.c.bf16 %v958_v2, %v954_v22  ;;  %v7770_v57 = vsub.f32 %v766_v46, %v2428_v45  ;;  %v711_v1 = vld [vmem:[%s7286_s19 + $0x1d8] sm:$0xff]  ;;  %v2430_v49 = vand.u32 4294901760, %v769_v27 }
  0xd2   : > { %11321 = vst [vmem:[#allocation152_spill] sm:$0xff] %v7732_v7  ;;  %11322 = vst [vmem:[#allocation153_spill] sm:$0xff] %v7734_v56  ;;  %v7766_v56 = vpack.c.bf16 %v2428_v45, %v2424_v32  ;;  %v7768_v7 = vsub.f32 %v764_v18, %v2424_v32  ;;  %6052 = vmatprep.subr.bf16.mxu0 %v7753_v48  ;;  %v7779_v34 = vsub.f32 %v705_v47, %v960_v4 }
  0xd3   : > { %11323 = vst [vmem:[#allocation154_spill] sm:$0xff] %v7741_v24  ;;  %11324 = vst [vmem:[#allocation155_spill] sm:$0xff] %v7743_v5  ;;  %v704_v5 = vld [vmem:[%s7286_s19 + $0x1a0] sm:$0xff]  ;;  %v706_v24 = vld [vmem:[%s7286_s19 + $0x1b0] sm:$0xff]  ;;  %5478 = vmatpush1.bf16.msra.mxu1 %v7757_v10  ;;  %v2434_v46 = vand.u32 4294901760, %v771_v44  ;;  %v7785_v32 = vsub.f32 %v769_v27, %v2430_v49  ;;  %v2436_v45 = vand.u32 4294901760, %v770_v36 }
  0xd4   : > { %11325 = vst [vmem:[#allocation156_spill] sm:$0xff] %v7745_v50  ;;  %11326 = vst [vmem:[#allocation157_spill] sm:$0xff] %v7749_v59  ;;  %v7759_v50 = vsub.f32 %v700_v6, %v954_v22  ;;  %v7764_v59 = vsub.f32 %v702_v40, %v958_v2  ;;  %v7777_v6 = vpack.c.bf16 %v964_v8, %v960_v4  ;;  %6054 = vmatpush1.bf16.msra.mxu0 %v7766_v56  ;;  %v773_v4 = vld [vmem:[%s7286_s19 + $0x3c8] sm:$0xff]  ;;  %v772_v27 = vld [vmem:[%s7286_s19 + $0x3c0] sm:$0xff] }
  0xd5   : > { %11327 = vst [vmem:[#allocation158_spill] sm:$0xff] %v7753_v48  ;;  %11328 = vst [vmem:[#allocation159_spill] sm:$0xff] %v7755_v55  ;;  %v7781_v40 = vsub.f32 %v707_v43, %v964_v8  ;;  %v962_v18 = vand.u32 4294901760, %v704_v5  ;;  %v966_v22 = vand.u32 4294901760, %v706_v24  ;;  %v2432_v2 = vand.u32 4294901760, %v768_v54  ;;  %v775_v8 = vld [vmem:[%s7286_s19 + $0x3d8] sm:$0xff] }
  0xd6   : > { %11329 = vst [vmem:[#allocation160_spill] sm:$0xff] %v7757_v10  ;;  %11330 = vst [vmem:[#allocation161_spill] sm:$0xff] %v7759_v50  ;;  %5480 = vmatprep.subr.bf16.mxu1 %v7777_v6  ;;  %v968_v47 = vand.u32 4294901760, %v709_v3  ;;  %v972_v43 = vand.u32 4294901760, %v711_v1  ;;  %v7789_v10 = vpack.c.bf16 %v2434_v46, %v2430_v49  ;;  %v774_v50 = vld [vmem:[%s7286_s19 + $0x3d0] sm:$0xff]  ;;  %v713_v49 = vld [vmem:[%s7286_s19 + $0x1e8] sm:$0xff] }
  0xd7   : > { %11331 = vst [vmem:[#allocation162_spill] sm:$0xff] %v7764_v59  ;;  %11332 = vst [vmem:[#allocation163_spill] sm:$0xff] %v7766_v56  ;;  %v7791_v56 = vsub.f32 %v771_v44, %v2434_v46  ;;  %v7793_v48 = vpack.c.bf16 %v966_v22, %v962_v18  ;;  %v7806_v59 = vsub.f32 %v770_v36, %v2436_v45  ;;  %v715_v55 = vld [vmem:[%s7286_s19 + $0x1f8] sm:$0xff]  ;;  %v2438_v46 = vand.u32 4294901760, %v773_v4 }
  0xd8   : > { %11333 = vst [vmem:[#allocation164_spill] sm:$0xff] %v7768_v7  ;;  %11334 = vst [vmem:[#allocation165_spill] sm:$0xff] %v7770_v57  ;;  %v7802_v57 = vpack.c.bf16 %v2436_v45, %v2432_v2  ;;  %v7804_v7 = vsub.f32 %v768_v54, %v2432_v2  ;;  %6056 = vmatprep.subr.bf16.mxu0 %v7789_v10  ;;  %v7815_v44 = vsub.f32 %v709_v3, %v968_v47 }
  0xd9   : > { %11335 = vst [vmem:[#allocation166_spill] sm:$0xff] %v7777_v6  ;;  %11336 = vst [vmem:[#allocation167_spill] sm:$0xff] %v7779_v34  ;;  %v708_v34 = vld [vmem:[%s7286_s19 + $0x1c0] sm:$0xff]  ;;  %v710_v6 = vld [vmem:[%s7286_s19 + $0x1d0] sm:$0xff]  ;;  %5482 = vmatpush1.bf16.msra.mxu1 %v7793_v48  ;;  %v2442_v36 = vand.u32 4294901760, %v775_v8  ;;  %v7821_v2 = vsub.f32 %v773_v4, %v2438_v46  ;;  %v2444_v45 = vand.u32 4294901760, %v774_v50 }
  0xda   : > { %11337 = vst [vmem:[#allocation168_spill] sm:$0xff] %v7781_v40  ;;  %11338 = vst [vmem:[#allocation169_spill] sm:$0xff] %v7785_v32  ;;  %v7795_v40 = vsub.f32 %v704_v5, %v962_v18  ;;  %v7800_v32 = vsub.f32 %v706_v24, %v966_v22  ;;  %v7813_v5 = vpack.c.bf16 %v972_v43, %v968_v47  ;;  %6058 = vmatpush1.bf16.msra.mxu0 %v7802_v57 }
  0xdb   : > { %11339 = vst [vmem:[#allocation170_spill] sm:$0xff] %v7789_v10  ;;  %11340 = vst [vmem:[#allocation171_spill] sm:$0xff] %v7791_v56  ;;  %v7817_v24 = vsub.f32 %v711_v1, %v972_v43  ;;  %v970_v54 = vand.u32 4294901760, %v708_v34  ;;  %v974_v18 = vand.u32 4294901760, %v710_v6  ;;  %v2440_v22 = vand.u32 4294901760, %v772_v27  ;;  %v777_v1 = vld [vmem:[%s7286_s19 + $0x3e8] sm:$0xff] }
  0xdc   : > { %11341 = vst [vmem:[#allocation172_spill] sm:$0xff] %v7793_v48  ;;  %11342 = vst [vmem:[#allocation173_spill] sm:$0xff] %v7795_v40  ;;  %5484 = vmatprep.subr.bf16.mxu1 %v7813_v5  ;;  %v976_v3 = vand.u32 4294901760, %v713_v49  ;;  %v980_v47 = vand.u32 4294901760, %v715_v55  ;;  %v779_v43 = vld [vmem:[%s7286_s19 + $0x3f8] sm:$0xff]  ;;  %v7825_v48 = vpack.c.bf16 %v2442_v36, %v2438_v46  ;;  %v778_v40 = vld [vmem:[%s7286_s19 + $0x3f0] sm:$0xff] }
  0xdd   : > { %11343 = vst [vmem:[#allocation174_spill] sm:$0xff] %v7800_v32  ;;  %11344 = vst [vmem:[#allocation175_spill] sm:$0xff] %v7802_v57  ;;  %v7827_v57 = vsub.f32 %v775_v8, %v2442_v36  ;;  %v7829_v10 = vpack.c.bf16 %v974_v18, %v970_v54  ;;  %v7838_v4 = vpack.c.bf16 %v2444_v45, %v2440_v22  ;;  %v2446_v36 = vand.u32 4294901760, %v777_v1 }
  0xde   : > { %11345 = vst [vmem:[#allocation176_spill] sm:$0xff] %v7804_v7  ;;  %11346 = vst [vmem:[#allocation177_spill] sm:$0xff] %v7806_v59  ;;  %v714_v59 = vld [vmem:[%s7286_s19 + $0x1f0] sm:$0xff]  ;;  %v776_v7 = vld [vmem:[%s7286_s19 + $0x3e0] sm:$0xff]  ;;  %v7842_v32 = vsub.f32 %v774_v50, %v2444_v45  ;;  %6060 = vmatprep.subr.bf16.mxu0 %v7825_v48  ;;  %v7847_v8 = vpack.c.bf16 %v980_v47, %v976_v3  ;;  %v7851_v46 = vsub.f32 %v715_v55, %v980_v47 }
  0xdf   : > { %11347 = vst [vmem:[#allocation178_spill] sm:$0xff] %v7813_v5  ;;  %11348 = vst [vmem:[#allocation179_spill] sm:$0xff] %v7815_v44  ;;  %v712_v44 = vld [vmem:[%s7286_s19 + $0x1e0] sm:$0xff]  ;;  %v7836_v5 = vsub.f32 %v710_v6, %v974_v18  ;;  %5486 = vmatpush1.bf16.msra.mxu1 %v7829_v10  ;;  %6062 = vmatpush1.bf16.msra.mxu0 %v7838_v4  ;;  %v2450_v6 = vand.u32 4294901760, %v779_v43  ;;  %v2448_v18 = vand.u32 4294901760, %v776_v7  ;;  %v10566_v45 = vand.u32 4294901760, %v7292_v11 }
  0xe0   : > { %11349 = vst [vmem:[#allocation180_spill] sm:$0xff] %v7817_v24  ;;  %11350 = vst [vmem:[#allocation181_spill] sm:$0xff] %v7821_v2  ;;  %v7831_v24 = vsub.f32 %v708_v34, %v970_v54  ;;  %v7840_v2 = vsub.f32 %v772_v27, %v2440_v22  ;;  %v7849_v34 = vsub.f32 %v713_v49, %v976_v3  ;;  %v978_v54 = vand.u32 4294901760, %v712_v44 }
  0xe1   : > { %11351 = vst [vmem:[#allocation182_spill] sm:$0xff] %v7825_v48  ;;  %11352 = vst [vmem:[#allocation183_spill] sm:$0xff] %v7827_v57  ;;  %v982_v27 = vand.u32 4294901760, %v714_v59  ;;  %5488 = vmatprep.subr.bf16.mxu1 %v7847_v8  ;;  %v7855_v50 = vsub.f32 %v777_v1, %v2446_v36  ;;  %v2452_v22 = vand.u32 4294901760, %v778_v40  ;;  %v7859_v49 = vpack.c.bf16 %v2450_v6, %v2446_v36 }
  0xe2   : > { %11353 = vst [vmem:[#allocation184_spill] sm:$0xff] %v7829_v10  ;;  %11354 = vst [vmem:[#allocation185_spill] sm:$0xff] %v7831_v24  ;;  %v10565_v10 = vand.u32 4294901760, %v7311_v28  ;;  %v7861_v55 = vsub.f32 %v779_v43, %v2450_v6  ;;  %v7865_v47 = vsub.f32 %v712_v44, %v978_v54  ;;  %v987_v43 = vsub.f32 %v7292_v11, %v10566_v45 }
  0xe3   : > { %11355 = vst [vmem:[#allocation186_spill] sm:$0xff] %v7836_v5  ;;  %11356 = vst [vmem:[#allocation187_spill] sm:$0xff] %v7838_v4  ;;  %v7863_v3 = vpack.c.bf16 %v982_v27, %v978_v54  ;;  %v7867_v4 = vsub.f32 %v714_v59, %v982_v27  ;;  %v7869_v48 = vpack.c.bf16 %v2452_v22, %v2448_v18  ;;  %6064 = vmatprep.subr.bf16.mxu0 %v7859_v49 }
  0xe4   : > { %11357 = vst [vmem:[#allocation188_spill] sm:$0xff] %v7840_v2  ;;  %11358 = vst [vmem:[#allocation189_spill] sm:$0xff] %v7842_v32  ;;  %v7873_v1 = vsub.f32 %v778_v40, %v2452_v22  ;;  %v1052_v44 = vsub.f32 %v7311_v28, %v10565_v10  ;;  %v10567_v59 = vand.u32 4294901760, %v7313_v29  ;;  %v10570_v36 = vand.u32 4294901760, %v7295_v12 }
  0xe5   : > { %11359 = vst [vmem:[#allocation190_spill] sm:$0xff] %v7847_v8  ;;  %11360 = vst [vmem:[#allocation191_spill] sm:$0xff] %v7849_v34  ;;  %v7871_v8 = vsub.f32 %v776_v7, %v2448_v18  ;;  %5490 = vmatpush1.bf16.msra.mxu1 %v7863_v3  ;;  %6066 = vmatpush1.bf16.msra.mxu0 %v7869_v48  ;;  %v10574_v7 = vand.u32 4294901760, %v7315_v30  ;;  %v10573_v40 = vand.u32 4294901760, %v7322_v35  ;;  %v10575_v6 = vand.u32 4294901760, %v7301_v19 }
  0xe6   : > { %11361 = vst [vmem:[#allocation192_spill] sm:$0xff] %v7851_v46  ;;  %11362 = vst [vmem:[#allocation193_spill] sm:$0xff] %v7855_v50  ;;  %v10578_v54 = vand.u32 4294901760, %v7326_v37  ;;  %v988_v27 = vand.u32 4294901760, %v987_v43  ;;  %v1053_v18 = vand.u32 4294901760, %v1052_v44  ;;  %v1064_v22 = vsub.f32 %v7313_v29, %v10567_v59  ;;  %3300 = vmatprep.mubr.f32.mxu0 %v10570_v36 }
  0xe7   : > { %11363 = vst [vmem:[#allocation194_spill] sm:$0xff] %v7859_v49  ;;  %11364 = vst [vmem:[#allocation195_spill] sm:$0xff] %v7861_v55  ;;  %v6067_v10 = vpack.c.bf16 %v10573_v40, %v10574_v7  ;;  %v993_v45 = vsub.f32 %v7301_v19, %v10575_v6  ;;  %v10583_v44 = vand.u32 4294901760, %v7330_v39  ;;  %v10579_v12 = vand.u32 4294901760, %v7307_v26 }
  0xe8   : > { %11365 = vst [vmem:[#allocation196_spill] sm:$0xff] %v7863_v3  ;;  %11366 = vst [vmem:[#allocation197_spill] sm:$0xff] %v7865_v47  ;;  %v1058_v43 = vsub.f32 %v7326_v37, %v10578_v54  ;;  %989 = vmatprep.mubr.f32.mxu1 %v988_v27  ;;  %v1065_v59 = vand.u32 4294901760, %v1064_v22  ;;  %v10581_v36 = vand.u32 4294901760, %v7339_v51  ;;  %v10580_v30 = vand.u32 4294901760, %v7341_v52  ;;  %v11394_v3 = vld [vmem:[#allocation87_spill] sm:$0xff] }
  0xe9   : > { %11367 = vst [vmem:[#allocation198_spill] sm:$0xff] %v7867_v4  ;;  %11368 = vst [vmem:[#allocation199_spill] sm:$0xff] %v7869_v48  ;;  %6068 = vmatprep.subr.bf16.mxu0 %v6067_v10  ;;  %v994_v40 = vand.u32 4294901760, %v993_v45  ;;  %v1070_v6 = vsub.f32 %v7330_v39, %v10583_v44  ;;  %v10582_v35 = vand.u32 4294901760, %v7343_v53  ;;  %3304 = vmatmul.mubr.f32.vlgmr.msra.gmra.mrb[0].mxu0 %v10579_v12  ;;  %v10584_v22 = vand.u32 4294901760, %v7350_v58 }
  0xea   : > { %11369 = vst [vmem:[#allocation200_spill] sm:$0xff] %v7871_v8  ;;  %11370 = vst [vmem:[#allocation201_spill] sm:$0xff] %v7873_v1  ;;  %v1059_v7 = vand.u32 4294901760, %v1058_v43  ;;  %v5491_v54 = vpack.c.bf16 %v1065_v59, %v1053_v18  ;;  %v6069_v27 = vpack.c.bf16 %v10580_v30, %v10581_v36  ;;  %v10586_v43 = vand.u32 4294901760, %v7354_v60 }
  0xeb   : > { %995 = vmatmul.mubr.f32.vlgmr.msra.gmra.mrb[0].mxu1 %v994_v40  ;;  %v1071_v10 = vand.u32 4294901760, %v1070_v6  ;;  %v1076_v45 = vsub.f32 %v7343_v53, %v10582_v35  ;;  %v10585_v59 = vand.u32 4294901760, %v7358_v62  ;;  %v1088_v18 = vsub.f32 %v7350_v58, %v10584_v22  ;;  %v11385_v62 = vld [vmem:[#allocation75_spill] sm:$0xff] }
  0xec   : > { %5492 = vmatprep.subr.bf16.mxu1 %v5491_v54  ;;  %6070 = vmatpush1.bf16.msra.mxu0 %v6069_v27  ;;  %v10587_v12 = vand.u32 4294901760, %v7360_v0  ;;  %v10588_v30 = vand.u32 4294901760, %v7368_v15  ;;  %v10589_v22 = vand.u32 4294901760, %v7377_v23  ;;  %v10646_v60 = vand.u32 4294901760, %v11385_v62 }
  0xed   : > { %v5493_v40 = vpack.c.bf16 %v1071_v10, %v1059_v7  ;;  %v1077_v6 = vand.u32 4294901760, %v1076_v45  ;;  %v6071_v36 = vpack.c.bf16 %v10585_v59, %v10586_v43  ;;  %v1089_v44 = vand.u32 4294901760, %v1088_v18 }
  0xee   : > { %v1082_v54 = vsub.f32 %v7360_v0, %v10587_v12  ;;  %v1094_v27 = vsub.f32 %v7368_v15, %v10588_v30  ;;  %v10590_v7 = vand.u32 4294901760, %v7381_v25  ;;  %v10593_v10 = vand.u32 4294901760, %v7387_v38 }
  0xef   : > { %5494 = vmatpush1.bf16.msra.mxu1 %v5493_v40  ;;  %6072 = vmatprep.subr.bf16.mxu0 %v6071_v36  ;;  %v10595_v45 = vand.u32 4294901760, %v7391_v41  ;;  %v10594_v18 = vand.u32 4294901760, %v7393_v42  ;;  %v5495_v59 = vpack.c.bf16 %v1089_v44, %v1077_v6  ;;  %v11371_v12 = vand.u32 4294901760, %v7370_v16  ;;  %v11377_v42 = vld [vmem:[#allocation63_spill] sm:$0xff] }
  0xf0   : > { %v1083_v43 = vand.u32 4294901760, %v1082_v54  ;;  %v1095_v35 = vand.u32 4294901760, %v1094_v27  ;;  %v1100_v36 = vsub.f32 %v7381_v25, %v10590_v7  ;;  %v1112_v40 = vsub.f32 %v7387_v38, %v10593_v10  ;;  %v11448_v25 = vld [vmem:[#allocation159_spill] sm:$0xff] }
  0xf1   : > { %v6073_v30 = vpack.c.bf16 %v10589_v22, %v11371_v12  ;;  %v6075_v44 = vpack.c.bf16 %v10594_v18, %v10595_v45  ;;  %v10599_v6 = vand.u32 4294901760, %v7401_v61  ;;  %5496 = vmatprep.subr.bf16.mxu1 %v5495_v59  ;;  %v10596_v12 = vand.u32 4294901760, %v7403_v63 }
  0xf2   : > { %v5497_v54 = vpack.c.bf16 %v1095_v35, %v1083_v43  ;;  %v10598_v27 = vand.u32 4294901760, %v7410_v9  ;;  %v10597_v22 = vand.u32 4294901760, %v7412_v17  ;;  %v1101_v7 = vand.u32 4294901760, %v1100_v36 }
  0xf3   : > { %6074 = vmatpush1.bf16.msra.mxu0 %v6073_v30  ;;  %v1113_v26 = vand.u32 4294901760, %v1112_v40  ;;  %v1106_v10 = vsub.f32 %v7401_v61, %v10599_v6  ;;  %v10600_v18 = vand.u32 4294901760, %v7416_v14  ;;  %v1118_v30 = vsub.f32 %v7403_v63, %v10596_v12 }
  0xf4   : > { %6076 = vmatprep.subr.bf16.mxu0 %v6075_v44  ;;  %5498 = vmatpush1.bf16.msra.mxu1 %v5497_v54  ;;  %v6077_v35 = vpack.c.bf16 %v10597_v22, %v10598_v27  ;;  %v10603_v43 = vand.u32 4294901760, %v7423_v13  ;;  %v10605_v59 = vand.u32 4294901760, %v7427_v20  ;;  %v10604_v54 = vand.u32 4294901760, %v7430_v21  ;;  %v11375_v21 = vld [vmem:[#allocation60_spill] sm:$0xff] }
  0xf5   : > { %v5499_v36 = vpack.c.bf16 %v1113_v26, %v1101_v7  ;;  %v1107_v40 = vand.u32 4294901760, %v1106_v10  ;;  %v1124_v44 = vsub.f32 %v7416_v14, %v10600_v18  ;;  %v1119_v45 = vand.u32 4294901760, %v1118_v30  ;;  %v11372_v7 = vld [vmem:[#allocation56_spill] sm:$0xff]  ;;  %v11373_v18 = vld [vmem:[#allocation57_spill] sm:$0xff]  ;;  %v11439_v14 = vld [vmem:[#allocation147_spill] sm:$0xff] }
  0xf6   : > { %v1136_v12 = vsub.f32 %v7423_v13, %v10603_v43  ;;  %v10612_v22 = vand.u32 4294901760, %v7434_v31  ;;  %v10619_v27 = vand.u32 4294901760, %v7441_v33  ;;  %v6079_v26 = vpack.c.bf16 %v10604_v54, %v10605_v59  ;;  %v11374_v54 = vld [vmem:[#allocation59_spill] sm:$0xff] }
  0xf7   : > { %6078 = vmatpush1.bf16.msra.mxu0 %v6077_v35  ;;  %5500 = vmatprep.subr.bf16.mxu1 %v5499_v36  ;;  %v1125_v6 = vand.u32 4294901760, %v1124_v44  ;;  %v10618_v10 = vand.u32 4294901760, %v11372_v7  ;;  %v10617_v30 = vand.u32 4294901760, %v11373_v18  ;;  %v5501_v35 = vpack.c.bf16 %v1119_v45, %v1107_v40  ;;  %v11376_v45 = vld [vmem:[#allocation61_spill] sm:$0xff]  ;;  %v11379_v18 = vld [vmem:[#allocation66_spill] sm:$0xff] }
  0xf8   : > { %v1137_v17 = vand.u32 4294901760, %v1136_v12  ;;  %v1130_v43 = vsub.f32 %v7434_v31, %v10612_v22  ;;  %v1142_v36 = vsub.f32 %v7441_v33, %v10619_v27  ;;  %6080 = vmatprep.subr.bf16.mxu0 %v6079_v26  ;;  %v10622_v59 = vand.u32 4294901760, %v11374_v54 }
  0xf9   : > { %v6081_v44 = vpack.c.bf16 %v10617_v30, %v10618_v10  ;;  %v10625_v20 = vand.u32 4294901760, %v11375_v21  ;;  %v10627_v12 = vand.u32 4294901760, %v11376_v45  ;;  %5502 = vmatpush1.bf16.msra.mxu1 %v5501_v35  ;;  %v10626_v41 = vand.u32 4294901760, %v11377_v42  ;;  %v11378_v10 = vld [vmem:[#allocation65_spill] sm:$0xff] }
  0xfa   : > { %v5503_v40 = vpack.c.bf16 %v1137_v17, %v1125_v6  ;;  %v1131_v9 = vand.u32 4294901760, %v1130_v43  ;;  %v1143_v22 = vand.u32 4294901760, %v1142_v36  ;;  %v1148_v26 = vsub.f32 %v11374_v54, %v10622_v59  ;;  %v11380_v6 = vld [vmem:[#allocation68_spill] sm:$0xff]  ;;  %v11381_v36 = vld [vmem:[#allocation69_spill] sm:$0xff]  ;;  %v11430_v54 = vld [vmem:[#allocation135_spill] sm:$0xff] }
  0xfb   : > { %6082 = vmatpush1.bf16.msra.mxu0 %v6081_v44  ;;  %v1160_v30 = vsub.f32 %v11375_v21, %v10625_v20  ;;  %v10632_v27 = vand.u32 4294901760, %v11378_v10  ;;  %v10639_v7 = vand.u32 4294901760, %v11379_v18  ;;  %v6083_v17 = vpack.c.bf16 %v10626_v41, %v10627_v12  ;;  %v11383_v12 = vld [vmem:[#allocation72_spill] sm:$0xff] }
  0xfc   : > { %5504 = vmatprep.subr.bf16.mxu1 %v5503_v40  ;;  %v5505_v35 = vpack.c.bf16 %v1143_v22, %v1131_v9  ;;  %v10638_v43 = vand.u32 4294901760, %v11380_v6  ;;  %v10637_v44 = vand.u32 4294901760, %v11381_v36  ;;  %v1149_v59 = vand.u32 4294901760, %v1148_v26  ;;  %v11382_v22 = vld [vmem:[#allocation71_spill] sm:$0xff] }
  0xfd   : > { %v1161_v23 = vand.u32 4294901760, %v1160_v30  ;;  %v1154_v20 = vsub.f32 %v11378_v10, %v10632_v27  ;;  %v1166_v40 = vsub.f32 %v11379_v18, %v10639_v7  ;;  %6084 = vmatprep.subr.bf16.mxu0 %v6083_v17  ;;  %v10642_v41 = vand.u32 4294901760, %v11382_v22  ;;  %v11384_v30 = vld [vmem:[#allocation73_spill] sm:$0xff]  ;;  %v11387_v7 = vld [vmem:[#allocation78_spill] sm:$0xff] }
  0xfe   : > { %5506 = vmatpush1.bf16.msra.mxu1 %v5505_v35  ;;  %v6085_v9 = vpack.c.bf16 %v10637_v44, %v10638_v43  ;;  %v10645_v26 = vand.u32 4294901760, %v11383_v12  ;;  %v11386_v44 = vld [vmem:[#allocation77_spill] sm:$0xff]  ;;  %v10658_v36 = vand.u32 4294901760, %v11387_v7  ;;  %v10665_v19 = vand.u32 4294901760, %v11394_v3 }
  0xff   : > { %v5507_v45 = vpack.c.bf16 %v1161_v23, %v1149_v59  ;;  %v1155_v16 = vand.u32 4294901760, %v1154_v20  ;;  %v1167_v27 = vand.u32 4294901760, %v1166_v40  ;;  %v1172_v35 = vsub.f32 %v11382_v22, %v10642_v41  ;;  %v11389_v59 = vld [vmem:[#allocation80_spill] sm:$0xff]  ;;  %v11421_v22 = vld [vmem:[#allocation123_spill] sm:$0xff] }
 0x100   : > { %6086 = vmatpush1.bf16.msra.mxu0 %v6085_v9  ;;  %v1184_v17 = vsub.f32 %v11383_v12, %v10645_v26  ;;  %v10651_v43 = vand.u32 4294901760, %v11386_v44  ;;  %v11388_v23 = vand.u32 4294901760, %v11384_v30  ;;  %v10657_v40 = vand.u32 4294901760, %v11389_v59  ;;  %v11390_v9 = vld [vmem:[#allocation81_spill] sm:$0xff] }
 0x101   : > { %5508 = vmatprep.subr.bf16.mxu1 %v5507_v45  ;;  %v5509_v42 = vpack.c.bf16 %v1167_v27, %v1155_v16  ;;  %v10656_v6 = vand.u32 4294901760, %v11390_v9  ;;  %v1173_v41 = vand.u32 4294901760, %v1172_v35  ;;  %v1190_v45 = vsub.f32 %v11387_v7, %v10658_v36  ;;  %v11391_v27 = vld [vmem:[#allocation83_spill] sm:$0xff]  ;;  %v11396_v36 = vld [vmem:[#allocation90_spill] sm:$0xff] }
 0x102   : > { %v6087_v20 = vpack.c.bf16 %v10646_v60, %v11388_v23  ;;  %v1185_v52 = vand.u32 4294901760, %v1184_v17  ;;  %v1178_v26 = vsub.f32 %v11386_v44, %v10651_v43  ;;  %v10661_v23 = vand.u32 4294901760, %v11391_v27  ;;  %v11392_v60 = vld [vmem:[#allocation84_spill] sm:$0xff]  ;;  %v11393_v17 = vld [vmem:[#allocation85_spill] sm:$0xff]  ;;  %v11412_v7 = vld [vmem:[#allocation111_spill] sm:$0xff] }
 0x103   : > { %5510 = vmatpush1.bf16.msra.mxu1 %v5509_v42  ;;  %v6089_v16 = vpack.c.bf16 %v10656_v6, %v10657_v40  ;;  %v10664_v35 = vand.u32 4294901760, %v11392_v60  ;;  %v1191_v43 = vand.u32 4294901760, %v1190_v45  ;;  %v11395_v6 = vld [vmem:[#allocation89_spill] sm:$0xff]  ;;  %v10675_v9 = vand.u32 4294901760, %v11396_v36 }
 0x104   : > { %6088 = vmatprep.subr.bf16.mxu0 %v6087_v20  ;;  %v5511_v30 = vpack.c.bf16 %v1185_v52, %v1173_v41  ;;  %v1179_v51 = vand.u32 4294901760, %v1178_v26  ;;  %v1196_v42 = vsub.f32 %v11391_v27, %v10661_v23  ;;  %v10670_v40 = vand.u32 4294901760, %v11395_v6  ;;  %v11398_v26 = vld [vmem:[#allocation92_spill] sm:$0xff] }
 0x105   : > { %6090 = vmatpush1.bf16.msra.mxu0 %v6089_v16  ;;  %v1208_v20 = vsub.f32 %v11392_v60, %v10664_v35  ;;  %v11397_v52 = vand.u32 4294901760, %v11393_v17  ;;  %v10674_v45 = vand.u32 4294901760, %v11398_v26  ;;  %v11399_v16 = vld [vmem:[#allocation93_spill] sm:$0xff]  ;;  %v10697_v44 = vand.u32 4294901760, %v11412_v7 }
 0x106   : > { %5512 = vmatprep.subr.bf16.mxu1 %v5511_v30  ;;  %v5513_v62 = vpack.c.bf16 %v1191_v43, %v1179_v51  ;;  %v10673_v59 = vand.u32 4294901760, %v11399_v16  ;;  %v1197_v23 = vand.u32 4294901760, %v1196_v42  ;;  %v1202_v35 = vsub.f32 %v11395_v6, %v10670_v40  ;;  %v11400_v43 = vld [vmem:[#allocation95_spill] sm:$0xff] }
 0x107   : > { %v6091_v41 = vpack.c.bf16 %v10665_v19, %v11397_v52  ;;  %v1209_v48 = vand.u32 4294901760, %v1208_v20  ;;  %v1214_v30 = vsub.f32 %v11396_v36, %v10675_v9  ;;  %v10678_v52 = vand.u32 4294901760, %v11400_v43  ;;  %v11401_v19 = vld [vmem:[#allocation96_spill] sm:$0xff]  ;;  %v11402_v20 = vld [vmem:[#allocation97_spill] sm:$0xff]  ;;  %v11403_v6 = vld [vmem:[#allocation99_spill] sm:$0xff] }
 0x108   : > { %5514 = vmatpush1.bf16.msra.mxu1 %v5513_v62  ;;  %v6093_v51 = vpack.c.bf16 %v10673_v59, %v10674_v45  ;;  %v10680_v42 = vand.u32 4294901760, %v11401_v19  ;;  %v1203_v49 = vand.u32 4294901760, %v1202_v35  ;;  %v10681_v60 = vand.u32 4294901760, %v11403_v6  ;;  %v11404_v59 = vld [vmem:[#allocation101_spill] sm:$0xff]  ;;  %v11405_v9 = vld [vmem:[#allocation102_spill] sm:$0xff]  ;;  %v11407_v35 = vld [vmem:[#allocation104_spill] sm:$0xff] }
 0x109   : > { %6092 = vmatprep.subr.bf16.mxu0 %v6091_v41  ;;  %v5515_v17 = vpack.c.bf16 %v1209_v48, %v1197_v23  ;;  %v1215_v40 = vand.u32 4294901760, %v1214_v30  ;;  %v1220_v62 = vsub.f32 %v11400_v43, %v10678_v52  ;;  %v10685_v45 = vand.u32 4294901760, %v11404_v59 }
 0x10a   : > { %6094 = vmatpush1.bf16.msra.mxu0 %v6093_v51  ;;  %v1232_v41 = vsub.f32 %v11401_v19, %v10680_v42  ;;  %v10690_v16 = vand.u32 4294901760, %v11405_v9  ;;  %v11406_v48 = vand.u32 4294901760, %v11402_v20  ;;  %v10689_v30 = vand.u32 4294901760, %v11407_v35  ;;  %v11408_v51 = vld [vmem:[#allocation105_spill] sm:$0xff] }
 0x10b   : > { %5516 = vmatprep.subr.bf16.mxu1 %v5515_v17  ;;  %v5517_v3 = vpack.c.bf16 %v1215_v40, %v1203_v49  ;;  %v10688_v26 = vand.u32 4294901760, %v11408_v51  ;;  %v1221_v52 = vand.u32 4294901760, %v1220_v62  ;;  %v1226_v42 = vsub.f32 %v11404_v59, %v10685_v45  ;;  %v11409_v40 = vld [vmem:[#allocation107_spill] sm:$0xff] }
 0x10c   : > { %v6095_v23 = vpack.c.bf16 %v10681_v60, %v11406_v48  ;;  %v1233_v36 = vand.u32 4294901760, %v1232_v41  ;;  %v1238_v17 = vsub.f32 %v11405_v9, %v10690_v16  ;;  %v10693_v48 = vand.u32 4294901760, %v11409_v40  ;;  %v11410_v60 = vld [vmem:[#allocation108_spill] sm:$0xff]  ;;  %v11411_v41 = vld [vmem:[#allocation109_spill] sm:$0xff]  ;;  %v11414_v16 = vld [vmem:[#allocation114_spill] sm:$0xff] }
 0x10d   : > { %5518 = vmatpush1.bf16.msra.mxu1 %v5517_v3  ;;  %v6097_v49 = vpack.c.bf16 %v10688_v26, %v10689_v30  ;;  %v10696_v62 = vand.u32 4294901760, %v11410_v60  ;;  %v1227_v27 = vand.u32 4294901760, %v1226_v42  ;;  %v11413_v26 = vld [vmem:[#allocation113_spill] sm:$0xff]  ;;  %v10706_v51 = vand.u32 4294901760, %v11414_v16  ;;  %v11416_v42 = vld [vmem:[#allocation116_spill] sm:$0xff] }
 0x10e   : > { %6096 = vmatprep.subr.bf16.mxu0 %v6095_v23  ;;  %v5519_v20 = vpack.c.bf16 %v1233_v36, %v1221_v52  ;;  %v1239_v45 = vand.u32 4294901760, %v1238_v17  ;;  %v1244_v3 = vsub.f32 %v11409_v40, %v10693_v48  ;;  %v10701_v30 = vand.u32 4294901760, %v11413_v26 }
 0x10f   : > { %6098 = vmatpush1.bf16.msra.mxu0 %v6097_v49  ;;  %v1256_v23 = vsub.f32 %v11410_v60, %v10696_v62  ;;  %v11415_v36 = vand.u32 4294901760, %v11411_v41  ;;  %v10705_v17 = vand.u32 4294901760, %v11416_v42  ;;  %v11417_v49 = vld [vmem:[#allocation117_spill] sm:$0xff]  ;;  %v10712_v18 = vand.u32 4294901760, %v11421_v22 }
 0x110   : > { %5520 = vmatprep.subr.bf16.mxu1 %v5519_v20  ;;  %v5521_v6 = vpack.c.bf16 %v1239_v45, %v1227_v27  ;;  %v10704_v35 = vand.u32 4294901760, %v11417_v49  ;;  %v1245_v48 = vand.u32 4294901760, %v1244_v3  ;;  %v1250_v62 = vsub.f32 %v11413_v26, %v10701_v30  ;;  %v11418_v45 = vld [vmem:[#allocation119_spill] sm:$0xff] }
 0x111   : > { %v6099_v52 = vpack.c.bf16 %v10697_v44, %v11415_v36  ;;  %v1257_v11 = vand.u32 4294901760, %v1256_v23  ;;  %v1262_v20 = vsub.f32 %v11414_v16, %v10706_v51  ;;  %v10709_v36 = vand.u32 4294901760, %v11418_v45  ;;  %v11419_v44 = vld [vmem:[#allocation120_spill] sm:$0xff]  ;;  %v11420_v23 = vld [vmem:[#allocation121_spill] sm:$0xff]  ;;  %v11423_v51 = vld [vmem:[#allocation126_spill] sm:$0xff] }
 0x112   : > { %5522 = vmatpush1.bf16.msra.mxu1 %v5521_v6  ;;  %v6101_v27 = vpack.c.bf16 %v10704_v35, %v10705_v17  ;;  %v10711_v3 = vand.u32 4294901760, %v11419_v44  ;;  %v1251_v12 = vand.u32 4294901760, %v1250_v62  ;;  %v11422_v35 = vld [vmem:[#allocation125_spill] sm:$0xff]  ;;  %v10722_v49 = vand.u32 4294901760, %v11423_v51  ;;  %v11425_v62 = vld [vmem:[#allocation128_spill] sm:$0xff] }
 0x113   : > { %6100 = vmatprep.subr.bf16.mxu0 %v6099_v52  ;;  %v5523_v41 = vpack.c.bf16 %v1257_v11, %v1245_v48  ;;  %v1263_v30 = vand.u32 4294901760, %v1262_v20  ;;  %v1268_v6 = vsub.f32 %v11418_v45, %v10709_v36  ;;  %v10716_v17 = vand.u32 4294901760, %v11422_v35 }
 0x114   : > { %6102 = vmatpush1.bf16.msra.mxu0 %v6101_v27  ;;  %v1280_v52 = vsub.f32 %v11419_v44, %v10711_v3  ;;  %v11424_v11 = vand.u32 4294901760, %v11420_v23  ;;  %v10721_v20 = vand.u32 4294901760, %v11425_v62  ;;  %v11426_v27 = vld [vmem:[#allocation129_spill] sm:$0xff]  ;;  %v10729_v33 = vand.u32 4294901760, %v11430_v54 }
 0x115   : > { %5524 = vmatprep.subr.bf16.mxu1 %v5523_v41  ;;  %v5525_v7 = vpack.c.bf16 %v1263_v30, %v1251_v12  ;;  %v10720_v42 = vand.u32 4294901760, %v11426_v27  ;;  %v1269_v36 = vand.u32 4294901760, %v1268_v6  ;;  %v1274_v3 = vsub.f32 %v11422_v35, %v10716_v17  ;;  %v11427_v30 = vld [vmem:[#allocation131_spill] sm:$0xff] }
 0x116   : > { %v6103_v48 = vpack.c.bf16 %v10712_v18, %v11424_v11  ;;  %v1281_v10 = vand.u32 4294901760, %v1280_v52  ;;  %v1286_v41 = vsub.f32 %v11423_v51, %v10722_v49  ;;  %v10725_v11 = vand.u32 4294901760, %v11427_v30  ;;  %v11428_v18 = vld [vmem:[#allocation132_spill] sm:$0xff]  ;;  %v11429_v52 = vld [vmem:[#allocation133_spill] sm:$0xff]  ;;  %v11432_v49 = vld [vmem:[#allocation138_spill] sm:$0xff] }
 0x117   : > { %5526 = vmatpush1.bf16.msra.mxu1 %v5525_v7  ;;  %v6105_v12 = vpack.c.bf16 %v10720_v42, %v10721_v20  ;;  %v10728_v6 = vand.u32 4294901760, %v11428_v18  ;;  %v1275_v21 = vand.u32 4294901760, %v1274_v3  ;;  %v11431_v42 = vld [vmem:[#allocation137_spill] sm:$0xff]  ;;  %v10741_v27 = vand.u32 4294901760, %v11432_v49  ;;  %v11434_v3 = vld [vmem:[#allocation140_spill] sm:$0xff] }
 0x118   : > { %6104 = vmatprep.subr.bf16.mxu0 %v6103_v48  ;;  %v5527_v23 = vpack.c.bf16 %v1281_v10, %v1269_v36  ;;  %v1287_v17 = vand.u32 4294901760, %v1286_v41  ;;  %v1292_v7 = vsub.f32 %v11427_v30, %v10725_v11  ;;  %v10734_v20 = vand.u32 4294901760, %v11431_v42 }
 0x119   : > { %6106 = vmatpush1.bf16.msra.mxu0 %v6105_v12  ;;  %v1304_v48 = vsub.f32 %v11428_v18, %v10728_v6  ;;  %v11433_v10 = vand.u32 4294901760, %v11429_v52  ;;  %v10740_v41 = vand.u32 4294901760, %v11434_v3  ;;  %v11435_v12 = vld [vmem:[#allocation141_spill] sm:$0xff]  ;;  %v10748_v63 = vand.u32 4294901760, %v11439_v14 }
 0x11a   : > { %5528 = vmatprep.subr.bf16.mxu1 %v5527_v23  ;;  %v5529_v22 = vpack.c.bf16 %v1287_v17, %v1275_v21  ;;  %v10739_v62 = vand.u32 4294901760, %v11435_v12  ;;  %v1293_v11 = vand.u32 4294901760, %v1292_v7  ;;  %v1298_v6 = vsub.f32 %v11431_v42, %v10734_v20  ;;  %v11436_v17 = vld [vmem:[#allocation143_spill] sm:$0xff] }
 0x11b   : > { %v6107_v36 = vpack.c.bf16 %v10729_v33, %v11433_v10  ;;  %v1305_v31 = vand.u32 4294901760, %v1304_v48  ;;  %v1310_v23 = vsub.f32 %v11432_v49, %v10741_v27  ;;  %v10744_v10 = vand.u32 4294901760, %v11436_v17  ;;  %v11437_v33 = vld [vmem:[#allocation144_spill] sm:$0xff]  ;;  %v11438_v48 = vld [vmem:[#allocation145_spill] sm:$0xff]  ;;  %v11441_v27 = vld [vmem:[#allocation150_spill] sm:$0xff] }
 0x11c   : > { %5530 = vmatpush1.bf16.msra.mxu1 %v5529_v22  ;;  %v6109_v21 = vpack.c.bf16 %v10739_v62, %v10740_v41  ;;  %v10747_v7 = vand.u32 4294901760, %v11437_v33  ;;  %v1299_v13 = vand.u32 4294901760, %v1298_v6  ;;  %v11440_v62 = vld [vmem:[#allocation149_spill] sm:$0xff]  ;;  %v10759_v12 = vand.u32 4294901760, %v11441_v27  ;;  %v11443_v6 = vld [vmem:[#allocation152_spill] sm:$0xff] }
 0x11d   : > { %6108 = vmatprep.subr.bf16.mxu0 %v6107_v36  ;;  %v5531_v52 = vpack.c.bf16 %v1305_v31, %v1293_v11  ;;  %v1311_v20 = vand.u32 4294901760, %v1310_v23  ;;  %v1316_v22 = vsub.f32 %v11436_v17, %v10744_v10  ;;  %v10753_v41 = vand.u32 4294901760, %v11440_v62 }
 0x11e   : > { %6110 = vmatpush1.bf16.msra.mxu0 %v6109_v21  ;;  %v1328_v36 = vsub.f32 %v11437_v33, %v10747_v7  ;;  %v11442_v31 = vand.u32 4294901760, %v11438_v48  ;;  %v10758_v23 = vand.u32 4294901760, %v11443_v6  ;;  %v11444_v21 = vld [vmem:[#allocation153_spill] sm:$0xff] }
 0x11f   : > { %5532 = vmatprep.subr.bf16.mxu1 %v5531_v52  ;;  %v5533_v54 = vpack.c.bf16 %v1311_v20, %v1299_v13  ;;  %v10757_v3 = vand.u32 4294901760, %v11444_v21  ;;  %v1317_v10 = vand.u32 4294901760, %v1316_v22  ;;  %v1322_v7 = vsub.f32 %v11440_v62, %v10753_v41  ;;  %v11445_v20 = vld [vmem:[#allocation155_spill] sm:$0xff] }
 0x120   : > { %v6111_v11 = vpack.c.bf16 %v10748_v63, %v11442_v31  ;;  %v1329_v61 = vand.u32 4294901760, %v1328_v36  ;;  %v1334_v52 = vsub.f32 %v11441_v27, %v10759_v12  ;;  %v10761_v31 = vand.u32 4294901760, %v11445_v20  ;;  %v11446_v63 = vld [vmem:[#allocation156_spill] sm:$0xff]  ;;  %v11447_v36 = vld [vmem:[#allocation157_spill] sm:$0xff]  ;;  %v11450_v12 = vld [vmem:[#allocation162_spill] sm:$0xff] }
 0x121   : > { %5534 = vmatpush1.bf16.msra.mxu1 %v5533_v54  ;;  %v6113_v13 = vpack.c.bf16 %v10757_v3, %v10758_v23  ;;  %v10763_v22 = vand.u32 4294901760, %v11446_v63  ;;  %v10766_v14 = vand.u32 4294901760, %v11447_v36  ;;  %v1323_v38 = vand.u32 4294901760, %v1322_v7  ;;  %v11449_v3 = vld [vmem:[#allocation161_spill] sm:$0xff] }
 0x122   : > { %6112 = vmatprep.subr.bf16.mxu0 %v6111_v11  ;;  %v5535_v48 = vpack.c.bf16 %v1329_v61, %v1317_v10  ;;  %v1335_v41 = vand.u32 4294901760, %v1334_v52  ;;  %v10765_v62 = vand.u32 4294901760, %v11448_v25  ;;  %v1340_v54 = vsub.f32 %v11445_v20, %v10761_v31  ;;  %v635_v61 = vld [vmem:[%s10347_s0 + $0x38] sm:$0xff]  ;;  %v11451_v52 = vld [vmem:[#allocation164_spill] sm:$0xff]  ;;  %v11452_v31 = vld [vmem:[#allocation165_spill] sm:$0xff] }
 0x123   : > { %6114 = vmatpush1.bf16.msra.mxu0 %v6113_v13  ;;  %v1352_v11 = vsub.f32 %v11446_v63, %v10763_v22  ;;  %v10772_v13 = vand.u32 4294901760, %v11451_v52  ;;  %v10771_v6 = vand.u32 4294901760, %v11452_v31  ;;  %v637_v22 = vld [vmem:[%s10347_s0 + $0x48] sm:$0xff]  ;;  %v11453_v63 = vand.u32 4294901760, %v11449_v3  ;;  %v11456_v25 = vld [vmem:[#allocation167_spill] sm:$0xff] }
 0x124   : > { %5536 = vmatprep.subr.bf16.mxu1 %v5535_v48  ;;  %v5537_v10 = vpack.c.bf16 %v1335_v41, %v1323_v38  ;;  %v6115_v7 = vpack.c.bf16 %v10765_v62, %v10766_v14  ;;  %v1341_v21 = vand.u32 4294901760, %v1340_v54  ;;  %v11454_v38 = vand.u32 4294901760, %v11450_v12  ;;  %v11460_v31 = vld [vmem:[#allocation169_spill] sm:$0xff] }
 0x125   : > { %v1353_v23 = vand.u32 4294901760, %v1352_v11  ;;  %v1346_v48 = vsub.f32 %v11449_v3, %v11453_v63  ;;  %v6117_v62 = vpack.c.bf16 %v10771_v6, %v10772_v13  ;;  %v8260_v14 = vand.u32 4294901760, %v635_v61  ;;  %v11457_v11 = vld [vmem:[#allocation168_spill] sm:$0xff]  ;;  %v634_v63 = vld [vmem:[%s10347_s0 + $0x30] sm:$0xff] }
 0x126   : > { %v1358_v41 = vsub.f32 %v11450_v12, %v11454_v38  ;;  %5538 = vmatpush1.bf16.msra.mxu1 %v5537_v10  ;;  %6116 = vmatprep.subr.bf16.mxu0 %v6115_v7  ;;  %v10775_v54 = vand.u32 4294901760, %v11456_v25  ;;  %v10778_v36 = vand.u32 4294901760, %v11457_v11  ;;  %v8267_v10 = vand.u32 4294901760, %v637_v22 }
 0x127   : > { %11455 = vst [vmem:[#allocation202_spill] sm:$0xff] %v8260_v14  ;;  %v5539_v3 = vpack.c.bf16 %v1353_v23, %v1341_v21  ;;  %v1347_v20 = vand.u32 4294901760, %v1346_v48  ;;  %6118 = vmatpush1.bf16.msra.mxu0 %v6117_v62  ;;  %v8270_v7 = vsub.f32 %v635_v61, %v8260_v14  ;;  %v10785_v52 = vand.u32 4294901760, %v11460_v31  ;;  %v636_v61 = vld [vmem:[%s10347_s0 + $0x40] sm:$0xff] }
 0x128   : > { %v1359_v38 = vand.u32 4294901760, %v1358_v41  ;;  %11458 = vst [vmem:[#allocation203_spill] sm:$0xff] %v8267_v10  ;;  %v1364_v6 = vsub.f32 %v11456_v25, %v10775_v54  ;;  %v1376_v13 = vsub.f32 %v11457_v11, %v10778_v36  ;;  %v8280_v21 = vsub.f32 %v637_v22, %v8267_v10  ;;  %v11463_v36 = vld [vmem:[#allocation173_spill] sm:$0xff]  ;;  %v11468_v31 = vld [vmem:[#allocation176_spill] sm:$0xff] }
 0x129   : > { %11459 = vst [vmem:[#allocation204_spill] sm:$0xff] %v8270_v7  ;;  %5540 = vmatprep.subr.bf16.mxu1 %v5539_v3  ;;  %v10784_v62 = vand.u32 4294901760, %v7791_v56  ;;  %v8283_v48 = vand.u32 4294901760, %v634_v63  ;;  %v10789_v41 = vand.u32 4294901760, %v8270_v7  ;;  %v10790_v11 = vand.u32 4294901760, %v11463_v36 }
 0x12a   : > { %v5541_v23 = vpack.c.bf16 %v1359_v38, %v1347_v20  ;;  %11461 = vst [vmem:[#allocation205_spill] sm:$0xff] %v8280_v21  ;;  %v1365_v54 = vand.u32 4294901760, %v1364_v6  ;;  %v1377_v14 = vand.u32 4294901760, %v1376_v13  ;;  %v11465_v38 = vld [vmem:[#allocation174_spill] sm:$0xff]  ;;  %v641_v6 = vld [vmem:[%s10347_s0 + $0x68] sm:$0xff]  ;;  %v8308_v56 = vand.u32 4294901760, %v636_v61 }
 0x12b   : > { %11462 = vst [vmem:[#allocation206_spill] sm:$0xff] %v8283_v48  ;;  %v6119_v20 = vpack.c.bf16 %v10784_v62, %v10785_v52  ;;  %v8296_v22 = vsub.f32 %v634_v63, %v8283_v48  ;;  %v10793_v10 = vand.u32 4294901760, %v11465_v38  ;;  %v1003_v13 = vsub.f32 %v8270_v7, %v10789_v41  ;;  %v11469_v41 = vld [vmem:[#allocation177_spill] sm:$0xff] }
 0x12c   : > { %5542 = vmatpush1.bf16.msra.mxu1 %v5541_v23  ;;  %v5543_v23 = vpack.c.bf16 %v1377_v14, %v1365_v54  ;;  %v1370_v3 = vsub.f32 %v11463_v36, %v10790_v11  ;;  %11466 = vst [vmem:[#allocation208_spill] sm:$0xff] %v8308_v56  ;;  %v11467_v63 = vand.u32 4294901760, %v8280_v21  ;;  %v10804_v48 = vand.u32 4294901760, %v11468_v31  ;;  %v643_v54 = vld [vmem:[%s10347_s0 + $0x78] sm:$0xff] }
 0x12d   : > { %11464 = vst [vmem:[#allocation207_spill] sm:$0xff] %v8296_v22  ;;  %6120 = vmatprep.subr.bf16.mxu0 %v6119_v20  ;;  %v10801_v62 = vand.u32 4294901760, %v8296_v22  ;;  %v1382_v52 = vsub.f32 %v11465_v38, %v10793_v10  ;;  %v10803_v14 = vand.u32 4294901760, %v11469_v41  ;;  %v1004_v11 = vand.u32 4294901760, %v1003_v13  ;;  %v11472_v36 = vld [vmem:[#allocation179_spill] sm:$0xff]  ;;  %v11474_v13 = vld [vmem:[#allocation180_spill] sm:$0xff] }
 0x12e   : > { %3312 = vmatprep.mubr.f32.mxu0 %v11467_v63  ;;  %5544 = vmatprep.subr.bf16.mxu1 %v5543_v23  ;;  %v1371_v7 = vand.u32 4294901760, %v1370_v3  ;;  %v8322_v63 = vsub.f32 %v636_v61, %v8308_v56  ;;  %v8324_v20 = vand.u32 4294901760, %v641_v6  ;;  %v10809_v25 = vand.u32 4294901760, %v11472_v36 }
 0x12f   : > { %v1009_v10 = vsub.f32 %v8296_v22, %v10801_v62  ;;  %v1383_v21 = vand.u32 4294901760, %v1382_v52  ;;  %v6121_v38 = vpack.c.bf16 %v10803_v14, %v10804_v48  ;;  %1005 = vmatprep.mubr.f32.mxu1 %v1004_v11  ;;  %v10810_v23 = vand.u32 4294901760, %v11474_v13  ;;  %v640_v52 = vld [vmem:[%s10347_s0 + $0x60] sm:$0xff]  ;;  %v11476_v14 = vld [vmem:[#allocation181_spill] sm:$0xff] }
 0x130   : > { %11470 = vst [vmem:[#allocation209_spill] sm:$0xff] %v8322_v63  ;;  %11471 = vst [vmem:[#allocation210_spill] sm:$0xff] %v8324_v20  ;;  %v10808_v3 = vand.u32 4294901760, %v8322_v63  ;;  %v8336_v61 = vsub.f32 %v641_v6, %v8324_v20  ;;  %v8339_v56 = vand.u32 4294901760, %v643_v54  ;;  %v1388_v11 = vsub.f32 %v11472_v36, %v10809_v25 }
 0x131   : > { %v1010_v62 = vand.u32 4294901760, %v1009_v10  ;;  %v5545_v31 = vpack.c.bf16 %v1383_v21, %v1371_v7  ;;  %6122 = vmatpush1.bf16.msra.mxu0 %v6121_v38  ;;  %v10818_v48 = vand.u32 4294901760, %v11476_v14  ;;  %v1400_v41 = vsub.f32 %v11474_v13, %v10810_v23  ;;  %v642_v7 = vld [vmem:[%s10347_s0 + $0x70] sm:$0xff] }
 0x132   : > { %11473 = vst [vmem:[#allocation211_spill] sm:$0xff] %v8336_v61  ;;  %11475 = vst [vmem:[#allocation212_spill] sm:$0xff] %v8339_v56  ;;  %3316 = vmatmul.mubr.f32.gmra.mrb[2].mxu0 %v10808_v3  ;;  %v10815_v6 = vand.u32 4294901760, %v8336_v61  ;;  %v8355_v22 = vsub.f32 %v643_v54, %v8339_v56  ;;  %v1389_v21 = vand.u32 4294901760, %v1388_v11  ;;  %v8361_v38 = vand.u32 4294901760, %v640_v52 }
 0x133   : > { %1011 = vmatmul.mubr.f32.gmra.mrb[2].mxu1 %v1010_v62  ;;  %v10819_v3 = vand.u32 4294901760, %v7831_v24  ;;  %v1401_v23 = vand.u32 4294901760, %v1400_v41  ;;  %v11479_v63 = vand.u32 4294901760, %v7827_v57  ;;  %v647_v41 = vld [vmem:[%s10347_s0 + $0x98] sm:$0xff] }
 0x134   : > { %11477 = vst [vmem:[#allocation213_spill] sm:$0xff] %v8355_v22  ;;  %11478 = vst [vmem:[#allocation214_spill] sm:$0xff] %v8361_v38  ;;  %5546 = vmatpush1.bf16.msra.mxu1 %v5545_v31  ;;  %v1019_v54 = vsub.f32 %v8336_v61, %v10815_v6  ;;  %v8374_v11 = vsub.f32 %v640_v52, %v8361_v38  ;;  %v11481_v31 = vand.u32 4294901760, %v7836_v5  ;;  %v8382_v6 = vand.u32 4294901760, %v642_v7 }
 0x135   : > { %v6123_v62 = vpack.c.bf16 %v11479_v63, %v10818_v48  ;;  %v1394_v25 = vsub.f32 %v7831_v24, %v10819_v3  ;;  %v5547_v57 = vpack.c.bf16 %v1401_v23, %v1389_v21  ;;  %v11483_v63 = vand.u32 4294901760, %v8355_v22  ;;  %v11512_v22 = vld [vmem:[#allocation202_spill] sm:$0xff] }
 0x136   : > { %11480 = vst [vmem:[#allocation215_spill] sm:$0xff] %v8374_v11  ;;  %v1406_v56 = vsub.f32 %v7836_v5, %v11481_v31  ;;  %11482 = vst [vmem:[#allocation216_spill] sm:$0xff] %v8382_v6  ;;  %v1020_v10 = vand.u32 4294901760, %v1019_v54  ;;  %v10826_v52 = vand.u32 4294901760, %v7840_v2  ;;  %v10825_v48 = vand.u32 4294901760, %v7842_v32  ;;  %v649_v31 = vld [vmem:[%s10347_s0 + $0xa8] sm:$0xff] }
 0x137   : > { %3324 = vmatprep.mubr.f32.mxu0 %v11483_v63  ;;  %6124 = vmatprep.subr.bf16.mxu0 %v6123_v62  ;;  %v10829_v3 = vand.u32 4294901760, %v8374_v11  ;;  %v1395_v14 = vand.u32 4294901760, %v1394_v25  ;;  %v8396_v38 = vsub.f32 %v642_v7, %v8382_v6  ;;  %v8402_v21 = vand.u32 4294901760, %v647_v41  ;;  %v646_v25 = vld [vmem:[%s10347_s0 + $0x90] sm:$0xff] }
 0x138   : > { %v1407_v61 = vand.u32 4294901760, %v1406_v56  ;;  %1021 = vmatprep.mubr.f32.mxu1 %v1020_v10  ;;  %5548 = vmatprep.subr.bf16.mxu1 %v5547_v57  ;;  %v6125_v23 = vpack.c.bf16 %v10825_v48, %v10826_v52  ;;  %v10831_v54 = vand.u32 4294901760, %v7849_v34  ;;  %v10830_v62 = vand.u32 4294901760, %v7851_v46 }
 0x139   : > { %11484 = vst [vmem:[#allocation217_spill] sm:$0xff] %v8396_v38  ;;  %11485 = vst [vmem:[#allocation218_spill] sm:$0xff] %v8402_v21  ;;  %v1025_v56 = vsub.f32 %v8374_v11, %v10829_v3  ;;  %v10832_v10 = vand.u32 4294901760, %v8396_v38  ;;  %v8413_v7 = vand.u32 4294901760, %v649_v31  ;;  %v8416_v63 = vsub.f32 %v647_v41, %v8402_v21 }
 0x13a   : > { %v5549_v57 = vpack.c.bf16 %v1407_v61, %v1395_v14  ;;  %6126 = vmatpush1.bf16.msra.mxu0 %v6125_v23  ;;  %v1412_v48 = vsub.f32 %v7849_v34, %v10831_v54  ;;  %v1424_v52 = vsub.f32 %v7851_v46, %v10830_v62  ;;  %v10839_v61 = vand.u32 4294901760, %v7861_v55  ;;  %v648_v23 = vld [vmem:[%s10347_s0 + $0xa0] sm:$0xff] }
 0x13b   : > { %11486 = vst [vmem:[#allocation219_spill] sm:$0xff] %v8413_v7  ;;  %11487 = vst [vmem:[#allocation220_spill] sm:$0xff] %v8416_v63  ;;  %v1026_v3 = vand.u32 4294901760, %v1025_v56  ;;  %3328 = vmatmul.mubr.f32.gmra.mrb[4].mxu0 %v10832_v10  ;;  %v8428_v14 = vsub.f32 %v649_v31, %v8413_v7  ;;  %v8431_v41 = vand.u32 4294901760, %v646_v25  ;;  %v10840_v62 = vand.u32 4294901760, %v8416_v63 }
 0x13c   : > { %5550 = vmatpush1.bf16.msra.mxu1 %v5549_v57  ;;  %v1413_v54 = vand.u32 4294901760, %v1412_v48  ;;  %v1425_v32 = vand.u32 4294901760, %v1424_v52  ;;  %v10841_v56 = vand.u32 4294901760, %v7865_v47  ;;  %v11490_v31 = vand.u32 4294901760, %v7855_v50 }
 0x13d   : > { %11488 = vst [vmem:[#allocation221_spill] sm:$0xff] %v8428_v14  ;;  %11489 = vst [vmem:[#allocation222_spill] sm:$0xff] %v8431_v41  ;;  %1027 = vmatmul.mubr.f32.gmra.mrb[4].mxu1 %v1026_v3  ;;  %v8444_v2 = vsub.f32 %v646_v25, %v8431_v41  ;;  %v10842_v38 = vand.u32 4294901760, %v7867_v4  ;;  %v1035_v48 = vsub.f32 %v8416_v63, %v10840_v62  ;;  %v8453_v57 = vand.u32 4294901760, %v648_v23 }
 0x13e   : > { %v6127_v10 = vpack.c.bf16 %v10839_v61, %v11490_v31  ;;  %v5551_v52 = vpack.c.bf16 %v1425_v32, %v1413_v54  ;;  %v1418_v3 = vsub.f32 %v7865_v47, %v10841_v56  ;;  %v11493_v50 = vand.u32 4294901760, %v8428_v14 }
 0x13f   : > { %11491 = vst [vmem:[#allocation223_spill] sm:$0xff] %v8444_v2  ;;  %11492 = vst [vmem:[#allocation224_spill] sm:$0xff] %v8453_v57  ;;  %v10850_v25 = vand.u32 4294901760, %v8444_v2  ;;  %v1430_v31 = vsub.f32 %v7867_v4, %v10842_v38  ;;  %v10848_v61 = vand.u32 4294901760, %v7871_v8  ;;  %v10847_v32 = vand.u32 4294901760, %v7873_v1  ;;  %v11502_v1 = vld [vmem:[#allocation155_spill] sm:$0xff] }
 0x140   : > { %3336 = vmatprep.mubr.f32.mxu0 %v11493_v50  ;;  %6128 = vmatprep.subr.bf16.mxu0 %v6127_v10  ;;  %v1036_v54 = vand.u32 4294901760, %v1035_v48  ;;  %v1419_v62 = vand.u32 4294901760, %v1418_v3  ;;  %v8464_v56 = vsub.f32 %v648_v23, %v8453_v57  ;;  %v5555_v23 = vpack.c.bf16 %v7313_v29, %v7311_v28  ;;  %v11496_v3 = vld [vmem:[#allocation5_spill] sm:$0xff]  ;;  %v11510_v8 = vld [vmem:[#allocation35_spill] sm:$0xff] }
 0x141   : > { %5552 = vmatprep.subr.bf16.mxu1 %v5551_v52  ;;  %v1041_v50 = vsub.f32 %v8444_v2, %v10850_v25  ;;  %v1431_v10 = vand.u32 4294901760, %v1430_v31  ;;  %v6129_v38 = vpack.c.bf16 %v10847_v32, %v10848_v61  ;;  %v11495_v52 = vld [vmem:[#allocation14_spill] sm:$0xff]  ;;  %v5557_v31 = vpack.c.bf16 %v7330_v39, %v7326_v37  ;;  %v11503_v61 = vld [vmem:[#allocation156_spill] sm:$0xff]  ;;  %v11505_v25 = vld [vmem:[#allocation167_spill] sm:$0xff] }
 0x142   : > { %11494 = vst [vmem:[#allocation225_spill] sm:$0xff] %v8464_v56  ;;  %1037 = vmatprep.mubr.f32.mxu1 %v1036_v54  ;;  %v10849_v55 = vand.u32 4294901760, %v8464_v56  ;;  %v5559_v54 = vpack.c.bf16 %v7350_v58, %v7343_v53  ;;  %v11504_v56 = vld [vmem:[#allocation161_spill] sm:$0xff]  ;;  %v11515_v32 = vld [vmem:[#allocation206_spill] sm:$0xff]  ;;  %v11523_v37 = vld [vmem:[#allocation43_spill] sm:$0xff] }
 0x143   : > { %v1042_v14 = vand.u32 4294901760, %v1041_v50  ;;  %v5553_v48 = vpack.c.bf16 %v1431_v10, %v1419_v62  ;;  %6130 = vmatpush1.bf16.msra.mxu0 %v6129_v38  ;;  %v11497_v62 = vld [vmem:[#allocation4_spill] sm:$0xff]  ;;  %v5561_v38 = vpack.c.bf16 %v7368_v15, %v7360_v0  ;;  %v11500_v50 = vld [vmem:[#allocation6_spill] sm:$0xff]  ;;  %v11508_v10 = vld [vmem:[#allocation173_spill] sm:$0xff] }
 0x144   : > { %3340 = vmatmul.mubr.f32.gmra.mrb[6].mxu0 %v10849_v55  ;;  %6132 = vmatprep.subr.bf16.mxu0 %v11495_v52  ;;  %v11498_v55 = vld [vmem:[#allocation7_spill] sm:$0xff]  ;;  %v11506_v52 = vld [vmem:[#allocation168_spill] sm:$0xff]  ;;  %v11509_v15 = vld [vmem:[#allocation174_spill] sm:$0xff] }
 0x145   : > { %1043 = vmatmul.mubr.f32.gmra.mrb[6].mxu1 %v1042_v14  ;;  %3603 = vmatprep.mubr.f32.mxu0 %v11496_v3  ;;  %v11499_v14 = vld [vmem:[#allocation149_spill] sm:$0xff]  ;;  %v11514_v0 = vld [vmem:[#allocation32_spill] sm:$0xff]  ;;  %v11518_v53 = vld [vmem:[#allocation42_spill] sm:$0xff] }
 0x146   : > { %5554 = vmatpush1.bf16.msra.mxu1 %v5553_v48  ;;  %1434 = vmatprep.mubr.f32.mxu1 %v11497_v62  ;;  %v11501_v48 = vld [vmem:[#allocation19_spill] sm:$0xff]  ;;  %v11522_v62 = vld [vmem:[#allocation212_spill] sm:$0xff] }
 0x147   : > { %5556 = vmatprep.subr.bf16.mxu1 %v5555_v23  ;;  %v11507_v23 = vld [vmem:[#allocation25_spill] sm:$0xff] }
 0x148   : > { %3605 = vmatmul.mubr.f32.vlgmr.msra.gmra.mrb[0].mxu0 %v11498_v55 }
 0x149   : > { %1436 = vmatmul.mubr.f32.vlgmr.msra.gmra.mrb[0].mxu1 %v11500_v50  ;;  %6134 = vmatpush1.bf16.msra.mxu0 %v11501_v48  ;;  %v11511_v50 = vld [vmem:[#allocation36_spill] sm:$0xff]  ;;  %v11516_v48 = vld [vmem:[#allocation37_spill] sm:$0xff] }
 0x14a   : > { %5558 = vmatpush1.bf16.msra.mxu1 %v5557_v31  ;;  %6136 = vmatprep.subr.bf16.mxu0 %v11507_v23  ;;  %v5563_v58 = vpack.c.bf16 %v11511_v50, %v11510_v8  ;;  %v11513_v23 = vld [vmem:[#allocation203_spill] sm:$0xff]  ;;  %v11520_v8 = vld [vmem:[#allocation48_spill] sm:$0xff] }
 0x14b   : > { %5560 = vmatprep.subr.bf16.mxu1 %v5559_v54  ;;  %1442 = vmatprep.mubr.f32.mxu1 %v11512_v22  ;;  %v11517_v54 = vld [vmem:[#allocation41_spill] sm:$0xff]  ;;  %v11519_v22 = vld [vmem:[#allocation47_spill] sm:$0xff]  ;;  %v11521_v31 = vld [vmem:[#allocation208_spill] sm:$0xff] }
 0x14c   : > { %3611 = vmatprep.mubr.f32.mxu0 %v11513_v23  ;;  %v5565_v50 = vpack.c.bf16 %v11518_v53, %v11517_v54  ;;  %v5567_v39 = vpack.c.bf16 %v11520_v8, %v11519_v22  ;;  %v11529_v54 = vld [vmem:[#allocation60_spill] sm:$0xff]  ;;  %v11546_v22 = vld [vmem:[#allocation90_spill] sm:$0xff] }
 0x14d   : > { %6138 = vmatpush1.bf16.msra.mxu0 %v11514_v0  ;;  %1444 = vmatmul.mubr.f32.gmra.mrb[2].mxu1 %v11515_v32  ;;  %v11524_v0 = vld [vmem:[#allocation214_spill] sm:$0xff] }
 0x14e   : > { %5562 = vmatpush1.bf16.msra.mxu1 %v5561_v38  ;;  %6140 = vmatprep.subr.bf16.mxu0 %v11516_v48  ;;  %v11525_v38 = vld [vmem:[#allocation49_spill] sm:$0xff]  ;;  %v11526_v48 = vld [vmem:[#allocation52_spill] sm:$0xff]  ;;  %v11527_v32 = vld [vmem:[#allocation54_spill] sm:$0xff] }
 0x14f   : > { %5564 = vmatprep.subr.bf16.mxu1 %v5563_v58  ;;  %3613 = vmatmul.mubr.f32.gmra.mrb[2].mxu0 %v11521_v31  ;;  %v5569_v53 = vpack.c.bf16 %v11527_v32, %v11526_v48  ;;  %v11528_v58 = vld [vmem:[#allocation59_spill] sm:$0xff]  ;;  %v11535_v32 = vld [vmem:[#allocation72_spill] sm:$0xff] }
 0x150   : > { %1450 = vmatprep.mubr.f32.mxu1 %v8324_v20  ;;  %3619 = vmatprep.mubr.f32.mxu0 %v11522_v62  ;;  %v5571_v8 = vpack.c.bf16 %v11529_v54, %v11528_v58  ;;  %v11530_v20 = vld [vmem:[#allocation55_spill] sm:$0xff]  ;;  %v11536_v58 = vld [vmem:[#allocation8_spill] sm:$0xff] }
 0x151   : > { %6142 = vmatpush1.bf16.msra.mxu0 %v11523_v37  ;;  %1452 = vmatmul.mubr.f32.gmra.mrb[4].mxu1 %v11524_v0  ;;  %v11533_v37 = vld [vmem:[#allocation66_spill] sm:$0xff]  ;;  %v11543_v48 = vld [vmem:[#allocation79_spill] sm:$0xff] }
 0x152   : > { %5566 = vmatpush1.bf16.msra.mxu1 %v5565_v50  ;;  %6144 = vmatprep.subr.bf16.mxu0 %v11525_v38  ;;  %v11531_v50 = vld [vmem:[#allocation62_spill] sm:$0xff]  ;;  %v11532_v38 = vld [vmem:[#allocation65_spill] sm:$0xff] }
 0x153   : > { %5568 = vmatprep.subr.bf16.mxu1 %v5567_v39  ;;  %3621 = vmatmul.mubr.f32.gmra.mrb[4].mxu0 %v8382_v6  ;;  %v5573_v0 = vpack.c.bf16 %v11533_v37, %v11532_v38  ;;  %v11534_v39 = vld [vmem:[#allocation71_spill] sm:$0xff] }
 0x154   : > { %1458 = vmatprep.mubr.f32.mxu1 %v8402_v21  ;;  %3627 = vmatprep.mubr.f32.mxu0 %v8413_v7  ;;  %v5575_v54 = vpack.c.bf16 %v11535_v32, %v11534_v39  ;;  %v11537_v21 = vld [vmem:[#allocation67_spill] sm:$0xff]  ;;  %v11544_v32 = vld [vmem:[#allocation86_spill] sm:$0xff]  ;;  %v11545_v39 = vld [vmem:[#allocation89_spill] sm:$0xff] }
 0x155   : > { %6146 = vmatpush1.bf16.msra.mxu0 %v11530_v20  ;;  %1460 = vmatmul.mubr.f32.gmra.mrb[6].mxu1 %v8431_v41  ;;  %v11538_v20 = vld [vmem:[#allocation74_spill] sm:$0xff]  ;;  %v11541_v37 = vld [vmem:[#allocation83_spill] sm:$0xff] }
 0x156   : > { %5570 = vmatpush1.bf16.msra.mxu1 %v5569_v53  ;;  %6148 = vmatprep.subr.bf16.mxu0 %v11531_v50  ;;  %v11539_v53 = vld [vmem:[#allocation77_spill] sm:$0xff]  ;;  %v11540_v50 = vld [vmem:[#allocation78_spill] sm:$0xff] }
 0x157   : > { %5572 = vmatprep.subr.bf16.mxu1 %v5571_v8  ;;  %3629 = vmatmul.mubr.f32.gmra.mrb[6].mxu0 %v8453_v57  ;;  %v5577_v41 = vpack.c.bf16 %v11540_v50, %v11539_v53  ;;  %v11542_v8 = vld [vmem:[#allocation84_spill] sm:$0xff] }
 0x158   : > { %1660 = vmatprep.mubr.f32.mxu1 %v11536_v58  ;;  %3764 = vmatprep.mubr.f32.mxu0 %v11496_v3  ;;  %v5579_v38 = vpack.c.bf16 %v11542_v8, %v11541_v37  ;;  %v5581_v3 = vpack.c.bf16 %v11546_v22, %v11545_v39  ;;  %v806_v39 = vld [vmem:[%s7286_s19 + $0x4d0] sm:$0xff]  ;;  %v11616_v8 = vld [vmem:[#allocation207_spill] sm:$0xff]  ;;  %v11617_v37 = vld [vmem:[#allocation29_spill] sm:$0xff] }
 0x159   : > { %6150 = vmatpush1.bf16.msra.mxu0 %v11537_v21  ;;  %v11547_v21 = vld [vmem:[#allocation91_spill] sm:$0xff] }
 0x15a   : > { %5574 = vmatpush1.bf16.msra.mxu1 %v5573_v0  ;;  %6152 = vmatprep.subr.bf16.mxu0 %v11538_v20  ;;  %v11548_v0 = vld [vmem:[#allocation98_spill] sm:$0xff]  ;;  %v11550_v20 = vld [vmem:[#allocation103_spill] sm:$0xff] }
 0x15b   : > { %5576 = vmatprep.subr.bf16.mxu1 %v5575_v54  ;;  %v11549_v54 = vpack.c.bf16 %v11401_v19, %v11400_v43  ;;  %v802_v43 = vld [vmem:[%s7286_s19 + $0x4b0] sm:$0xff] }
 0x15d   : > { %6154 = vmatpush1.bf16.msra.mxu0 %v11543_v48  ;;  %v11575_v48 = vpack.c.bf16 %v11509_v15, %v11508_v10  ;;  %v11578_v15 = vld [vmem:[#allocation187_spill] sm:$0xff]  ;;  %v633_v10 = vld [vmem:[%s10347_s0 + $0x28] sm:$0xff] }
 0x15e   : > { %5578 = vmatpush1.bf16.msra.mxu1 %v5577_v41  ;;  %6156 = vmatprep.subr.bf16.mxu0 %v11544_v32  ;;  %v11551_v41 = vpack.c.bf16 %v11405_v9, %v11404_v59  ;;  %v11552_v32 = vld [vmem:[#allocation110_spill] sm:$0xff]  ;;  %v11609_v9 = vld [vmem:[#allocation23_spill] sm:$0xff] }
 0x15f   : > { %5580 = vmatprep.subr.bf16.mxu1 %v5579_v38  ;;  %v11553_v38 = vpack.c.bf16 %v11410_v60, %v11409_v40 }
 0x161   : > { %6158 = vmatpush1.bf16.msra.mxu0 %v11547_v21  ;;  %v11554_v21 = vld [vmem:[#allocation115_spill] sm:$0xff] }
 0x162   : > { %5582 = vmatpush1.bf16.msra.mxu1 %v5581_v3  ;;  %6160 = vmatprep.subr.bf16.mxu0 %v11548_v0  ;;  %v11555_v3 = vpack.c.bf16 %v11414_v16, %v11413_v26  ;;  %v11556_v0 = vld [vmem:[#allocation122_spill] sm:$0xff]  ;;  %v11595_v16 = vld [vmem:[#allocation12_spill] sm:$0xff] }
 0x163   : > { %5584 = vmatprep.subr.bf16.mxu1 %v11549_v54  ;;  %v11557_v54 = vpack.c.bf16 %v11419_v44, %v11418_v45  ;;  %v792_v44 = vld [vmem:[%s7286_s19 + $0x460] sm:$0xff]  ;;  %v794_v45 = vld [vmem:[%s7286_s19 + $0x470] sm:$0xff] }
 0x165   : > { %6162 = vmatpush1.bf16.msra.mxu0 %v11550_v20  ;;  %v11558_v20 = vld [vmem:[#allocation127_spill] sm:$0xff] }
 0x166   : > { %5586 = vmatpush1.bf16.msra.mxu1 %v11551_v41  ;;  %6164 = vmatprep.subr.bf16.mxu0 %v11552_v32  ;;  %v11559_v41 = vpack.c.bf16 %v11423_v51, %v11422_v35  ;;  %v11574_v32 = vld [vmem:[#allocation175_spill] sm:$0xff] }
 0x167   : > { %5588 = vmatprep.subr.bf16.mxu1 %v11553_v38  ;;  %v11560_v38 = vld [vmem:[#allocation134_spill] sm:$0xff] }
 0x169   : > { %6166 = vmatpush1.bf16.msra.mxu0 %v11554_v21  ;;  %v11561_v21 = vpack.c.bf16 %v11428_v18, %v11427_v30 }
 0x16a   : > { %5590 = vmatpush1.bf16.msra.mxu1 %v11555_v3  ;;  %6168 = vmatprep.subr.bf16.mxu0 %v11556_v0  ;;  %v11562_v3 = vld [vmem:[#allocation139_spill] sm:$0xff] }
 0x16b   : > { %5592 = vmatprep.subr.bf16.mxu1 %v11557_v54  ;;  %v11563_v54 = vpack.c.bf16 %v11432_v49, %v11431_v42  ;;  %v11566_v0 = vld [vmem:[#allocation151_spill] sm:$0xff]  ;;  %v790_v49 = vld [vmem:[%s7286_s19 + $0x450] sm:$0xff]  ;;  %v11584_v42 = vpack.c.bf16 %v7851_v46, %v7849_v34 }
 0x16c   : > { %v3818_v35 = vand.u32 4294901760, %v790_v49 }
 0x16d   : > { %6170 = vmatpush1.bf16.msra.mxu0 %v11558_v20  ;;  %v11564_v20 = vld [vmem:[#allocation146_spill] sm:$0xff] }
 0x16e   : > { %5594 = vmatpush1.bf16.msra.mxu1 %v11559_v41  ;;  %6172 = vmatprep.subr.bf16.mxu0 %v11560_v38  ;;  %v11565_v41 = vpack.c.bf16 %v11437_v33, %v11436_v17  ;;  %v11567_v38 = vpack.c.bf16 %v11441_v27, %v11499_v14  ;;  %v789_v27 = vld [vmem:[%s7286_s19 + $0x448] sm:$0xff]  ;;  %v791_v14 = vld [vmem:[%s7286_s19 + $0x458] sm:$0xff] }
 0x16f   : > { %5596 = vmatprep.subr.bf16.mxu1 %v11561_v21  ;;  %v11568_v21 = vld [vmem:[#allocation158_spill] sm:$0xff] }
 0x171   : > { %6174 = vmatpush1.bf16.msra.mxu0 %v11562_v3  ;;  %v11569_v3 = vpack.c.bf16 %v11503_v61, %v11502_v1  ;;  %v786_v1 = vld [vmem:[%s7286_s19 + $0x430] sm:$0xff] }
 0x172   : > { %5598 = vmatpush1.bf16.msra.mxu1 %v11563_v54  ;;  %6176 = vmatprep.subr.bf16.mxu0 %v11564_v20  ;;  %v11570_v54 = vld [vmem:[#allocation163_spill] sm:$0xff]  ;;  %v11571_v20 = vpack.c.bf16 %v11450_v12, %v11504_v56  ;;  %v785_v56 = vld [vmem:[%s7286_s19 + $0x428] sm:$0xff]  ;;  %v3810_v30 = vand.u32 4294901760, %v786_v1 }
 0x173   : > { %5600 = vmatprep.subr.bf16.mxu1 %v11565_v41  ;;  %v11572_v41 = vld [vmem:[#allocation170_spill] sm:$0xff] }
 0x174   : > { %v8691_v60 = vsub.f32 %v786_v1, %v3810_v30 }
 0x175   : > { %6178 = vmatpush1.bf16.msra.mxu0 %v11566_v0  ;;  %v783_v0 = vld [vmem:[%s7286_s19 + $0x418] sm:$0xff] }
 0x176   : > { %5602 = vmatpush1.bf16.msra.mxu1 %v11567_v38  ;;  %6180 = vmatprep.subr.bf16.mxu0 %v11568_v21  ;;  %v11573_v38 = vpack.c.bf16 %v11506_v52, %v11505_v25  ;;  %v781_v21 = vld [vmem:[%s7286_s19 + $0x408] sm:$0xff]  ;;  %v3800_v12 = vand.u32 4294901760, %v783_v0  ;;  %v787_v52 = vld [vmem:[%s7286_s19 + $0x438] sm:$0xff]  ;;  %v784_v25 = vld [vmem:[%s7286_s19 + $0x420] sm:$0xff]  ;;  %11597 = vst [vmem:[#allocation237_spill] sm:$0xff] %v8691_v60 }
 0x177   : > { %5604 = vmatprep.subr.bf16.mxu1 %v11569_v3  ;;  %v780_v3 = vld [vmem:[%s7286_s19 + $0x400] sm:$0xff]  ;;  %v3806_v18 = vand.u32 4294901760, %v784_v25 }
 0x178   : > { %v8654_v17 = vsub.f32 %v783_v0, %v3800_v12  ;;  %v8669_v0 = vand.u32 4294901760, %v633_v10 }
 0x179   : > { %6182 = vmatpush1.bf16.msra.mxu0 %v11570_v54  ;;  %v782_v54 = vld [vmem:[%s7286_s19 + $0x410] sm:$0xff]  ;;  %v8689_v26 = vpack.c.bf16 %v3810_v30, %v3806_v18 }
 0x17a   : > { %5606 = vmatpush1.bf16.msra.mxu1 %v11571_v20  ;;  %6184 = vmatprep.subr.bf16.mxu0 %v11572_v41  ;;  %v11576_v20 = vld [vmem:[#allocation182_spill] sm:$0xff]  ;;  %v3796_v41 = vand.u32 4294901760, %v781_v21  ;;  %v3802_v61 = vand.u32 4294901760, %v782_v54  ;;  %11583 = vst [vmem:[#allocation227_spill] sm:$0xff] %v8654_v17  ;;  %11588 = vst [vmem:[#allocation231_spill] sm:$0xff] %v8669_v0 }
 0x17b   : > { %5608 = vmatprep.subr.bf16.mxu1 %v11573_v38  ;;  %v11577_v38 = vpack.c.bf16 %v11474_v13, %v11472_v36  ;;  %v11580_v13 = vld [vmem:[#allocation194_spill] sm:$0xff]  ;;  %11596 = vst [vmem:[#allocation236_spill] sm:$0xff] %v8689_v26 }
 0x17c   : > { %v8650_v36 = vpack.c.bf16 %v3800_v12, %v3796_v41  ;;  %v8652_v33 = vsub.f32 %v781_v21, %v3796_v41  ;;  %v8667_v12 = vsub.f32 %v782_v54, %v3802_v61  ;;  %v11589_v41 = vld [vmem:[#allocation199_spill] sm:$0xff]  ;;  %v8684_v54 = vsub.f32 %v784_v25, %v3806_v18  ;;  %v11602_v18 = vld [vmem:[#allocation10_spill] sm:$0xff] }
 0x17d   : > { %6186 = vmatpush1.bf16.msra.mxu0 %v11574_v32  ;;  %v3798_v32 = vand.u32 4294901760, %v780_v3 }
 0x17e   : > { %5610 = vmatpush1.bf16.msra.mxu1 %v11575_v48  ;;  %6188 = vmatprep.subr.bf16.mxu0 %v11576_v20  ;;  %v3804_v48 = vand.u32 4294901760, %v785_v56  ;;  %v3808_v20 = vand.u32 4294901760, %v787_v52  ;;  %11581 = vst [vmem:[#allocation8_spill] sm:$0xff] %v8650_v36  ;;  %11582 = vst [vmem:[#allocation226_spill] sm:$0xff] %v8652_v33 }
 0x17f   : > { %5612 = vmatprep.subr.bf16.mxu1 %v11577_v38  ;;  %v11579_v38 = vpack.c.bf16 %v7836_v5, %v7831_v24  ;;  %v3812_v5 = vand.u32 4294901760, %v789_v27  ;;  %v793_v24 = vld [vmem:[%s7286_s19 + $0x468] sm:$0xff]  ;;  %v8663_v51 = vpack.c.bf16 %v3802_v61, %v3798_v32  ;;  %v8665_v21 = vsub.f32 %v780_v3, %v3798_v32  ;;  %11587 = vst [vmem:[#allocation230_spill] sm:$0xff] %v8667_v12 }
 0x180   : > { %v8674_v46 = vsub.f32 %v785_v56, %v3804_v48  ;;  %v11592_v32 = vpack.c.bf16 %v7867_v4, %v7865_v47  ;;  %v8682_v61 = vsub.f32 %v787_v52, %v3808_v20  ;;  %11594 = vst [vmem:[#allocation235_spill] sm:$0xff] %v8684_v54  ;;  %v3820_v3 = vand.u32 4294901760, %v793_v24  ;;  %v797_v56 = vld [vmem:[%s7286_s19 + $0x488] sm:$0xff]  ;;  %v796_v4 = vld [vmem:[%s7286_s19 + $0x480] sm:$0xff]  ;;  %v798_v47 = vld [vmem:[%s7286_s19 + $0x490] sm:$0xff] }
 0x181   : > { %6190 = vmatpush1.bf16.msra.mxu0 %v11578_v15  ;;  %v788_v15 = vld [vmem:[%s7286_s19 + $0x440] sm:$0xff]  ;;  %11585 = vst [vmem:[#allocation228_spill] sm:$0xff] %v8663_v51  ;;  %11586 = vst [vmem:[#allocation229_spill] sm:$0xff] %v8665_v21  ;;  %v3822_v52 = vand.u32 4294901760, %v792_v44  ;;  %v3830_v59 = vand.u32 4294901760, %v796_v4  ;;  %v3834_v19 = vand.u32 4294901760, %v798_v47 }
 0x182   : > { %5614 = vmatpush1.bf16.msra.mxu1 %v11579_v38  ;;  %6192 = vmatprep.subr.bf16.mxu0 %v11580_v13  ;;  %v3816_v38 = vand.u32 4294901760, %v791_v14  ;;  %v795_v13 = vld [vmem:[%s7286_s19 + $0x478] sm:$0xff]  ;;  %11591 = vst [vmem:[#allocation233_spill] sm:$0xff] %v8674_v46  ;;  %v3814_v34 = vand.u32 4294901760, %v788_v15  ;;  %11593 = vst [vmem:[#allocation234_spill] sm:$0xff] %v8682_v61 }
 0x183   : > { %5616 = vmatprep.subr.bf16.mxu1 %v11584_v42  ;;  %v8672_v42 = vpack.c.bf16 %v3808_v20, %v3804_v48  ;;  %v799_v48 = vld [vmem:[%s7286_s19 + $0x498] sm:$0xff]  ;;  %v3826_v20 = vand.u32 4294901760, %v794_v45  ;;  %v8756_v50 = vsub.f32 %v798_v47, %v3834_v19 }
 0x184   : > { %v8698_v25 = vsub.f32 %v791_v14, %v3816_v38  ;;  %v8707_v1 = vpack.c.bf16 %v3818_v35, %v3814_v34  ;;  %v3832_v30 = vand.u32 4294901760, %v799_v48  ;;  %v801_v14 = vld [vmem:[%s7286_s19 + $0x4a8] sm:$0xff] }
 0x185   : > { %6194 = vmatpush1.bf16.msra.mxu0 %v11589_v41  ;;  %11590 = vst [vmem:[#allocation232_spill] sm:$0xff] %v8672_v42  ;;  %v3824_v41 = vand.u32 4294901760, %v795_v13  ;;  %11622 = vst [vmem:[#allocation255_spill] sm:$0xff] %v8756_v50  ;;  %v11628_v50 = vld [vmem:[#allocation40_spill] sm:$0xff] }
 0x186   : > { %5618 = vmatpush1.bf16.msra.mxu1 %v11592_v32  ;;  %6196 = vmatprep.subr.bf16.mxu0 %v8650_v36  ;;  %v8693_v32 = vpack.c.bf16 %v3816_v38, %v3812_v5  ;;  %v8695_v36 = vsub.f32 %v789_v27, %v3812_v5  ;;  %11600 = vst [vmem:[#allocation240_spill] sm:$0xff] %v8698_v25  ;;  %11603 = vst [vmem:[#allocation242_spill] sm:$0xff] %v8707_v1  ;;  %v3828_v27 = vand.u32 4294901760, %v797_v56  ;;  %v803_v38 = vld [vmem:[%s7286_s19 + $0x4b8] sm:$0xff] }
 0x187   : > { %5620 = vmatprep.subr.bf16.mxu1 %v11595_v16  ;;  %v8703_v16 = vsub.f32 %v633_v10, %v8669_v0  ;;  %v8709_v5 = vsub.f32 %v788_v15, %v3814_v34  ;;  %v8715_v10 = vsub.f32 %v790_v49, %v3818_v35  ;;  %v8717_v40 = vpack.c.bf16 %v3824_v41, %v3820_v3  ;;  %v811_v0 = vld [vmem:[%s7286_s19 + $0x4f8] sm:$0xff] }
 0x188   : > { %11598 = vst [vmem:[#allocation238_spill] sm:$0xff] %v8693_v32  ;;  %11599 = vst [vmem:[#allocation239_spill] sm:$0xff] %v8695_v36  ;;  %3766 = vmatmul.mubr.f32.vlgmr.msra.gmra.mrb[0].mxu0 %v11498_v55  ;;  %v11605_v55 = vld [vmem:[#allocation16_spill] sm:$0xff]  ;;  %v8722_v15 = vsub.f32 %v795_v13, %v3824_v41  ;;  %v8724_v34 = vsub.f32 %v792_v44, %v3822_v52  ;;  %v8729_v35 = vpack.c.bf16 %v3826_v20, %v3822_v52 }
 0x189   : > { %11601 = vst [vmem:[#allocation241_spill] sm:$0xff] %v8703_v16  ;;  %1663 = vmatmul.mubr.f32.vlgmr.msra.gmra.mrb[0].mxu1 %v11602_v18  ;;  %6198 = vmatpush1.bf16.msra.mxu0 %v8663_v51  ;;  %11604 = vst [vmem:[#allocation243_spill] sm:$0xff] %v8709_v5  ;;  %v8719_v51 = vsub.f32 %v793_v24, %v3820_v3  ;;  %v3836_v49 = vand.u32 4294901760, %v801_v14  ;;  %v3840_v22 = vand.u32 4294901760, %v803_v38  ;;  %v805_v24 = vld [vmem:[%s7286_s19 + $0x4c8] sm:$0xff]  ;;  %v807_v3 = vld [vmem:[%s7286_s19 + $0x4d8] sm:$0xff] }
 0x18a   : > { %5622 = vmatpush1.bf16.msra.mxu1 %v11605_v55  ;;  %6200 = vmatprep.subr.bf16.mxu0 %v8672_v42  ;;  %11606 = vst [vmem:[#allocation244_spill] sm:$0xff] %v8715_v10  ;;  %11607 = vst [vmem:[#allocation245_spill] sm:$0xff] %v8717_v40  ;;  %v800_v55 = vld [vmem:[%s7286_s19 + $0x4a0] sm:$0xff]  ;;  %v8736_v13 = vsub.f32 %v794_v45, %v3826_v20  ;;  %v8738_v41 = vpack.c.bf16 %v3832_v30, %v3828_v27  ;;  %v3842_v20 = vand.u32 4294901760, %v802_v43 }
 0x18b   : > { %11608 = vst [vmem:[#allocation246_spill] sm:$0xff] %v8719_v51  ;;  %5624 = vmatprep.subr.bf16.mxu1 %v11609_v9  ;;  %11610 = vst [vmem:[#allocation247_spill] sm:$0xff] %v8722_v15  ;;  %v11611_v42 = vld [vmem:[#allocation204_spill] sm:$0xff]  ;;  %3772 = vmatprep.mubr.f32.mxu0 %v11513_v23  ;;  %v8740_v9 = vsub.f32 %v797_v56, %v3828_v27  ;;  %v8747_v23 = vsub.f32 %v799_v48, %v3832_v30  ;;  %v3838_v45 = vand.u32 4294901760, %v800_v55  ;;  %v11620_v56 = vld [vmem:[#allocation34_spill] sm:$0xff] }
 0x18c   : > { %1670 = vmatprep.mubr.f32.mxu1 %v11611_v42  ;;  %11612 = vst [vmem:[#allocation248_spill] sm:$0xff] %v8729_v35  ;;  %11613 = vst [vmem:[#allocation249_spill] sm:$0xff] %v8736_v13  ;;  %v804_v52 = vld [vmem:[%s7286_s19 + $0x4c0] sm:$0xff]  ;;  %v8749_v44 = vsub.f32 %v796_v4, %v3830_v59  ;;  %v8754_v27 = vpack.c.bf16 %v3834_v19, %v3830_v59  ;;  %v3844_v53 = vand.u32 4294901760, %v805_v24  ;;  %3774 = vmatmul.mubr.f32.gmra.mrb[2].mxu0 %v11521_v31  ;;  %v11624_v42 = vld [vmem:[#allocation211_spill] sm:$0xff] }
 0x18d   : > { %6202 = vmatpush1.bf16.msra.mxu0 %v8689_v26  ;;  %11614 = vst [vmem:[#allocation250_spill] sm:$0xff] %v8738_v41  ;;  %11615 = vst [vmem:[#allocation251_spill] sm:$0xff] %v8740_v9  ;;  %1673 = vmatmul.mubr.f32.gmra.mrb[2].mxu1 %v11616_v8  ;;  %v809_v26 = vld [vmem:[%s7286_s19 + $0x4e8] sm:$0xff]  ;;  %v3846_v48 = vand.u32 4294901760, %v804_v52  ;;  %v3850_v30 = vand.u32 4294901760, %v806_v39  ;;  %v808_v4 = vld [vmem:[%s7286_s19 + $0x4e0] sm:$0xff]  ;;  %v8769_v47 = vsub.f32 %v801_v14, %v3836_v49 }
 0x18e   : > { %5626 = vmatpush1.bf16.msra.mxu1 %v11617_v37  ;;  %6204 = vmatprep.subr.bf16.mxu0 %v8693_v32  ;;  %11618 = vst [vmem:[#allocation252_spill] sm:$0xff] %v8747_v23  ;;  %11619 = vst [vmem:[#allocation253_spill] sm:$0xff] %v8749_v44  ;;  %v3848_v37 = vand.u32 4294901760, %v807_v3  ;;  %v8759_v32 = vpack.c.bf16 %v3840_v22, %v3836_v49  ;;  %v810_v8 = vld [vmem:[%s7286_s19 + $0x4f0] sm:$0xff]  ;;  %v11625_v59 = vand.u32 4294901760, %v8703_v16  ;;  %v3856_v18 = vand.u32 4294901760, %v811_v0 }
 0x18f   : > { %5628 = vmatprep.subr.bf16.mxu1 %v11620_v56  ;;  %11621 = vst [vmem:[#allocation254_spill] sm:$0xff] %v8754_v27  ;;  %1680 = vmatprep.mubr.f32.mxu1 %v11624_v42  ;;  %11626 = vst [vmem:[#allocation257_spill] sm:$0xff] %v8769_v47  ;;  %v8771_v31 = vsub.f32 %v803_v38, %v3840_v22  ;;  %v3852_v56 = vand.u32 4294901760, %v809_v26  ;;  %v8780_v14 = vsub.f32 %v802_v43, %v3842_v20  ;;  %v813_v22 = vld [vmem:[%s7286_s19 + $0x508] sm:$0xff]  ;;  %v815_v38 = vld [vmem:[%s7286_s19 + $0x518] sm:$0xff] }
 0x190   : > { %11623 = vst [vmem:[#allocation256_spill] sm:$0xff] %v8759_v32  ;;  %3780 = vmatprep.mubr.f32.mxu0 %v11522_v62  ;;  %v3927_v19 = vsub.f32 %v8703_v16, %v11625_v59  ;;  %v8776_v62 = vpack.c.bf16 %v3842_v20, %v3838_v45  ;;  %v8778_v59 = vsub.f32 %v800_v55, %v3838_v45  ;;  %v11632_v49 = vld [vmem:[#allocation46_spill] sm:$0xff]  ;;  %v812_v42 = vld [vmem:[%s7286_s19 + $0x500] sm:$0xff]  ;;  %v817_v20 = vld [vmem:[%s7286_s19 + $0x528] sm:$0xff] }
 0x191   : > { %6206 = vmatpush1.bf16.msra.mxu0 %v8707_v1  ;;  %11627 = vst [vmem:[#allocation258_spill] sm:$0xff] %v8771_v31  ;;  %1683 = vmatmul.mubr.f32.gmra.mrb[4].mxu1 %v8374_v11  ;;  %11631 = vst [vmem:[#allocation261_spill] sm:$0xff] %v8780_v14  ;;  %v8785_v1 = vpack.c.bf16 %v3848_v37, %v3844_v53  ;;  %v8787_v16 = vsub.f32 %v805_v24, %v3844_v53  ;;  %v3854_v11 = vand.u32 4294901760, %v808_v4  ;;  %v11672_v31 = vld [vmem:[#allocation88_spill] sm:$0xff] }
 0x192   : > { %5630 = vmatpush1.bf16.msra.mxu1 %v11628_v50  ;;  %6208 = vmatprep.subr.bf16.mxu0 %v8717_v40  ;;  %11629 = vst [vmem:[#allocation259_spill] sm:$0xff] %v8776_v62  ;;  %11630 = vst [vmem:[#allocation260_spill] sm:$0xff] %v8778_v59  ;;  %v3858_v50 = vand.u32 4294901760, %v810_v8  ;;  %v814_v40 = vld [vmem:[%s7286_s19 + $0x510] sm:$0xff]  ;;  %v8792_v55 = vsub.f32 %v807_v3, %v3848_v37  ;;  %v8794_v43 = vpack.c.bf16 %v3850_v30, %v3846_v48  ;;  %v839_v59 = vld [vmem:[%s7286_s19 + $0x5d8] sm:$0xff] }
 0x193   : > { %5632 = vmatprep.subr.bf16.mxu1 %v11632_v49  ;;  %11633 = vst [vmem:[#allocation262_spill] sm:$0xff] %v8785_v1  ;;  %11634 = vst [vmem:[#allocation263_spill] sm:$0xff] %v8787_v16  ;;  %3782 = vmatmul.mubr.f32.gmra.mrb[4].mxu0 %v8382_v6  ;;  %v8796_v45 = vsub.f32 %v804_v52, %v3846_v48  ;;  %v819_v49 = vld [vmem:[%s7286_s19 + $0x538] sm:$0xff]  ;;  %v3928_v53 = vand.u32 4294901760, %v3927_v19  ;;  %v8803_v24 = vsub.f32 %v806_v39, %v3850_v30  ;;  %v818_v52 = vld [vmem:[%s7286_s19 + $0x530] sm:$0xff] }
 0x194   : > { %11635 = vst [vmem:[#allocation264_spill] sm:$0xff] %v8792_v55  ;;  %11636 = vst [vmem:[#allocation265_spill] sm:$0xff] %v8794_v43  ;;  %1690 = vmatprep.mubr.f32.mxu1 %v8416_v63  ;;  %3788 = vmatprep.mubr.f32.mxu0 %v8413_v7  ;;  %v8805_v6 = vpack.c.bf16 %v3856_v18, %v3852_v56  ;;  %v3860_v37 = vand.u32 4294901760, %v813_v22  ;;  %v3864_v3 = vand.u32 4294901760, %v815_v38  ;;  %v816_v55 = vld [vmem:[%s7286_s19 + $0x520] sm:$0xff]  ;;  %v11640_v48 = vld [vmem:[#allocation53_spill] sm:$0xff] }
 0x195   : > { %11637 = vst [vmem:[#allocation266_spill] sm:$0xff] %v8796_v45  ;;  %6210 = vmatpush1.bf16.msra.mxu0 %v8729_v35  ;;  %11638 = vst [vmem:[#allocation267_spill] sm:$0xff] %v8803_v24  ;;  %1693 = vmatmul.mubr.f32.gmra.mrb[6].mxu1 %v8444_v2  ;;  %v8812_v19 = vsub.f32 %v809_v26, %v3852_v56  ;;  %v8814_v7 = vsub.f32 %v811_v0, %v3856_v18  ;;  %v3862_v39 = vand.u32 4294901760, %v812_v42  ;;  %v821_v35 = vld [vmem:[%s7286_s19 + $0x548] sm:$0xff]  ;;  %v823_v63 = vld [vmem:[%s7286_s19 + $0x558] sm:$0xff] }
 0x196   : > { %11639 = vst [vmem:[#allocation268_spill] sm:$0xff] %v8805_v6  ;;  %5634 = vmatpush1.bf16.msra.mxu1 %v11640_v48  ;;  %6212 = vmatprep.subr.bf16.mxu0 %v8738_v41  ;;  %v3866_v30 = vand.u32 4294901760, %v814_v40  ;;  %v11643_v24 = vld [vmem:[#allocation58_spill] sm:$0xff]  ;;  %v8819_v45 = vpack.c.bf16 %v3858_v50, %v3854_v11  ;;  %v8821_v16 = vsub.f32 %v808_v4, %v3854_v11  ;;  %v3868_v14 = vand.u32 4294901760, %v817_v20  ;;  %v820_v48 = vld [vmem:[%s7286_s19 + $0x540] sm:$0xff] }
 0x197   : > { %11641 = vst [vmem:[#allocation269_spill] sm:$0xff] %v8812_v19  ;;  %11642 = vst [vmem:[#allocation270_spill] sm:$0xff] %v8814_v7  ;;  %5636 = vmatprep.subr.bf16.mxu1 %v11643_v24  ;;  %v3872_v2 = vand.u32 4294901760, %v819_v49  ;;  %v822_v41 = vld [vmem:[%s7286_s19 + $0x550] sm:$0xff]  ;;  %3790 = vmatmul.mubr.f32.gmra.mrb[6].mxu0 %v8453_v57  ;;  %v8826_v26 = vsub.f32 %v810_v8, %v3858_v50  ;;  %v8828_v0 = vsub.f32 %v813_v22, %v3860_v37  ;;  %v825_v50 = vld [vmem:[%s7286_s19 + $0x568] sm:$0xff] }
 0x198   : > { %11644 = vst [vmem:[#allocation271_spill] sm:$0xff] %v8819_v45  ;;  %11645 = vst [vmem:[#allocation272_spill] sm:$0xff] %v8821_v16  ;;  %v3870_v18 = vand.u32 4294901760, %v816_v55  ;;  %v3874_v56 = vand.u32 4294901760, %v818_v52  ;;  %v11648_v24 = vand.u32 4294901760, %v11536_v58  ;;  %3929 = vmatprep.mubr.f32.mxu0 %v3928_v53  ;;  %v8833_v11 = vpack.c.bf16 %v3864_v3, %v3860_v37  ;;  %v827_v8 = vld [vmem:[%s7286_s19 + $0x578] sm:$0xff] }
 0x199   : > { %11646 = vst [vmem:[#allocation273_spill] sm:$0xff] %v8826_v26  ;;  %11647 = vst [vmem:[#allocation274_spill] sm:$0xff] %v8828_v0  ;;  %6214 = vmatpush1.bf16.msra.mxu0 %v8754_v27  ;;  %v8835_v4 = vsub.f32 %v815_v38, %v3864_v3  ;;  %v3876_v16 = vand.u32 4294901760, %v821_v35  ;;  %v3880_v57 = vand.u32 4294901760, %v823_v63  ;;  %v11651_v22 = vld [vmem:[#allocation64_spill] sm:$0xff]  ;;  %v8841_v58 = vpack.c.bf16 %v3866_v30, %v3862_v39  ;;  %v11654_v37 = vld [vmem:[#allocation70_spill] sm:$0xff] }
 0x19a   : > { %1830 = vmatprep.mubr.f32.mxu1 %v11648_v24  ;;  %11649 = vst [vmem:[#allocation275_spill] sm:$0xff] %v8833_v11  ;;  %5638 = vmatpush1.bf16.msra.mxu1 %v11651_v22  ;;  %v8843_v53 = vsub.f32 %v812_v42, %v3862_v39  ;;  %v3878_v24 = vand.u32 4294901760, %v820_v48  ;;  %v3882_v38 = vand.u32 4294901760, %v822_v41  ;;  %v8846_v3 = vsub.f32 %v814_v40, %v3866_v30  ;;  %v826_v0 = vld [vmem:[%s7286_s19 + $0x570] sm:$0xff]  ;;  %v829_v26 = vld [vmem:[%s7286_s19 + $0x588] sm:$0xff]  ;;  %v828_v40 = vld [vmem:[%s7286_s19 + $0x580] sm:$0xff] }
 0x19b   : > { %11650 = vst [vmem:[#allocation276_spill] sm:$0xff] %v8835_v4  ;;  %6216 = vmatprep.subr.bf16.mxu0 %v8759_v32  ;;  %11652 = vst [vmem:[#allocation277_spill] sm:$0xff] %v8841_v58  ;;  %5640 = vmatprep.subr.bf16.mxu1 %v11654_v37  ;;  %v8848_v27 = vpack.c.bf16 %v3872_v2, %v3868_v14  ;;  %v8850_v4 = vsub.f32 %v817_v20, %v3868_v14  ;;  %v824_v32 = vld [vmem:[%s7286_s19 + $0x560] sm:$0xff]  ;;  %v3888_v7 = vand.u32 4294901760, %v827_v8  ;;  %v831_v37 = vld [vmem:[%s7286_s19 + $0x598] sm:$0xff] }
 0x19c   : > { %11653 = vst [vmem:[#allocation278_spill] sm:$0xff] %v8843_v53  ;;  %11655 = vst [vmem:[#allocation279_spill] sm:$0xff] %v8846_v3  ;;  %v8852_v22 = vsub.f32 %v819_v49, %v3872_v2  ;;  %v8857_v42 = vpack.c.bf16 %v3874_v56, %v3870_v18  ;;  %v8859_v39 = vsub.f32 %v816_v55, %v3870_v18  ;;  %v3884_v53 = vand.u32 4294901760, %v825_v50  ;;  %v830_v30 = vld [vmem:[%s7286_s19 + $0x590] sm:$0xff]  ;;  %v833_v55 = vld [vmem:[%s7286_s19 + $0x5a8] sm:$0xff] }
 0x19d   : > { %11656 = vst [vmem:[#allocation280_spill] sm:$0xff] %v8848_v27  ;;  %11657 = vst [vmem:[#allocation281_spill] sm:$0xff] %v8850_v4  ;;  %6218 = vmatpush1.bf16.msra.mxu0 %v8776_v62  ;;  %v8865_v2 = vsub.f32 %v818_v52, %v3874_v56  ;;  %v8867_v14 = vpack.c.bf16 %v3880_v57, %v3876_v16  ;;  %v8869_v49 = vsub.f32 %v821_v35, %v3876_v16  ;;  %v11665_v18 = vld [vmem:[#allocation76_spill] sm:$0xff]  ;;  %v835_v62 = vld [vmem:[%s7286_s19 + $0x5b8] sm:$0xff] }
 0x19e   : > { %11658 = vst [vmem:[#allocation282_spill] sm:$0xff] %v8852_v22  ;;  %11659 = vst [vmem:[#allocation283_spill] sm:$0xff] %v8857_v42  ;;  %v8871_v20 = vsub.f32 %v823_v63, %v3880_v57  ;;  %5642 = vmatpush1.bf16.msra.mxu1 %v11665_v18  ;;  %6220 = vmatprep.subr.bf16.mxu0 %v8785_v1  ;;  %v8878_v22 = vsub.f32 %v820_v48, %v3878_v24  ;;  %v3886_v4 = vand.u32 4294901760, %v824_v32  ;;  %v832_v52 = vld [vmem:[%s7286_s19 + $0x5a0] sm:$0xff]  ;;  %v834_v56 = vld [vmem:[%s7286_s19 + $0x5b0] sm:$0xff] }
 0x19f   : > { %11660 = vst [vmem:[#allocation284_spill] sm:$0xff] %v8859_v39  ;;  %11661 = vst [vmem:[#allocation285_spill] sm:$0xff] %v8865_v2  ;;  %v8876_v39 = vpack.c.bf16 %v3882_v38, %v3878_v24  ;;  %v3890_v3 = vand.u32 4294901760, %v826_v0  ;;  %v11668_v2 = vld [vmem:[#allocation82_spill] sm:$0xff]  ;;  %v3892_v16 = vand.u32 4294901760, %v829_v26  ;;  %v3896_v63 = vand.u32 4294901760, %v831_v37 }
 0x1a0   : > { %11662 = vst [vmem:[#allocation286_spill] sm:$0xff] %v8867_v14  ;;  %11663 = vst [vmem:[#allocation287_spill] sm:$0xff] %v8869_v49  ;;  %5644 = vmatprep.subr.bf16.mxu1 %v11668_v2  ;;  %v3894_v57 = vand.u32 4294901760, %v828_v40  ;;  %v3898_v35 = vand.u32 4294901760, %v830_v30  ;;  %v8884_v18 = vsub.f32 %v822_v41, %v3882_v38  ;;  %v8886_v1 = vpack.c.bf16 %v3888_v7, %v3884_v53  ;;  %v837_v19 = vld [vmem:[%s7286_s19 + $0x5c8] sm:$0xff] }
 0x1a1   : > { %11664 = vst [vmem:[#allocation288_spill] sm:$0xff] %v8871_v20  ;;  %11666 = vst [vmem:[#allocation289_spill] sm:$0xff] %v8876_v39  ;;  %v8888_v20 = vsub.f32 %v825_v50, %v3884_v53  ;;  %v8890_v48 = vsub.f32 %v827_v8, %v3888_v7  ;;  %6222 = vmatpush1.bf16.msra.mxu0 %v8794_v43  ;;  %v3900_v24 = vand.u32 4294901760, %v833_v55  ;;  %v3902_v49 = vand.u32 4294901760, %v832_v52  ;;  %v11676_v8 = vld [vmem:[#allocation94_spill] sm:$0xff] }
 0x1a2   : > { %11667 = vst [vmem:[#allocation290_spill] sm:$0xff] %v8878_v22  ;;  %11669 = vst [vmem:[#allocation291_spill] sm:$0xff] %v8886_v1  ;;  %v3904_v22 = vand.u32 4294901760, %v835_v62  ;;  %v3906_v2 = vand.u32 4294901760, %v834_v56  ;;  %5646 = vmatpush1.bf16.msra.mxu1 %v11672_v31  ;;  %6224 = vmatprep.subr.bf16.mxu0 %v8805_v6  ;;  %v8897_v41 = vpack.c.bf16 %v3890_v3, %v3886_v4  ;;  %v836_v31 = vld [vmem:[%s7286_s19 + $0x5c0] sm:$0xff]  ;;  %v838_v6 = vld [vmem:[%s7286_s19 + $0x5d0] sm:$0xff] }
 0x1a3   : > { %11670 = vst [vmem:[#allocation292_spill] sm:$0xff] %v8888_v20  ;;  %11671 = vst [vmem:[#allocation293_spill] sm:$0xff] %v8890_v48  ;;  %v8899_v7 = vsub.f32 %v824_v32, %v3886_v4  ;;  %v8901_v50 = vsub.f32 %v826_v0, %v3890_v3  ;;  %5648 = vmatprep.subr.bf16.mxu1 %v11676_v8  ;;  %v8904_v53 = vpack.c.bf16 %v3896_v63, %v3892_v16  ;;  %v632_v20 = vld [vmem:[%s10347_s0 + $0x20] sm:$0xff]  ;;  %v841_v8 = vld [vmem:[%s7286_s19 + $0x5e8] sm:$0xff] }
 0x1a4   : > { %11673 = vst [vmem:[#allocation294_spill] sm:$0xff] %v8897_v41  ;;  %v8906_v38 = vsub.f32 %v829_v26, %v3892_v16  ;;  %v8908_v43 = vsub.f32 %v831_v37, %v3896_v63  ;;  %v8910_v48 = vpack.c.bf16 %v3898_v35, %v3894_v57  ;;  %v8917_v32 = vsub.f32 %v828_v40, %v3894_v57  ;;  %v843_v26 = vld [vmem:[%s7286_s19 + $0x5f8] sm:$0xff]  ;;  %v11687_v40 = vld [vmem:[#allocation100_spill] sm:$0xff] }
 0x1a5   : > { %11674 = vst [vmem:[#allocation295_spill] sm:$0xff] %v8899_v7  ;;  %11675 = vst [vmem:[#allocation296_spill] sm:$0xff] %v8901_v50  ;;  %v8919_v0 = vsub.f32 %v830_v30, %v3898_v35  ;;  %v3908_v4 = vand.u32 4294901760, %v837_v19  ;;  %v3912_v3 = vand.u32 4294901760, %v839_v59  ;;  %6226 = vmatpush1.bf16.msra.mxu0 %v8819_v45  ;;  %v8924_v37 = vpack.c.bf16 %v3904_v22, %v3900_v24  ;;  %v11690_v45 = vld [vmem:[#allocation106_spill] sm:$0xff] }
 0x1a6   : > { %11677 = vst [vmem:[#allocation297_spill] sm:$0xff] %v8904_v53  ;;  %11678 = vst [vmem:[#allocation298_spill] sm:$0xff] %v8906_v38  ;;  %v8926_v16 = vsub.f32 %v833_v55, %v3900_v24  ;;  %v8928_v63 = vsub.f32 %v835_v62, %v3904_v22  ;;  %5650 = vmatpush1.bf16.msra.mxu1 %v11687_v40  ;;  %6228 = vmatprep.subr.bf16.mxu0 %v8833_v11  ;;  %v3910_v57 = vand.u32 4294901760, %v836_v31  ;;  %v842_v24 = vld [vmem:[%s7286_s19 + $0x5f0] sm:$0xff]  ;;  %v11696_v62 = vld [vmem:[#allocation112_spill] sm:$0xff] }
 0x1a7   : > { %11679 = vst [vmem:[#allocation299_spill] sm:$0xff] %v8908_v43  ;;  %11680 = vst [vmem:[#allocation300_spill] sm:$0xff] %v8910_v48  ;;  %v8930_v43 = vpack.c.bf16 %v3906_v2, %v3902_v49  ;;  %v8934_v30 = vsub.f32 %v832_v52, %v3902_v49  ;;  %v3914_v35 = vand.u32 4294901760, %v838_v6  ;;  %5652 = vmatprep.subr.bf16.mxu1 %v11690_v45  ;;  %v3916_v38 = vand.u32 4294901760, %v841_v8 }
 0x1a8   : > { %11681 = vst [vmem:[#allocation301_spill] sm:$0xff] %v8917_v32  ;;  %11682 = vst [vmem:[#allocation302_spill] sm:$0xff] %v8919_v0  ;;  %v840_v0 = vld [vmem:[%s7286_s19 + $0x5e0] sm:$0xff]  ;;  %v8937_v32 = vand.u32 4294901760, %v632_v20  ;;  %v3920_v55 = vand.u32 4294901760, %v843_v26  ;;  %v8945_v40 = vpack.c.bf16 %v3912_v3, %v3908_v4  ;;  %v8947_v49 = vsub.f32 %v837_v19, %v3908_v4  ;;  %v11700_v4 = vld [vmem:[#allocation118_spill] sm:$0xff] }
 0x1a9   : > { %11683 = vst [vmem:[#allocation303_spill] sm:$0xff] %v8924_v37  ;;  %11684 = vst [vmem:[#allocation304_spill] sm:$0xff] %v8926_v16  ;;  %v8949_v52 = vsub.f32 %v839_v59, %v3912_v3  ;;  %6230 = vmatpush1.bf16.msra.mxu0 %v8841_v58  ;;  %v8952_v11 = vsub.f32 %v836_v31, %v3910_v57  ;;  %v3918_v45 = vand.u32 4294901760, %v840_v0  ;;  %v3922_v19 = vand.u32 4294901760, %v842_v24  ;;  %v11714_v58 = vld [vmem:[#allocation130_spill] sm:$0xff] }
 0x1aa   : > { %11685 = vst [vmem:[#allocation305_spill] sm:$0xff] %v8928_v63  ;;  %11686 = vst [vmem:[#allocation306_spill] sm:$0xff] %v8930_v43  ;;  %v8943_v63 = vsub.f32 %v834_v56, %v3906_v2  ;;  %5654 = vmatpush1.bf16.msra.mxu1 %v11696_v62  ;;  %6232 = vmatprep.subr.bf16.mxu0 %v8848_v27  ;;  %v8958_v2 = vpack.c.bf16 %v3914_v35, %v3910_v57  ;;  %v11702_v3 = vand.u32 4294901760, %v7311_v28  ;;  %v11715_v62 = vld [vmem:[#allocation17_spill] sm:$0xff] }
 0x1ab   : > { %11688 = vst [vmem:[#allocation307_spill] sm:$0xff] %v8934_v30  ;;  %11689 = vst [vmem:[#allocation308_spill] sm:$0xff] %v8937_v32  ;;  %v8960_v56 = vsub.f32 %v838_v6, %v3914_v35  ;;  %v8963_v59 = vsub.f32 %v632_v20, %v8937_v32  ;;  %5656 = vmatprep.subr.bf16.mxu1 %v11700_v4  ;;  %v8966_v31 = vpack.c.bf16 %v3920_v55, %v3916_v38  ;;  %v11717_v32 = vld [vmem:[#allocation18_spill] sm:$0xff] }
 0x1ac   : > { %11691 = vst [vmem:[#allocation309_spill] sm:$0xff] %v8943_v63  ;;  %11692 = vst [vmem:[#allocation310_spill] sm:$0xff] %v8945_v40  ;;  %v11703_v16 = vand.u32 4294901760, %v7313_v29  ;;  %v11704_v22 = vand.u32 4294901760, %v8652_v33  ;;  %v11705_v6 = vand.u32 4294901760, %v8654_v17  ;;  %v8980_v20 = vsub.f32 %v841_v8, %v3916_v38  ;;  %v639_v38 = vld [vmem:[%s10347_s0 + $0x58] sm:$0xff] }
 0x1ad   : > { %11693 = vst [vmem:[#allocation311_spill] sm:$0xff] %v8947_v49  ;;  %11694 = vst [vmem:[#allocation312_spill] sm:$0xff] %v8949_v52  ;;  %v8982_v27 = vsub.f32 %v843_v26, %v3920_v55  ;;  %6234 = vmatpush1.bf16.msra.mxu0 %v8857_v42  ;;  %v11708_v29 = vand.u32 4294901760, %v8665_v21  ;;  %v11710_v26 = vld [vmem:[#allocation124_spill] sm:$0xff]  ;;  %v9000_v55 = vpack.c.bf16 %v3922_v19, %v3918_v45 }
 0x1ae   : > { %11695 = vst [vmem:[#allocation313_spill] sm:$0xff] %v8952_v11  ;;  %11697 = vst [vmem:[#allocation314_spill] sm:$0xff] %v8958_v2  ;;  %v8972_v30 = vpack.c.bf16 %v11703_v16, %v11702_v3  ;;  %v3992_v57 = vsub.f32 %v8652_v33, %v11704_v22  ;;  %v4004_v35 = vsub.f32 %v8654_v17, %v11705_v6  ;;  %v11709_v22 = vand.u32 4294901760, %v8667_v12  ;;  %v11724_v42 = vld [vmem:[#allocation136_spill] sm:$0xff]  ;;  %v11750_v17 = vld [vmem:[#allocation42_spill] sm:$0xff] }
 0x1af   : > { %11698 = vst [vmem:[#allocation315_spill] sm:$0xff] %v8960_v56  ;;  %11699 = vst [vmem:[#allocation316_spill] sm:$0xff] %v8963_v59  ;;  %v3998_v16 = vsub.f32 %v8665_v21, %v11708_v29  ;;  %5658 = vmatpush1.bf16.msra.mxu1 %v11710_v26  ;;  %6236 = vmatprep.subr.bf16.mxu0 %v8867_v14  ;;  %v9002_v28 = vsub.f32 %v840_v0, %v3918_v45  ;;  %v11716_v26 = vand.u32 4294901760, %v11715_v62 }
 0x1b0   : > { %11701 = vst [vmem:[#allocation317_spill] sm:$0xff] %v8966_v31  ;;  %11706 = vst [vmem:[#allocation318_spill] sm:$0xff] %v8980_v20  ;;  %v4010_v3 = vsub.f32 %v8667_v12, %v11709_v22  ;;  %v9004_v29 = vsub.f32 %v842_v24, %v3922_v19  ;;  %v11006_v22 = vand.u32 4294901760, %v8963_v59  ;;  %5660 = vmatprep.subr.bf16.mxu1 %v11714_v58  ;;  %v3993_v6 = vand.u32 4294901760, %v3992_v57 }
 0x1b1   : > { %11707 = vst [vmem:[#allocation319_spill] sm:$0xff] %v8982_v27  ;;  %11711 = vst [vmem:[#allocation320_spill] sm:$0xff] %v9000_v55  ;;  %v4005_v8 = vand.u32 4294901760, %v4004_v35  ;;  %v11718_v14 = vand.u32 4294901760, %v11717_v32  ;;  %v11719_v45 = vand.u32 4294901760, %v8674_v46  ;;  %v11720_v24 = vand.u32 4294901760, %v8682_v61  ;;  %6238 = vmatpush1.bf16.msra.mxu0 %v8876_v39 }
 0x1b2   : > { %11712 = vst [vmem:[#allocation321_spill] sm:$0xff] %v9002_v28  ;;  %11713 = vst [vmem:[#allocation322_spill] sm:$0xff] %v9004_v29  ;;  %v9022_v57 = vand.u32 4294901760, %v639_v38  ;;  %v3999_v35 = vand.u32 4294901760, %v3998_v16  ;;  %v4011_v4 = vand.u32 4294901760, %v4010_v3  ;;  %v11722_v62 = vand.u32 4294901760, %v8684_v54  ;;  %6240 = vmatprep.subr.bf16.mxu0 %v8886_v1 }
 0x1b3   : > { %v9014_v12 = vpack.c.bf16 %v11718_v14, %v11716_v26  ;;  %v4016_v0 = vsub.f32 %v8674_v46, %v11719_v45  ;;  %v4028_v19 = vsub.f32 %v8682_v61, %v11720_v24  ;;  %v11723_v14 = vand.u32 4294901760, %v8691_v60  ;;  %5662 = vmatpush1.bf16.msra.mxu1 %v11724_v42  ;;  %v11725_v24 = vld [vmem:[#allocation22_spill] sm:$0xff]  ;;  %v11727_v3 = vld [vmem:[#allocation24_spill] sm:$0xff]  ;;  %v11748_v46 = vld [vmem:[#allocation41_spill] sm:$0xff] }
 0x1b4   : > { %11721 = vst [vmem:[#allocation17_spill] sm:$0xff] %v9022_v57  ;;  %v4022_v32 = vsub.f32 %v8684_v54, %v11722_v62  ;;  %v9036_v45 = vsub.f32 %v8963_v59, %v11006_v22  ;;  %v11726_v16 = vand.u32 4294901760, %v11725_v24  ;;  %v11728_v39 = vand.u32 4294901760, %v11727_v3  ;;  %v11729_v1 = vld [vmem:[#allocation142_spill] sm:$0xff]  ;;  %v11730_v22 = vld [vmem:[#allocation28_spill] sm:$0xff]  ;;  %v645_v62 = vld [vmem:[%s10347_s0 + $0x88] sm:$0xff] }
 0x1b5   : > { %v4034_v26 = vsub.f32 %v8691_v60, %v11723_v14  ;;  %v638_v14 = vld [vmem:[%s10347_s0 + $0x50] sm:$0xff]  ;;  %5664 = vmatprep.subr.bf16.mxu1 %v11729_v1  ;;  %v9050_v42 = vpack.c.bf16 %v4005_v8, %v3993_v6  ;;  %v11731_v59 = vand.u32 4294901760, %v11730_v22  ;;  %v11735_v3 = vand.u32 4294901760, %v8698_v25  ;;  %6242 = vmatpush1.bf16.msra.mxu0 %v8897_v41 }
 0x1b6   : > { %v9042_v58 = vpack.c.bf16 %v11728_v39, %v11726_v16  ;;  %v11732_v60 = vld [vmem:[#allocation30_spill] sm:$0xff]  ;;  %v11734_v39 = vand.u32 4294901760, %v8695_v36  ;;  %v4017_v6 = vand.u32 4294901760, %v4016_v0  ;;  %v4029_v8 = vand.u32 4294901760, %v4028_v19  ;;  %6244 = vmatprep.subr.bf16.mxu0 %v8904_v53 }
 0x1b7   : > { %v11733_v24 = vand.u32 4294901760, %v11732_v60  ;;  %v4052_v54 = vsub.f32 %v8698_v25, %v11735_v3  ;;  %v9069_v60 = vsub.f32 %v639_v38, %v9022_v57  ;;  %v9074_v1 = vand.u32 4294901760, %v638_v14  ;;  %v11738_v3 = vld [vmem:[#allocation148_spill] sm:$0xff] }
 0x1b8   : > { %v4040_v16 = vsub.f32 %v8695_v36, %v11734_v39  ;;  %v4035_v39 = vand.u32 4294901760, %v4034_v26  ;;  %5666 = vmatpush1.bf16.msra.mxu1 %v11738_v3  ;;  %v11739_v19 = vand.u32 4294901760, %v8709_v5  ;;  %v11740_v38 = vand.u32 4294901760, %v8715_v10  ;;  %v11743_v26 = vld [vmem:[#allocation35_spill] sm:$0xff]  ;;  %v11745_v3 = vld [vmem:[#allocation36_spill] sm:$0xff] }
 0x1b9   : > { %v9056_v61 = vpack.c.bf16 %v11733_v24, %v11731_v59  ;;  %11736 = vst [vmem:[#allocation18_spill] sm:$0xff] %v9069_v60  ;;  %v9072_v59 = vpack.c.bf16 %v4011_v4, %v3999_v35  ;;  %v4023_v24 = vand.u32 4294901760, %v4022_v32  ;;  %11737 = vst [vmem:[#allocation22_spill] sm:$0xff] %v9074_v1  ;;  %v9089_v35 = vand.u32 4294901760, %v645_v62  ;;  %v11742_v32 = vld [vmem:[#allocation154_spill] sm:$0xff]  ;;  %v644_v36 = vld [vmem:[%s10347_s0 + $0x80] sm:$0xff]  ;;  %6246 = vmatpush1.bf16.msra.mxu0 %v8910_v48 }
 0x1ba   : > { %v9082_v22 = vsub.f32 %v8709_v5, %v11739_v19  ;;  %v9087_v4 = vsub.f32 %v8715_v10, %v11740_v38  ;;  %5668 = vmatprep.subr.bf16.mxu1 %v11742_v32  ;;  %v11744_v41 = vand.u32 4294901760, %v11743_v26  ;;  %v11746_v53 = vand.u32 4294901760, %v11745_v3  ;;  %6248 = vmatprep.subr.bf16.mxu0 %v8924_v37  ;;  %v11774_v37 = vld [vmem:[#allocation60_spill] sm:$0xff]  ;;  %v11793_v5 = vld [vmem:[#allocation273_spill] sm:$0xff] }
 0x1bb   : > { %11741 = vst [vmem:[#allocation24_spill] sm:$0xff] %v9089_v35  ;;  %v4041_v0 = vand.u32 4294901760, %v4040_v16  ;;  %v4053_v25 = vand.u32 4294901760, %v4052_v54  ;;  %v9102_v38 = vpack.c.bf16 %v4029_v8, %v4017_v6  ;;  %v11749_v21 = vand.u32 4294901760, %v11748_v46  ;;  %v11754_v46 = vld [vmem:[#allocation47_spill] sm:$0xff] }
 0x1bc   : > { %v9096_v57 = vpack.c.bf16 %v11746_v53, %v11744_v41  ;;  %v11751_v32 = vand.u32 4294901760, %v11750_v17  ;;  %v11753_v3 = vand.u32 4294901760, %v8719_v51  ;;  %v651_v53 = vld [vmem:[%s10347_s0 + $0xb8] sm:$0xff]  ;;  %v9120_v16 = vpack.c.bf16 %v4035_v39, %v4023_v24  ;;  %v11756_v17 = vld [vmem:[#allocation48_spill] sm:$0xff] }
 0x1bd   : > { %v11755_v6 = vand.u32 4294901760, %v11754_v46  ;;  %v9135_v54 = vsub.f32 %v638_v14, %v9074_v1  ;;  %v4047_v24 = vand.u32 4294901760, %v9082_v22  ;;  %v4059_v39 = vand.u32 4294901760, %v9087_v4  ;;  %v11772_v4 = vld [vmem:[#allocation59_spill] sm:$0xff]  ;;  %6250 = vmatpush1.bf16.msra.mxu0 %v8930_v43  ;;  %v11785_v43 = vld [vmem:[#allocation261_spill] sm:$0xff]  ;;  %v11807_v1 = vld [vmem:[#allocation292_spill] sm:$0xff] }
 0x1be   : > { %11747 = vst [vmem:[#allocation28_spill] sm:$0xff] %v9096_v57  ;;  %v9108_v33 = vpack.c.bf16 %v11751_v32, %v11749_v21  ;;  %v9113_v41 = vsub.f32 %v8719_v51, %v11753_v3  ;;  %v11757_v21 = vand.u32 4294901760, %v11756_v17  ;;  %v11759_v32 = vld [vmem:[#allocation52_spill] sm:$0xff]  ;;  %v11761_v3 = vld [vmem:[#allocation54_spill] sm:$0xff]  ;;  %v9142_v46 = vsub.f32 %v645_v62, %v9089_v35  ;;  %6252 = vmatprep.subr.bf16.mxu0 %v8945_v40  ;;  %v11780_v22 = vld [vmem:[#allocation255_spill] sm:$0xff] }
 0x1bf   : > { %v11760_v26 = vand.u32 4294901760, %v11759_v32  ;;  %v11762_v19 = vand.u32 4294901760, %v11761_v3  ;;  %11764 = vst [vmem:[#allocation41_spill] sm:$0xff] %v9135_v54  ;;  %v11765_v57 = vld [vmem:[#allocation160_spill] sm:$0xff]  ;;  %v11768_v17 = vld [vmem:[#allocation166_spill] sm:$0xff]  ;;  %v11770_v14 = vand.u32 4294901760, %v8722_v15 }
 0x1c0   : > { %11752 = vst [vmem:[#allocation30_spill] sm:$0xff] %v9108_v33  ;;  %v9126_v8 = vpack.c.bf16 %v11757_v21, %v11755_v6  ;;  %5670 = vmatpush1.bf16.msra.mxu1 %v11765_v57  ;;  %11766 = vst [vmem:[#allocation42_spill] sm:$0xff] %v9142_v46  ;;  %v9144_v6 = vand.u32 4294901760, %v644_v36  ;;  %v11773_v3 = vand.u32 4294901760, %v11772_v4  ;;  %v11775_v48 = vand.u32 4294901760, %v11774_v37  ;;  %v11781_v32 = vld [vmem:[#allocation178_spill] sm:$0xff] }
 0x1c1   : > { %v9132_v33 = vpack.c.bf16 %v11762_v19, %v11760_v26  ;;  %5672 = vmatprep.subr.bf16.mxu1 %v11768_v17  ;;  %v9147_v19 = vpack.c.bf16 %v4053_v25, %v4041_v0  ;;  %v9152_v21 = vsub.f32 %v8722_v15, %v11770_v14  ;;  %v9155_v26 = vand.u32 4294901760, %v651_v53  ;;  %v650_v37 = vld [vmem:[%s10347_s0 + $0xb0] sm:$0xff]  ;;  %6254 = vmatpush1.bf16.msra.mxu0 %v8958_v2  ;;  %v11804_v15 = vld [vmem:[#allocation184_spill] sm:$0xff]  ;;  %v11816_v40 = vld [vmem:[#allocation307_spill] sm:$0xff] }
 0x1c2   : > { %11758 = vst [vmem:[#allocation35_spill] sm:$0xff] %v9126_v8  ;;  %11767 = vst [vmem:[#allocation47_spill] sm:$0xff] %v9144_v6  ;;  %v9163_v17 = vpack.c.bf16 %v11775_v48, %v11773_v3  ;;  %v11777_v25 = vand.u32 4294901760, %v9069_v60  ;;  %v11778_v48 = vld [vmem:[#allocation172_spill] sm:$0xff]  ;;  %v9182_v3 = vsub.f32 %v644_v36, %v9144_v6  ;;  %v11783_v4 = vld [vmem:[#allocation258_spill] sm:$0xff]  ;;  %6256 = vmatprep.subr.bf16.mxu0 %v8966_v31  ;;  %v9220_v10 = vand.u32 4294901760, %v650_v37 }
 0x1c3   : > { %11763 = vst [vmem:[#allocation36_spill] sm:$0xff] %v9132_v33  ;;  %11769 = vst [vmem:[#allocation48_spill] sm:$0xff] %v9147_v19  ;;  %v9190_v62 = vsub.f32 %v651_v53, %v9155_v26  ;;  %v11784_v36 = vld [vmem:[#allocation260_spill] sm:$0xff]  ;;  %v11794_v35 = vld [vmem:[#allocation274_spill] sm:$0xff]  ;;  %v9246_v14 = vpack.c.bf16 %v4059_v39, %v4047_v24  ;;  %v4077_v57 = vand.u32 4294901760, %v9152_v21  ;;  %v11819_v63 = vand.u32 4294901760, %v9135_v54 }
 0x1c4   : > { %11771 = vst [vmem:[#allocation52_spill] sm:$0xff] %v9155_v26  ;;  %11776 = vst [vmem:[#allocation54_spill] sm:$0xff] %v9163_v17  ;;  %v9168_v0 = vsub.f32 %v9069_v60, %v11777_v25  ;;  %5674 = vmatpush1.bf16.msra.mxu1 %v11778_v48  ;;  %v11792_v26 = vld [vmem:[#allocation272_spill] sm:$0xff]  ;;  %v11806_v17 = vld [vmem:[#allocation290_spill] sm:$0xff]  ;;  %v9266_v21 = vsub.f32 %v650_v37, %v9220_v10  ;;  %v11821_v8 = vand.u32 4294901760, %v9036_v45  ;;  %v11823_v39 = vand.u32 4294901760, %v9142_v46 }
 0x1c5   : > { %11779 = vst [vmem:[#allocation59_spill] sm:$0xff] %v9182_v3  ;;  %5676 = vmatprep.subr.bf16.mxu1 %v11781_v32  ;;  %11782 = vst [vmem:[#allocation60_spill] sm:$0xff] %v9190_v62  ;;  %v11790_v32 = vld [vmem:[#allocation269_spill] sm:$0xff]  ;;  %v11809_v19 = vld [vmem:[#allocation190_spill] sm:$0xff]  ;;  %6258 = vmatpush1.bf16.msra.mxu0 %v9000_v55  ;;  %v3949_v2 = vsub.f32 %v9135_v54, %v11819_v63  ;;  %v11826_v45 = vand.u32 4294901760, %v8740_v9  ;;  %v11827_v37 = vand.u32 4294901760, %v8747_v23 }
 0x1c6   : > { %11805 = vst [vmem:[#allocation323_spill] sm:$0xff] %v9220_v10  ;;  %v11808_v60 = vld [vmem:[#allocation293_spill] sm:$0xff]  ;;  %v11810_v51 = vld [vmem:[#allocation298_spill] sm:$0xff]  ;;  %v11811_v48 = vld [vmem:[#allocation299_spill] sm:$0xff]  ;;  %6260 = vmatprep.subr.bf16.mxu0 %v9050_v42  ;;  %v3959_v55 = vsub.f32 %v9142_v46, %v11823_v39  ;;  %v11831_v63 = vand.u32 4294901760, %v8769_v47 }
 0x1c7   : > { %v11812_v6 = vld [vmem:[#allocation301_spill] sm:$0xff]  ;;  %v11814_v31 = vld [vmem:[#allocation304_spill] sm:$0xff]  ;;  %11820 = vst [vmem:[#allocation290_spill] sm:$0xff] %v9266_v21  ;;  %v11824_v54 = vld [vmem:[#allocation10_spill] sm:$0xff] }
 0x1c8   : > { %5678 = vmatpush1.bf16.msra.mxu1 %v11804_v15  ;;  %v11813_v15 = vld [vmem:[#allocation302_spill] sm:$0xff]  ;;  %v11815_v25 = vld [vmem:[#allocation305_spill] sm:$0xff]  ;;  %v11817_v33 = vld [vmem:[#allocation196_spill] sm:$0xff]  ;;  %3935 = vmatmul.mubr.f32.vlgmr.msra.gmra.mrb[0].mxu0 %v11821_v8  ;;  %v11825_v42 = vand.u32 4294901760, %v11824_v54  ;;  %v4088_v8 = vsub.f32 %v8740_v9, %v11826_v45  ;;  %v11829_v54 = vand.u32 4294901760, %v9113_v41  ;;  %v3950_v41 = vand.u32 4294901760, %v3949_v2 }
 0x1c9   : > { %5680 = vmatprep.subr.bf16.mxu1 %v11809_v19  ;;  %v11818_v19 = vand.u32 4294901760, %v8724_v34  ;;  %6262 = vmatpush1.bf16.msra.mxu0 %v9072_v59  ;;  %v11833_v46 = vld [vmem:[#allocation204_spill] sm:$0xff]  ;;  %v11854_v10 = vld [vmem:[#allocation215_spill] sm:$0xff] }
 0x1ca   : > { %6264 = vmatprep.subr.bf16.mxu0 %v9102_v38  ;;  %v6271_v39 = vpack.c.bf16 %v4077_v57, %v11829_v54  ;;  %v11834_v38 = vand.u32 4294901760, %v11833_v46  ;;  %v11835_v57 = vand.u32 4294901760, %v9182_v3  ;;  %v4089_v2 = vand.u32 4294901760, %v4088_v8  ;;  %v11844_v8 = vld [vmem:[#allocation267_spill] sm:$0xff] }
 0x1cb   : > { %v4070_v53 = vsub.f32 %v8724_v34, %v11818_v19  ;;  %v11822_v19 = vand.u32 4294901760, %v8736_v13 }
 0x1cc   : > { %5682 = vmatpush1.bf16.msra.mxu1 %v11817_v33 }
 0x1cd   : > { %5684 = vmatprep.subr.bf16.mxu1 %v8972_v30  ;;  %v4082_v24 = vsub.f32 %v8736_v13, %v11822_v19  ;;  %v3944_v30 = vand.u32 4294901760, %v9168_v0  ;;  %v4100_v19 = vsub.f32 %v8747_v23, %v11827_v37  ;;  %v11828_v0 = vand.u32 4294901760, %v8749_v44  ;;  %6266 = vmatpush1.bf16.msra.mxu0 %v9120_v16  ;;  %v11843_v16 = vld [vmem:[#allocation266_spill] sm:$0xff] }
 0x1ce   : > { %v4071_v59 = vand.u32 4294901760, %v4070_v53  ;;  %v4112_v37 = vsub.f32 %v8769_v47, %v11831_v63  ;;  %v3965_v53 = vsub.f32 %v9182_v3, %v11835_v57  ;;  %v11836_v47 = vand.u32 4294901760, %v9190_v62  ;;  %v11841_v3 = vld [vmem:[#allocation264_spill] sm:$0xff] }
 0x1cf   : > { %1834 = vmatmul.mubr.f32.vlgmr.msra.gmra.mrb[0].mxu1 %v11825_v42  ;;  %v4094_v33 = vsub.f32 %v8749_v44, %v11828_v0  ;;  %v11830_v42 = vand.u32 4294901760, %v11780_v22  ;;  %v11832_v0 = vand.u32 4294901760, %v11783_v4  ;;  %3945 = vmatprep.mubr.f32.mxu0 %v3944_v30  ;;  %v4083_v46 = vand.u32 4294901760, %v4082_v24  ;;  %v11837_v44 = vld [vmem:[#allocation207_spill] sm:$0xff]  ;;  %v11850_v24 = vld [vmem:[#allocation65_spill] sm:$0xff] }
 0x1d0   : > { %5686 = vmatpush1.bf16.msra.mxu1 %v9014_v12  ;;  %1842 = vmatprep.mubr.f32.mxu1 %v11834_v38  ;;  %v4101_v38 = vand.u32 4294901760, %v4100_v19  ;;  %v11838_v57 = vand.u32 4294901760, %v11837_v44  ;;  %v4113_v30 = vand.u32 4294901760, %v4112_v37  ;;  %v11845_v44 = vand.u32 4294901760, %v9266_v21 }
 0x1d1   : > { %v4106_v45 = vsub.f32 %v11780_v22, %v11830_v42  ;;  %5688 = vmatprep.subr.bf16.mxu1 %v9042_v58  ;;  %v4124_v12 = vsub.f32 %v11783_v4, %v11832_v0  ;;  %v3960_v58 = vand.u32 4294901760, %v3959_v55  ;;  %v3975_v0 = vsub.f32 %v9190_v62, %v11836_v47  ;;  %v11839_v42 = vld [vmem:[#allocation48_spill] sm:$0xff]  ;;  %v11840_v55 = vld [vmem:[#allocation263_spill] sm:$0xff]  ;;  %3951 = vmatmul.mubr.f32.gmra.mrb[2].mxu0 %v3950_v41 }
 0x1d2   : > { %v4095_v4 = vand.u32 4294901760, %v4094_v33  ;;  %6268 = vmatprep.subr.bf16.mxu0 %v11839_v42  ;;  %v11842_v47 = vld [vmem:[#allocation28_spill] sm:$0xff]  ;;  %v3966_v33 = vand.u32 4294901760, %v3965_v53  ;;  %v11847_v42 = vand.u32 4294901760, %v11785_v43  ;;  %v6273_v41 = vpack.c.bf16 %v4083_v46, %v4071_v59 }
 0x1d3   : > { %1846 = vmatmul.mubr.f32.gmra.mrb[2].mxu1 %v11838_v57  ;;  %v4107_v63 = vand.u32 4294901760, %v4106_v45  ;;  %v4125_v57 = vand.u32 4294901760, %v4124_v12  ;;  %v11846_v45 = vand.u32 4294901760, %v11784_v36  ;;  %3961 = vmatprep.mubr.f32.mxu0 %v3960_v58  ;;  %v3976_v19 = vand.u32 4294901760, %v3975_v0  ;;  %v11852_v12 = vld [vmem:[#allocation66_spill] sm:$0xff] }
 0x1d4   : > { %5690 = vmatpush1.bf16.msra.mxu1 %v9056_v61  ;;  %v3981_v61 = vsub.f32 %v9266_v21, %v11845_v44  ;;  %v4130_v22 = vsub.f32 %v11785_v43, %v11847_v42  ;;  %6270 = vmatpush1.bf16.msra.mxu0 %v9246_v14  ;;  %v6275_v53 = vpack.c.bf16 %v4101_v38, %v4089_v2  ;;  %v11851_v44 = vand.u32 4294901760, %v11850_v24  ;;  %v11859_v0 = vld [vmem:[#allocation270_spill] sm:$0xff]  ;;  %v11860_v2 = vld [vmem:[#allocation35_spill] sm:$0xff]  ;;  %v11863_v38 = vld [vmem:[#allocation72_spill] sm:$0xff] }
 0x1d5   : > { %5692 = vmatprep.subr.bf16.mxu1 %v11842_v47  ;;  %v4118_v37 = vsub.f32 %v11784_v36, %v11846_v45  ;;  %v11848_v47 = vld [vmem:[#allocation211_spill] sm:$0xff]  ;;  %v11853_v21 = vand.u32 4294901760, %v11852_v12  ;;  %v11855_v45 = vand.u32 4294901760, %v11854_v10  ;;  %v11856_v36 = vld [vmem:[#allocation30_spill] sm:$0xff]  ;;  %6272 = vmatprep.subr.bf16.mxu0 %v6271_v39  ;;  %v11857_v42 = vand.u32 4294901760, %v11840_v55 }
 0x1d6   : > { %v11849_v54 = vand.u32 4294901760, %v11848_v47  ;;  %v11858_v58 = vand.u32 4294901760, %v11841_v3  ;;  %v11864_v24 = vand.u32 4294901760, %v11863_v38  ;;  %v11865_v39 = vand.u32 4294901760, %v11843_v16  ;;  %3967 = vmatmul.mubr.f32.gmra.mrb[4].mxu0 %v3966_v33 }
 0x1d7   : > { %v5701_v62 = vpack.c.bf16 %v11853_v21, %v11851_v44  ;;  %v11861_v21 = vld [vmem:[#allocation71_spill] sm:$0xff]  ;;  %v11866_v44 = vand.u32 4294901760, %v11844_v8  ;;  %v4119_v46 = vand.u32 4294901760, %v4118_v37  ;;  %v4131_v59 = vand.u32 4294901760, %v4130_v22  ;;  %3977 = vmatprep.mubr.f32.mxu0 %v3976_v19 }
 0x1d8   : > { %1854 = vmatprep.mubr.f32.mxu1 %v11849_v54  ;;  %5694 = vmatpush1.bf16.msra.mxu1 %v11856_v36  ;;  %v4136_v54 = vsub.f32 %v11840_v55, %v11857_v42  ;;  %v4148_v14 = vsub.f32 %v11841_v3, %v11858_v58  ;;  %v11862_v10 = vand.u32 4294901760, %v11861_v21  ;;  %v4142_v47 = vsub.f32 %v11843_v16, %v11865_v39  ;;  %v11892_v16 = vld [vmem:[#allocation84_spill] sm:$0xff] }
 0x1d9   : > { %1858 = vmatmul.mubr.f32.gmra.mrb[4].mxu1 %v11855_v45  ;;  %5696 = vmatprep.subr.bf16.mxu1 %v11860_v2  ;;  %v4154_v12 = vsub.f32 %v11844_v8, %v11866_v44  ;;  %v3982_v45 = vand.u32 4294901760, %v3981_v61  ;;  %v6277_v42 = vpack.c.bf16 %v4107_v63, %v4095_v4  ;;  %v6279_v58 = vpack.c.bf16 %v4125_v57, %v4113_v30  ;;  %v11867_v2 = vld [vmem:[#allocation220_spill] sm:$0xff]  ;;  %v11870_v44 = vld [vmem:[#allocation223_spill] sm:$0xff]  ;;  %v11875_v57 = vld [vmem:[#allocation54_spill] sm:$0xff] }
 0x1da   : > { %v5703_v36 = vpack.c.bf16 %v11864_v24, %v11862_v10  ;;  %v11868_v55 = vand.u32 4294901760, %v11867_v2  ;;  %6274 = vmatpush1.bf16.msra.mxu0 %v6273_v41  ;;  %v11869_v24 = vld [vmem:[#allocation276_spill] sm:$0xff]  ;;  %v11871_v33 = vand.u32 4294901760, %v11870_v44  ;;  %v4137_v22 = vand.u32 4294901760, %v4136_v54  ;;  %v11876_v2 = vld [vmem:[#allocation278_spill] sm:$0xff] }
 0x1db   : > { %v11872_v4 = vld [vmem:[#allocation36_spill] sm:$0xff]  ;;  %6276 = vmatprep.subr.bf16.mxu0 %v6275_v53  ;;  %v4149_v63 = vand.u32 4294901760, %v4148_v14  ;;  %v11873_v30 = vand.u32 4294901760, %v11790_v32  ;;  %v11874_v19 = vand.u32 4294901760, %v11859_v0  ;;  %v4143_v37 = vand.u32 4294901760, %v4142_v47  ;;  %3983 = vmatmul.mubr.f32.gmra.mrb[6].mxu0 %v3982_v45  ;;  %v11878_v53 = vld [vmem:[#allocation77_spill] sm:$0xff] }
 0x1dc   : > { %1866 = vmatprep.mubr.f32.mxu1 %v11868_v55  ;;  %5698 = vmatpush1.bf16.msra.mxu1 %v11872_v4  ;;  %v4155_v41 = vand.u32 4294901760, %v4154_v12  ;;  %v11879_v54 = vand.u32 4294901760, %v11878_v53  ;;  %v11880_v14 = vld [vmem:[#allocation78_spill] sm:$0xff]  ;;  %v6281_v10 = vpack.c.bf16 %v4131_v59, %v4119_v46  ;;  %v11886_v47 = vand.u32 4294901760, %v11792_v26 }
 0x1dd   : > { %1870 = vmatmul.mubr.f32.gmra.mrb[6].mxu1 %v11871_v33  ;;  %v4160_v55 = vsub.f32 %v11790_v32, %v11873_v30  ;;  %v4172_v61 = vsub.f32 %v11859_v0, %v11874_v19  ;;  %5700 = vmatprep.subr.bf16.mxu1 %v11875_v57  ;;  %v11877_v33 = vld [vmem:[#allocation279_spill] sm:$0xff]  ;;  %v11881_v4 = vand.u32 4294901760, %v11880_v14  ;;  %v11882_v30 = vld [vmem:[#allocation281_spill] sm:$0xff]  ;;  %v11883_v32 = vld [vmem:[#allocation282_spill] sm:$0xff]  ;;  %v11887_v45 = vand.u32 4294901760, %v11793_v5 }
 0x1de   : > { %v11884_v19 = vld [vmem:[#allocation4_spill] sm:$0xff]  ;;  %v11885_v57 = vld [vmem:[#allocation231_spill] sm:$0xff]  ;;  %6278 = vmatpush1.bf16.msra.mxu0 %v6277_v42  ;;  %v4166_v12 = vsub.f32 %v11792_v26, %v11886_v47  ;;  %v11889_v46 = vand.u32 4294901760, %v11869_v24  ;;  %v11893_v21 = vand.u32 4294901760, %v11892_v16  ;;  %v6283_v47 = vpack.c.bf16 %v4149_v63, %v4137_v22 }
 0x1df   : > { %v5705_v38 = vpack.c.bf16 %v11881_v4, %v11879_v54  ;;  %2133 = vmatprep.mubr.f32.mxu1 %v11884_v19  ;;  %4374 = vmatprep.mubr.f32.mxu0 %v11885_v57  ;;  %v4178_v53 = vsub.f32 %v11793_v5, %v11887_v45  ;;  %v11888_v54 = vand.u32 4294901760, %v11794_v35  ;;  %v11890_v4 = vld [vmem:[#allocation83_spill] sm:$0xff]  ;;  %v4161_v44 = vand.u32 4294901760, %v4160_v55  ;;  %v11894_v45 = vld [vmem:[#allocation89_spill] sm:$0xff]  ;;  %v11896_v5 = vld [vmem:[#allocation90_spill] sm:$0xff] }
 0x1e0   : > { %v4196_v14 = vsub.f32 %v11869_v24, %v11889_v46  ;;  %5702 = vmatpush1.bf16.msra.mxu1 %v5701_v62  ;;  %6280 = vmatprep.subr.bf16.mxu0 %v6279_v58  ;;  %v11891_v42 = vand.u32 4294901760, %v11890_v4  ;;  %v4173_v57 = vand.u32 4294901760, %v4172_v61  ;;  %v11895_v26 = vand.u32 4294901760, %v11894_v45  ;;  %v11902_v63 = vld [vmem:[#allocation284_spill] sm:$0xff] }
 0x1e1   : > { %v4184_v59 = vsub.f32 %v11794_v35, %v11888_v54  ;;  %5704 = vmatprep.subr.bf16.mxu1 %v5703_v36  ;;  %v11897_v0 = vand.u32 4294901760, %v11896_v5  ;;  %v6285_v35 = vpack.c.bf16 %v4155_v41, %v4143_v37  ;;  %v11898_v8 = vand.u32 4294901760, %v11876_v2  ;;  %v11904_v41 = vld [vmem:[#allocation95_spill] sm:$0xff] }
 0x1e2   : > { %v5707_v39 = vpack.c.bf16 %v11893_v21, %v11891_v42  ;;  %v11899_v58 = vand.u32 4294901760, %v11877_v33  ;;  %v11900_v16 = vand.u32 4294901760, %v11882_v30  ;;  %v11901_v36 = vand.u32 4294901760, %v11883_v32  ;;  %6282 = vmatpush1.bf16.msra.mxu0 %v6281_v10  ;;  %v11906_v42 = vld [vmem:[#allocation96_spill] sm:$0xff] }
 0x1e3   : > { %v5709_v54 = vpack.c.bf16 %v11897_v0, %v11895_v26  ;;  %v4190_v62 = vsub.f32 %v11876_v2, %v11898_v8  ;;  %v11903_v26 = vld [vmem:[#allocation285_spill] sm:$0xff]  ;;  %v4167_v55 = vand.u32 4294901760, %v4166_v12  ;;  %v4179_v61 = vand.u32 4294901760, %v4178_v53  ;;  %6284 = vmatprep.subr.bf16.mxu0 %v6283_v47  ;;  %v11918_v12 = vld [vmem:[#allocation108_spill] sm:$0xff] }
 0x1e4   : > { %v4202_v46 = vsub.f32 %v11877_v33, %v11899_v58  ;;  %v4208_v21 = vsub.f32 %v11882_v30, %v11900_v16  ;;  %v4220_v22 = vsub.f32 %v11883_v32, %v11901_v36  ;;  %v4185_v8 = vand.u32 4294901760, %v4184_v59  ;;  %5706 = vmatpush1.bf16.msra.mxu1 %v5705_v38  ;;  %v11908_v30 = vld [vmem:[#allocation287_spill] sm:$0xff]  ;;  %v11909_v36 = vld [vmem:[#allocation288_spill] sm:$0xff] }
 0x1e5   : > { %v4197_v37 = vand.u32 4294901760, %v4196_v14  ;;  %v11905_v4 = vand.u32 4294901760, %v11904_v41  ;;  %v11907_v45 = vand.u32 4294901760, %v11906_v42  ;;  %v6287_v16 = vpack.c.bf16 %v4173_v57, %v4161_v44  ;;  %5708 = vmatprep.subr.bf16.mxu1 %v5707_v39  ;;  %v11912_v57 = vld [vmem:[#allocation101_spill] sm:$0xff]  ;;  %v11914_v39 = vld [vmem:[#allocation102_spill] sm:$0xff]  ;;  %v11916_v42 = vld [vmem:[#allocation107_spill] sm:$0xff] }
 0x1e6   : > { %v11096_v2 = vand.u32 4294901760, %v11908_v30  ;;  %v11095_v32 = vand.u32 4294901760, %v11909_v36  ;;  %v4191_v5 = vand.u32 4294901760, %v4190_v62  ;;  %v4203_v0 = vand.u32 4294901760, %v4202_v46  ;;  %6286 = vmatpush1.bf16.msra.mxu0 %v6285_v35 }
 0x1e7   : > { %v5711_v58 = vpack.c.bf16 %v11907_v45, %v11905_v4  ;;  %v4209_v53 = vand.u32 4294901760, %v4208_v21  ;;  %v4221_v38 = vand.u32 4294901760, %v4220_v22  ;;  %v11910_v59 = vand.u32 4294901760, %v11902_v63  ;;  %6288 = vmatprep.subr.bf16.mxu0 %v6287_v16  ;;  %v11926_v16 = vld [vmem:[#allocation120_spill] sm:$0xff] }
 0x1e8   : > { %v11911_v47 = vand.u32 4294901760, %v11903_v26  ;;  %v11913_v41 = vand.u32 4294901760, %v11912_v57  ;;  %v11915_v62 = vand.u32 4294901760, %v11914_v39  ;;  %v6289_v4 = vpack.c.bf16 %v4179_v61, %v4167_v55  ;;  %5710 = vmatpush1.bf16.msra.mxu1 %v5709_v54  ;;  %v11920_v61 = vld [vmem:[#allocation113_spill] sm:$0xff]  ;;  %v11924_v54 = vld [vmem:[#allocation119_spill] sm:$0xff] }
 0x1e9   : > { %v4214_v14 = vsub.f32 %v11902_v63, %v11910_v59  ;;  %v11917_v45 = vand.u32 4294901760, %v11916_v42  ;;  %v11919_v21 = vand.u32 4294901760, %v11918_v12  ;;  %v6291_v10 = vpack.c.bf16 %v4197_v37, %v4185_v8  ;;  %5712 = vmatprep.subr.bf16.mxu1 %v5711_v58  ;;  %v11922_v12 = vld [vmem:[#allocation114_spill] sm:$0xff] }
 0x1ea   : > { %v4226_v44 = vsub.f32 %v11903_v26, %v11911_v47  ;;  %v5713_v46 = vpack.c.bf16 %v11915_v62, %v11913_v41  ;;  %v4232_v59 = vsub.f32 %v11908_v30, %v11096_v2  ;;  %v4244_v35 = vsub.f32 %v11909_v36, %v11095_v32  ;;  %6290 = vmatpush1.bf16.msra.mxu0 %v6289_v4 }
 0x1eb   : > { %v5715_v22 = vpack.c.bf16 %v11919_v21, %v11917_v45  ;;  %v11099_v47 = vand.u32 4294901760, %v11807_v1  ;;  %v11921_v57 = vand.u32 4294901760, %v11920_v61  ;;  %v11923_v41 = vand.u32 4294901760, %v11922_v12  ;;  %6292 = vmatprep.subr.bf16.mxu0 %v6291_v10 }
 0x1ec   : > { %v11925_v37 = vand.u32 4294901760, %v11924_v54  ;;  %v11927_v39 = vand.u32 4294901760, %v11926_v16  ;;  %v11928_v42 = vand.u32 4294901760, %v11806_v17  ;;  %v11929_v21 = vand.u32 4294901760, %v8884_v18  ;;  %5714 = vmatpush1.bf16.msra.mxu1 %v5713_v46  ;;  %v11937_v46 = vld [vmem:[#allocation132_spill] sm:$0xff] }
 0x1ed   : > { %v5717_v8 = vpack.c.bf16 %v11923_v41, %v11921_v57  ;;  %v6293_v2 = vpack.c.bf16 %v4203_v0, %v4191_v5  ;;  %v6295_v58 = vpack.c.bf16 %v4221_v38, %v4209_v53  ;;  %v4215_v55 = vand.u32 4294901760, %v4214_v14  ;;  %5716 = vmatprep.subr.bf16.mxu1 %v5715_v22 }
 0x1ee   : > { %v5719_v62 = vpack.c.bf16 %v11927_v39, %v11925_v37  ;;  %v4238_v45 = vsub.f32 %v11806_v17, %v11928_v42  ;;  %v4250_v32 = vsub.f32 %v8884_v18, %v11929_v21  ;;  %v4227_v61 = vand.u32 4294901760, %v4226_v44  ;;  %v11933_v42 = vld [vmem:[#allocation126_spill] sm:$0xff] }
 0x1ef   : > { %v11097_v57 = vand.u32 4294901760, %v8899_v7  ;;  %v11098_v12 = vand.u32 4294901760, %v8901_v50  ;;  %v11100_v41 = vand.u32 4294901760, %v11810_v51  ;;  %v11102_v54 = vand.u32 4294901760, %v11811_v48  ;;  %6294 = vmatpush1.bf16.msra.mxu0 %v6293_v2 }
 0x1f0   : > { %v4233_v37 = vand.u32 4294901760, %v4232_v59  ;;  %v4245_v16 = vand.u32 4294901760, %v4244_v35  ;;  %v4256_v5 = vsub.f32 %v11807_v1, %v11099_v47  ;;  %v11930_v0 = vand.u32 4294901760, %v11808_v60  ;;  %5718 = vmatpush1.bf16.msra.mxu1 %v5717_v8  ;;  %6296 = vmatprep.subr.bf16.mxu0 %v6295_v58 }
 0x1f1   : > { %v4239_v38 = vand.u32 4294901760, %v4238_v45  ;;  %v4251_v14 = vand.u32 4294901760, %v4250_v32  ;;  %v11101_v44 = vand.u32 4294901760, %v11812_v6  ;;  %v6297_v39 = vpack.c.bf16 %v4227_v61, %v4215_v55  ;;  %v11931_v55 = vld [vmem:[#allocation125_spill] sm:$0xff]  ;;  %5720 = vmatprep.subr.bf16.mxu1 %v5719_v62 }
 0x1f2   : > { %v4268_v53 = vsub.f32 %v11808_v60, %v11930_v0  ;;  %v4262_v59 = vsub.f32 %v8899_v7, %v11097_v57  ;;  %v4274_v22 = vsub.f32 %v8901_v50, %v11098_v12  ;;  %v4280_v32 = vsub.f32 %v11810_v51, %v11100_v41  ;;  %v11935_v12 = vld [vmem:[#allocation131_spill] sm:$0xff] }
 0x1f3   : > { %v4292_v35 = vsub.f32 %v11811_v48, %v11102_v54  ;;  %v11932_v2 = vand.u32 4294901760, %v11931_v55  ;;  %v11934_v45 = vand.u32 4294901760, %v11933_v42  ;;  %v6299_v61 = vpack.c.bf16 %v4245_v16, %v4233_v37  ;;  %6298 = vmatpush1.bf16.msra.mxu0 %v6297_v39  ;;  %v11947_v16 = vld [vmem:[#allocation143_spill] sm:$0xff]  ;;  %v11949_v39 = vld [vmem:[#allocation144_spill] sm:$0xff] }
 0x1f4   : > { %v4257_v0 = vand.u32 4294901760, %v4256_v5  ;;  %v4269_v57 = vand.u32 4294901760, %v4268_v53  ;;  %v11936_v47 = vand.u32 4294901760, %v11935_v12  ;;  %v11938_v10 = vand.u32 4294901760, %v11937_v46  ;;  %v11943_v46 = vld [vmem:[#allocation137_spill] sm:$0xff] }
 0x1f5   : > { %v5721_v21 = vpack.c.bf16 %v11934_v45, %v11932_v2  ;;  %v6301_v4 = vpack.c.bf16 %v4251_v14, %v4239_v38  ;;  %v4286_v8 = vsub.f32 %v11812_v6, %v11101_v44  ;;  %v11939_v58 = vand.u32 4294901760, %v11813_v15  ;;  %6300 = vmatprep.subr.bf16.mxu0 %v6299_v61  ;;  %v11945_v45 = vld [vmem:[#allocation138_spill] sm:$0xff] }
 0x1f6   : > { %v5723_v41 = vpack.c.bf16 %v11938_v10, %v11936_v47  ;;  %v11940_v2 = vand.u32 4294901760, %v11814_v31  ;;  %v11941_v62 = vand.u32 4294901760, %v11815_v25  ;;  %v11942_v47 = vld [vmem:[#allocation309_spill] sm:$0xff]  ;;  %v4263_v53 = vand.u32 4294901760, %v4262_v59 }
 0x1f7   : > { %v4298_v55 = vsub.f32 %v11813_v15, %v11939_v58  ;;  %v4275_v38 = vand.u32 4294901760, %v4274_v22  ;;  %v4281_v14 = vand.u32 4294901760, %v4280_v32  ;;  %v4293_v10 = vand.u32 4294901760, %v4292_v35  ;;  %5722 = vmatpush1.bf16.msra.mxu1 %v5721_v21  ;;  %v11951_v32 = vld [vmem:[#allocation149_spill] sm:$0xff]  ;;  %v11953_v21 = vld [vmem:[#allocation150_spill] sm:$0xff]  ;;  %6302 = vmatpush1.bf16.msra.mxu0 %v6301_v4 }
 0x1f8   : > { %v4304_v37 = vsub.f32 %v11814_v31, %v11940_v2  ;;  %v4316_v12 = vsub.f32 %v11815_v25, %v11941_v62  ;;  %v11944_v42 = vand.u32 4294901760, %v11943_v46  ;;  %v11946_v58 = vand.u32 4294901760, %v11945_v45  ;;  %5724 = vmatprep.subr.bf16.mxu1 %v5723_v41 }
 0x1f9   : > { %v6303_v44 = vpack.c.bf16 %v4269_v57, %v4257_v0  ;;  %v11105_v54 = vand.u32 4294901760, %v8947_v49  ;;  %v11106_v62 = vand.u32 4294901760, %v8949_v52  ;;  %v11948_v5 = vand.u32 4294901760, %v11947_v16 }
 0x1fa   : > { %v5725_v2 = vpack.c.bf16 %v11946_v58, %v11944_v42  ;;  %v11950_v59 = vand.u32 4294901760, %v11949_v39  ;;  %v11952_v35 = vand.u32 4294901760, %v11951_v32  ;;  %v11954_v61 = vand.u32 4294901760, %v11953_v21  ;;  %v11963_v32 = vld [vmem:[#allocation162_spill] sm:$0xff] }
 0x1fb   : > { %v4287_v46 = vand.u32 4294901760, %v4286_v8  ;;  %v4299_v25 = vand.u32 4294901760, %v4298_v55  ;;  %v4305_v45 = vand.u32 4294901760, %v4304_v37  ;;  %v4317_v42 = vand.u32 4294901760, %v4316_v12  ;;  %6304 = vmatprep.subr.bf16.mxu0 %v6303_v44  ;;  %v11957_v12 = vld [vmem:[#allocation155_spill] sm:$0xff] }
 0x1fc   : > { %v5727_v22 = vpack.c.bf16 %v11950_v59, %v11948_v5  ;;  %v5729_v31 = vpack.c.bf16 %v11954_v61, %v11952_v35  ;;  %v11955_v57 = vand.u32 4294901760, %v11816_v40  ;;  %v11956_v41 = vand.u32 4294901760, %v11942_v47  ;;  %5726 = vmatpush1.bf16.msra.mxu1 %v5725_v2  ;;  %v11961_v2 = vld [vmem:[#allocation161_spill] sm:$0xff] }
 0x1fd   : > { %v6305_v58 = vpack.c.bf16 %v4275_v38, %v4263_v53  ;;  %v6307_v5 = vpack.c.bf16 %v4293_v10, %v4281_v14  ;;  %v11112_v39 = vand.u32 4294901760, %v8952_v11  ;;  %v11111_v59 = vand.u32 4294901760, %v8960_v56  ;;  %v11959_v38 = vld [vmem:[#allocation156_spill] sm:$0xff] }
 0x1fe   : > { %v4310_v0 = vsub.f32 %v11816_v40, %v11955_v57  ;;  %v4322_v16 = vsub.f32 %v11942_v47, %v11956_v41  ;;  %v4328_v8 = vsub.f32 %v8947_v49, %v11105_v54  ;;  %v4340_v55 = vsub.f32 %v8949_v52, %v11106_v62  ;;  %5728 = vmatprep.subr.bf16.mxu1 %v5727_v22 }
 0x1ff   : > { %v11110_v37 = vand.u32 4294901760, %v8980_v20  ;;  %v11108_v4 = vand.u32 4294901760, %v8982_v27  ;;  %v11958_v53 = vand.u32 4294901760, %v11957_v12  ;;  %v11960_v14 = vand.u32 4294901760, %v11959_v38  ;;  %6306 = vmatpush1.bf16.msra.mxu0 %v6305_v58 }
 0x200   : > { %v11962_v44 = vand.u32 4294901760, %v11961_v2  ;;  %v11964_v35 = vand.u32 4294901760, %v11963_v32  ;;  %v6309_v61 = vpack.c.bf16 %v4299_v25, %v4287_v46  ;;  %v6311_v57 = vpack.c.bf16 %v4317_v42, %v4305_v45  ;;  %5730 = vmatpush1.bf16.msra.mxu1 %v5729_v31  ;;  %6308 = vmatprep.subr.bf16.mxu0 %v6307_v5  ;;  %v11965_v42 = vld [vmem:[#allocation167_spill] sm:$0xff]  ;;  %v11971_v32 = vld [vmem:[#allocation174_spill] sm:$0xff] }
 0x201   : > { %v5731_v10 = vpack.c.bf16 %v11960_v14, %v11958_v53  ;;  %v4311_v41 = vand.u32 4294901760, %v4310_v0  ;;  %v4323_v54 = vand.u32 4294901760, %v4322_v16  ;;  %v4334_v62 = vsub.f32 %v8952_v11, %v11112_v39  ;;  %v11967_v16 = vld [vmem:[#allocation168_spill] sm:$0xff] }
 0x202   : > { %v5733_v21 = vpack.c.bf16 %v11964_v35, %v11962_v44  ;;  %v4346_v22 = vsub.f32 %v8960_v56, %v11111_v59  ;;  %v11107_v12 = vand.u32 4294901760, %v9002_v28  ;;  %v11109_v53 = vand.u32 4294901760, %v9004_v29  ;;  %v12023_v59 = vld [vmem:[#allocation52_spill] sm:$0xff] }
 0x203   : > { %v4329_v38 = vand.u32 4294901760, %v4328_v8  ;;  %v4341_v25 = vand.u32 4294901760, %v4340_v55  ;;  %v4352_v46 = vsub.f32 %v8980_v20, %v11110_v37  ;;  %v4364_v45 = vsub.f32 %v8982_v27, %v11108_v4  ;;  %5732 = vmatprep.subr.bf16.mxu1 %v5731_v10  ;;  %6310 = vmatpush1.bf16.msra.mxu0 %v6309_v61  ;;  %v11969_v10 = vld [vmem:[#allocation173_spill] sm:$0xff]  ;;  %v12022_v37 = vld [vmem:[#allocation218_spill] sm:$0xff] }
 0x204   : > { %v11966_v0 = vand.u32 4294901760, %v11965_v42  ;;  %v11968_v58 = vand.u32 4294901760, %v11967_v16  ;;  %v6313_v2 = vpack.c.bf16 %v4323_v54, %v4311_v41  ;;  %v4335_v31 = vand.u32 4294901760, %v4334_v62  ;;  %5734 = vmatpush1.bf16.msra.mxu1 %v5733_v21  ;;  %6312 = vmatprep.subr.bf16.mxu0 %v6311_v57  ;;  %v11973_v62 = vld [vmem:[#allocation179_spill] sm:$0xff]  ;;  %v11977_v21 = vld [vmem:[#allocation185_spill] sm:$0xff] }
 0x205   : > { %v4347_v5 = vand.u32 4294901760, %v4346_v22  ;;  %v4358_v8 = vsub.f32 %v9002_v28, %v11107_v12  ;;  %v4370_v55 = vsub.f32 %v9004_v29, %v11109_v53  ;;  %v11970_v44 = vand.u32 4294901760, %v11969_v10  ;;  %v11975_v22 = vld [vmem:[#allocation180_spill] sm:$0xff]  ;;  %v11979_v10 = vld [vmem:[#allocation186_spill] sm:$0xff] }
 0x206   : > { %v5735_v14 = vpack.c.bf16 %v11968_v58, %v11966_v0  ;;  %v11972_v35 = vand.u32 4294901760, %v11971_v32  ;;  %v6315_v0 = vpack.c.bf16 %v4341_v25, %v4329_v38  ;;  %v4353_v54 = vand.u32 4294901760, %v4352_v46  ;;  %v11981_v25 = vld [vmem:[#allocation191_spill] sm:$0xff] }
 0x207   : > { %v4365_v61 = vand.u32 4294901760, %v4364_v45  ;;  %v11974_v41 = vand.u32 4294901760, %v11973_v62  ;;  %v11976_v16 = vand.u32 4294901760, %v11975_v22  ;;  %6314 = vmatpush1.bf16.msra.mxu0 %v6313_v2  ;;  %v6317_v12 = vpack.c.bf16 %v4347_v5, %v4335_v31  ;;  %v11983_v45 = vld [vmem:[#allocation192_spill] sm:$0xff]  ;;  %v11985_v2 = vld [vmem:[#allocation197_spill] sm:$0xff]  ;;  %v11987_v5 = vld [vmem:[#allocation198_spill] sm:$0xff] }
 0x208   : > { %v5737_v42 = vpack.c.bf16 %v11972_v35, %v11970_v44  ;;  %5736 = vmatprep.subr.bf16.mxu1 %v5735_v14  ;;  %v4359_v4 = vand.u32 4294901760, %v4358_v8  ;;  %v4371_v53 = vand.u32 4294901760, %v4370_v55  ;;  %6316 = vmatprep.subr.bf16.mxu0 %v6315_v0  ;;  %v11978_v57 = vand.u32 4294901760, %v11977_v21  ;;  %v11990_v0 = vld [vmem:[#allocation227_spill] sm:$0xff]  ;;  %v11997_v21 = vld [vmem:[#allocation6_spill] sm:$0xff] }
 0x209   : > { %v5739_v58 = vpack.c.bf16 %v11976_v16, %v11974_v41  ;;  %v11980_v32 = vand.u32 4294901760, %v11979_v10  ;;  %v6319_v38 = vpack.c.bf16 %v4365_v61, %v4353_v54  ;;  %v11982_v46 = vand.u32 4294901760, %v11981_v25  ;;  %v11991_v54 = vld [vmem:[#allocation229_spill] sm:$0xff]  ;;  %v11992_v61 = vld [vmem:[#allocation230_spill] sm:$0xff]  ;;  %v12002_v25 = vld [vmem:[#allocation240_spill] sm:$0xff] }
 0x20a   : > { %5738 = vmatpush1.bf16.msra.mxu1 %v5737_v42  ;;  %v11984_v14 = vand.u32 4294901760, %v11983_v45  ;;  %v6321_v62 = vpack.c.bf16 %v4371_v53, %v4359_v4  ;;  %v11986_v31 = vand.u32 4294901760, %v11985_v2  ;;  %v11988_v8 = vand.u32 4294901760, %v11987_v5  ;;  %v11989_v42 = vld [vmem:[#allocation226_spill] sm:$0xff]  ;;  %v11993_v16 = vld [vmem:[#allocation233_spill] sm:$0xff]  ;;  %v11995_v53 = vld [vmem:[#allocation12_spill] sm:$0xff] }
 0x20b   : > { %v5741_v44 = vpack.c.bf16 %v11980_v32, %v11978_v57  ;;  %5740 = vmatprep.subr.bf16.mxu1 %v5739_v58  ;;  %6318 = vmatpush1.bf16.msra.mxu0 %v6317_v12  ;;  %v6323_v41 = vpack.c.bf16 %v11990_v0, %v11989_v42  ;;  %v6325_v22 = vpack.c.bf16 %v11992_v61, %v11991_v54  ;;  %v11994_v12 = vld [vmem:[#allocation234_spill] sm:$0xff]  ;;  %v11996_v58 = vld [vmem:[#allocation308_spill] sm:$0xff]  ;;  %v11998_v57 = vld [vmem:[#allocation235_spill] sm:$0xff] }
 0x20c   : > { %v5743_v35 = vpack.c.bf16 %v11984_v14, %v11982_v46  ;;  %6320 = vmatprep.subr.bf16.mxu0 %v6319_v38  ;;  %v5745_v55 = vpack.c.bf16 %v11988_v8, %v11986_v31  ;;  %v6327_v4 = vpack.c.bf16 %v11994_v12, %v11993_v16  ;;  %v11999_v10 = vld [vmem:[#allocation237_spill] sm:$0xff]  ;;  %v12001_v38 = vld [vmem:[#allocation239_spill] sm:$0xff]  ;;  %v12004_v14 = vld [vmem:[#allocation202_spill] sm:$0xff]  ;;  %v12024_v39 = vpack.c.bf16 %v8736_v13, %v8724_v34 }
 0x20d   : > { %v6329_v32 = vpack.c.bf16 %v11999_v10, %v11998_v57  ;;  %v6331_v46 = vpack.c.bf16 %v12002_v25, %v12001_v38  ;;  %v12003_v45 = vld [vmem:[#allocation23_spill] sm:$0xff]  ;;  %v12007_v2 = vld [vmem:[#allocation29_spill] sm:$0xff]  ;;  %v12008_v31 = vld [vmem:[#allocation34_spill] sm:$0xff] }
 0x20e   : > { %5742 = vmatpush1.bf16.msra.mxu1 %v5741_v44  ;;  %v12000_v44 = vld [vmem:[#allocation16_spill] sm:$0xff]  ;;  %v12009_v5 = vld [vmem:[#allocation22_spill] sm:$0xff] }
 0x20f   : > { %5744 = vmatprep.subr.bf16.mxu1 %v5743_v35  ;;  %6322 = vmatpush1.bf16.msra.mxu0 %v6321_v62  ;;  %v12005_v35 = vld [vmem:[#allocation17_spill] sm:$0xff]  ;;  %v12006_v62 = vld [vmem:[#allocation206_spill] sm:$0xff] }
 0x210   : > { %6324 = vmatprep.subr.bf16.mxu0 %v6323_v41  ;;  %v12010_v8 = vld [vmem:[#allocation210_spill] sm:$0xff]  ;;  %v12012_v41 = vld [vmem:[#allocation244_spill] sm:$0xff] }
 0x212   : > { %5746 = vmatpush1.bf16.msra.mxu1 %v5745_v55  ;;  %4376 = vmatmul.mubr.f32.vlgmr.msra.gmra.mrb[0].mxu0 %v11996_v58  ;;  %v12011_v55 = vld [vmem:[#allocation24_spill] sm:$0xff]  ;;  %v12035_v58 = vld [vmem:[#allocation258_spill] sm:$0xff] }
 0x213   : > { %5748 = vmatprep.subr.bf16.mxu1 %v11995_v53  ;;  %6326 = vmatpush1.bf16.msra.mxu0 %v6325_v22  ;;  %v12013_v22 = vld [vmem:[#allocation243_spill] sm:$0xff]  ;;  %v12015_v53 = vld [vmem:[#allocation214_spill] sm:$0xff] }
 0x214   : > { %6328 = vmatprep.subr.bf16.mxu0 %v6327_v4  ;;  %4382 = vmatprep.mubr.f32.mxu0 %v12005_v35  ;;  %v12014_v4 = vpack.c.bf16 %v12012_v41, %v12013_v22 }
 0x215   : > { %2135 = vmatmul.mubr.f32.vlgmr.msra.gmra.mrb[0].mxu1 %v11997_v21 }
 0x216   : > { %5750 = vmatpush1.bf16.msra.mxu1 %v12000_v44  ;;  %2141 = vmatprep.mubr.f32.mxu1 %v12004_v14  ;;  %v12017_v44 = vld [vmem:[#allocation247_spill] sm:$0xff] }
 0x217   : > { %5752 = vmatprep.subr.bf16.mxu1 %v12003_v45  ;;  %6330 = vmatpush1.bf16.msra.mxu0 %v6329_v32  ;;  %v12016_v32 = vld [vmem:[#allocation40_spill] sm:$0xff]  ;;  %v12018_v45 = vld [vmem:[#allocation246_spill] sm:$0xff] }
 0x218   : > { %6332 = vmatprep.subr.bf16.mxu0 %v6331_v46  ;;  %4384 = vmatmul.mubr.f32.gmra.mrb[2].mxu0 %v12009_v5  ;;  %v12020_v46 = vld [vmem:[#allocation46_spill] sm:$0xff]  ;;  %v12032_v5 = vld [vmem:[#allocation253_spill] sm:$0xff] }
 0x219   : > { %2143 = vmatmul.mubr.f32.gmra.mrb[2].mxu1 %v12006_v62  ;;  %4390 = vmatprep.mubr.f32.mxu0 %v12011_v55  ;;  %v12026_v55 = vld [vmem:[#allocation53_spill] sm:$0xff] }
 0x21a   : > { %5754 = vmatpush1.bf16.msra.mxu1 %v12007_v2  ;;  %2149 = vmatprep.mubr.f32.mxu1 %v12010_v8  ;;  %v12019_v2 = vpack.c.bf16 %v12017_v44, %v12018_v45 }
 0x21b   : > { %5756 = vmatprep.subr.bf16.mxu1 %v12008_v31  ;;  %6334 = vmatpush1.bf16.msra.mxu0 %v12014_v4  ;;  %v12021_v31 = vld [vmem:[#allocation47_spill] sm:$0xff]  ;;  %v12025_v4 = vld [vmem:[#allocation222_spill] sm:$0xff] }
 0x21c   : > { %6336 = vmatprep.subr.bf16.mxu0 %v12019_v2  ;;  %4392 = vmatmul.mubr.f32.gmra.mrb[4].mxu0 %v12021_v31  ;;  %v12028_v2 = vld [vmem:[#allocation58_spill] sm:$0xff]  ;;  %v12030_v31 = vld [vmem:[#allocation241_spill] sm:$0xff] }
 0x21d   : > { %2151 = vmatmul.mubr.f32.gmra.mrb[4].mxu1 %v12015_v53  ;;  %4398 = vmatprep.mubr.f32.mxu0 %v12023_v59  ;;  %v12031_v59 = vld [vmem:[#allocation255_spill] sm:$0xff] }
 0x21e   : > { %5758 = vmatpush1.bf16.msra.mxu1 %v12016_v32  ;;  %2157 = vmatprep.mubr.f32.mxu1 %v12022_v37  ;;  %v12027_v32 = vpack.c.bf16 %v8747_v23, %v8740_v9  ;;  %v12033_v35 = vpack.c.bf16 %v12031_v59, %v12032_v5  ;;  %v12038_v23 = vld [vmem:[#allocation70_spill] sm:$0xff] }
 0x21f   : > { %5760 = vmatprep.subr.bf16.mxu1 %v12020_v46  ;;  %6338 = vmatpush1.bf16.msra.mxu0 %v12024_v39  ;;  %v12029_v46 = vld [vmem:[#allocation323_spill] sm:$0xff]  ;;  %v12034_v39 = vld [vmem:[#allocation64_spill] sm:$0xff]  ;;  %v12044_v59 = vld [vmem:[#allocation82_spill] sm:$0xff] }
 0x220   : > { %6340 = vmatprep.subr.bf16.mxu0 %v12027_v32  ;;  %4400 = vmatmul.mubr.f32.gmra.mrb[6].mxu0 %v12029_v46  ;;  %v12039_v32 = vld [vmem:[#allocation260_spill] sm:$0xff] }
 0x221   : > { %2159 = vmatmul.mubr.f32.gmra.mrb[6].mxu1 %v12025_v4  ;;  %4600 = vmatprep.mubr.f32.mxu0 %v12030_v31  ;;  %v12041_v46 = vld [vmem:[#allocation76_spill] sm:$0xff] }
 0x222   : > { %5762 = vmatpush1.bf16.msra.mxu1 %v12026_v55  ;;  %2294 = vmatprep.mubr.f32.mxu1 %v11884_v19  ;;  %v12036_v55 = vld [vmem:[#allocation257_spill] sm:$0xff]  ;;  %v12042_v19 = vld [vmem:[#allocation263_spill] sm:$0xff] }
 0x223   : > { %5764 = vmatprep.subr.bf16.mxu1 %v12028_v2  ;;  %6342 = vmatpush1.bf16.msra.mxu0 %v12033_v35  ;;  %v12037_v13 = vpack.c.bf16 %v12035_v58, %v12036_v55  ;;  %v12040_v2 = vpack.c.bf16 %v11785_v43, %v12039_v32  ;;  %v12043_v9 = vpack.c.bf16 %v11841_v3, %v12042_v19  ;;  %v12045_v35 = vld [vmem:[#allocation267_spill] sm:$0xff]  ;;  %v12048_v58 = vld [vmem:[#allocation88_spill] sm:$0xff]  ;;  %v12052_v43 = vld [vmem:[#allocation94_spill] sm:$0xff] }
 0x224   : > { %v12056_v3 = vld [vmem:[#allocation100_spill] sm:$0xff] }
 0x225   : > { %6344 = vmatprep.subr.bf16.mxu0 %v12037_v13  ;;  %v12049_v13 = vld [vmem:[#allocation270_spill] sm:$0xff] }
 0x226   : > { %5766 = vmatpush1.bf16.msra.mxu1 %v12034_v39  ;;  %v12046_v39 = vld [vmem:[#allocation266_spill] sm:$0xff] }
 0x227   : > { %5768 = vmatprep.subr.bf16.mxu1 %v12038_v23  ;;  %6346 = vmatpush1.bf16.msra.mxu0 %v12040_v2  ;;  %v12047_v5 = vpack.c.bf16 %v12045_v35, %v12046_v39  ;;  %v12050_v23 = vld [vmem:[#allocation269_spill] sm:$0xff]  ;;  %v12059_v35 = vld [vmem:[#allocation106_spill] sm:$0xff] }
 0x228   : > { %6348 = vmatprep.subr.bf16.mxu0 %v12043_v9  ;;  %v12051_v55 = vpack.c.bf16 %v12049_v13, %v12050_v23  ;;  %v12053_v2 = vld [vmem:[#allocation273_spill] sm:$0xff]  ;;  %v12057_v9 = vld [vmem:[#allocation274_spill] sm:$0xff]  ;;  %v12062_v13 = vld [vmem:[#allocation112_spill] sm:$0xff] }
 0x22a   : > { %5770 = vmatpush1.bf16.msra.mxu1 %v12041_v46  ;;  %v12054_v46 = vld [vmem:[#allocation272_spill] sm:$0xff] }
 0x22b   : > { %5772 = vmatprep.subr.bf16.mxu1 %v12044_v59  ;;  %6350 = vmatpush1.bf16.msra.mxu0 %v12047_v5  ;;  %v12055_v32 = vpack.c.bf16 %v12053_v2, %v12054_v46  ;;  %v12058_v59 = vpack.c.bf16 %v11869_v24, %v12057_v9  ;;  %v12066_v2 = vld [vmem:[#allocation118_spill] sm:$0xff] }
 0x22c   : > { %6352 = vmatprep.subr.bf16.mxu0 %v12051_v55  ;;  %v12063_v55 = vld [vmem:[#allocation282_spill] sm:$0xff] }
 0x22e   : > { %5774 = vmatpush1.bf16.msra.mxu1 %v12048_v58  ;;  %v12060_v58 = vld [vmem:[#allocation278_spill] sm:$0xff] }
 0x22f   : > { %5776 = vmatprep.subr.bf16.mxu1 %v12052_v43  ;;  %6354 = vmatpush1.bf16.msra.mxu0 %v12055_v32  ;;  %v12061_v5 = vpack.c.bf16 %v11877_v33, %v12060_v58  ;;  %v12064_v43 = vld [vmem:[#allocation281_spill] sm:$0xff]  ;;  %v12068_v32 = vld [vmem:[#allocation124_spill] sm:$0xff] }
 0x230   : > { %6356 = vmatprep.subr.bf16.mxu0 %v12058_v59  ;;  %v12065_v23 = vpack.c.bf16 %v12063_v55, %v12064_v43  ;;  %v12070_v59 = vld [vmem:[#allocation130_spill] sm:$0xff] }
 0x232   : > { %5778 = vmatpush1.bf16.msra.mxu1 %v12056_v3  ;;  %v12067_v3 = vpack.c.bf16 %v11903_v26, %v11902_v63 }
 0x233   : > { %5780 = vmatprep.subr.bf16.mxu1 %v12059_v35  ;;  %6358 = vmatpush1.bf16.msra.mxu0 %v12061_v5  ;;  %v12069_v35 = vpack.c.bf16 %v11909_v36, %v11908_v30  ;;  %v12072_v5 = vld [vmem:[#allocation136_spill] sm:$0xff] }
 0x234   : > { %6360 = vmatprep.subr.bf16.mxu0 %v12065_v23  ;;  %v12073_v23 = vpack.c.bf16 %v11808_v60, %v11807_v1 }
 0x236   : > { %5782 = vmatpush1.bf16.msra.mxu1 %v12062_v13  ;;  %v12071_v13 = vpack.c.bf16 %v8884_v18, %v11806_v17 }
 0x237   : > { %5784 = vmatprep.subr.bf16.mxu1 %v12066_v2  ;;  %6362 = vmatpush1.bf16.msra.mxu0 %v12067_v3  ;;  %v12074_v2 = vld [vmem:[#allocation142_spill] sm:$0xff]  ;;  %v12075_v3 = vpack.c.bf16 %v8901_v50, %v8899_v7 }
 0x238   : > { %6364 = vmatprep.subr.bf16.mxu0 %v12069_v35  ;;  %v12077_v35 = vpack.c.bf16 %v11811_v48, %v11810_v51  ;;  %v12084_v50 = vld [vmem:[#allocation166_spill] sm:$0xff]  ;;  %v12184_v48 = vld [vmem:[#allocation187_spill] sm:$0xff] }
 0x23a   : > { %5786 = vmatpush1.bf16.msra.mxu1 %v12068_v32  ;;  %v12076_v32 = vld [vmem:[#allocation148_spill] sm:$0xff] }
 0x23b   : > { %5788 = vmatprep.subr.bf16.mxu1 %v12070_v59  ;;  %6366 = vmatpush1.bf16.msra.mxu0 %v12071_v13  ;;  %v12078_v59 = vld [vmem:[#allocation154_spill] sm:$0xff]  ;;  %v12079_v13 = vpack.c.bf16 %v11813_v15, %v11812_v6 }
 0x23c   : > { %6368 = vmatprep.subr.bf16.mxu0 %v12073_v23  ;;  %v12081_v23 = vld [vmem:[#allocation305_spill] sm:$0xff] }
 0x23e   : > { %5790 = vmatpush1.bf16.msra.mxu1 %v12072_v5  ;;  %v12080_v5 = vld [vmem:[#allocation160_spill] sm:$0xff] }
 0x23f   : > { %5792 = vmatprep.subr.bf16.mxu1 %v12074_v2  ;;  %6370 = vmatpush1.bf16.msra.mxu0 %v12075_v3  ;;  %v12082_v2 = vld [vmem:[#allocation304_spill] sm:$0xff]  ;;  %v12085_v3 = vpack.c.bf16 %v11942_v47, %v11816_v40 }
 0x240   : > { %6372 = vmatprep.subr.bf16.mxu0 %v12077_v35  ;;  %v12083_v60 = vpack.c.bf16 %v12081_v23, %v12082_v2  ;;  %v12087_v35 = vpack.c.bf16 %v8949_v52, %v8947_v49  ;;  %v12170_v49 = vld [vmem:[#allocation175_spill] sm:$0xff]  ;;  %v12181_v2 = vld [vmem:[#allocation314_spill] sm:$0xff] }
 0x242   : > { %5794 = vmatpush1.bf16.msra.mxu1 %v12076_v32  ;;  %v12086_v32 = vld [vmem:[#allocation172_spill] sm:$0xff] }
 0x243   : > { %5796 = vmatprep.subr.bf16.mxu1 %v12078_v59  ;;  %6374 = vmatpush1.bf16.msra.mxu0 %v12079_v13  ;;  %v12088_v59 = vld [vmem:[#allocation178_spill] sm:$0xff]  ;;  %v12089_v13 = vpack.c.bf16 %v8960_v56, %v8952_v11  ;;  %v12097_v56 = vld [vmem:[#allocation316_spill] sm:$0xff] }
 0x244   : > { %6376 = vmatprep.subr.bf16.mxu0 %v12083_v60  ;;  %v12092_v60 = vld [vmem:[#allocation190_spill] sm:$0xff] }
 0x245   : > { %v12168_v11 = vld [vmem:[#allocation26_spill] sm:$0xff] }
 0x246   : > { %5798 = vmatpush1.bf16.msra.mxu1 %v12080_v5  ;;  %v12090_v5 = vld [vmem:[#allocation184_spill] sm:$0xff] }
 0x247   : > { %5800 = vmatprep.subr.bf16.mxu1 %v12084_v50  ;;  %6378 = vmatpush1.bf16.msra.mxu0 %v12085_v3  ;;  %v12091_v50 = vpack.c.bf16 %v8982_v27, %v8980_v20  ;;  %v12093_v3 = vpack.c.bf16 %v9004_v29, %v9002_v28  ;;  %v12111_v29 = vld [vmem:[#allocation242_spill] sm:$0xff]  ;;  %v12161_v28 = vld [vmem:[#allocation15_spill] sm:$0xff]  ;;  %v12166_v20 = vld [vmem:[#allocation21_spill] sm:$0xff] }
 0x248   : > { %6380 = vmatprep.subr.bf16.mxu0 %v12087_v35  ;;  %v12095_v35 = vld [vmem:[#allocation8_spill] sm:$0xff]  ;;  %v12163_v27 = vld [vmem:[#allocation306_spill] sm:$0xff] }
 0x24a   : > { %5802 = vmatpush1.bf16.msra.mxu1 %v12086_v32  ;;  %v12094_v32 = vld [vmem:[#allocation196_spill] sm:$0xff] }
 0x24b   : > { %5804 = vmatprep.subr.bf16.mxu1 %v12088_v59  ;;  %6382 = vmatpush1.bf16.msra.mxu0 %v12089_v13  ;;  %v12096_v59 = vld [vmem:[#allocation14_spill] sm:$0xff]  ;;  %v12098_v13 = vld [vmem:[#allocation228_spill] sm:$0xff] }
 0x24c   : > { %6384 = vmatprep.subr.bf16.mxu0 %v12091_v50  ;;  %v12100_v50 = vld [vmem:[#allocation232_spill] sm:$0xff] }
 0x24e   : > { %5806 = vmatpush1.bf16.msra.mxu1 %v12090_v5  ;;  %v12099_v5 = vld [vmem:[#allocation19_spill] sm:$0xff] }
 0x24f   : > { %5808 = vmatprep.subr.bf16.mxu1 %v12092_v60  ;;  %6386 = vmatpush1.bf16.msra.mxu0 %v12093_v3  ;;  %v12101_v60 = vld [vmem:[#allocation25_spill] sm:$0xff]  ;;  %v12102_v3 = vld [vmem:[#allocation18_spill] sm:$0xff] }
 0x250   : > { %6388 = vmatprep.subr.bf16.mxu0 %v12095_v35  ;;  %v12105_v35 = vld [vmem:[#allocation238_spill] sm:$0xff] }
 0x252   : > { %5810 = vmatpush1.bf16.msra.mxu1 %v12094_v32  ;;  %4603 = vmatmul.mubr.f32.vlgmr.msra.gmra.mrb[0].mxu0 %v12097_v56  ;;  %v12103_v32 = vld [vmem:[#allocation236_spill] sm:$0xff] }
 0x253   : > { %5812 = vmatprep.subr.bf16.mxu1 %v12096_v59  ;;  %6390 = vmatpush1.bf16.msra.mxu0 %v12098_v13  ;;  %v12104_v59 = vld [vmem:[#allocation32_spill] sm:$0xff]  ;;  %v12107_v13 = vld [vmem:[#allocation41_spill] sm:$0xff] }
 0x254   : > { %6392 = vmatprep.subr.bf16.mxu0 %v12100_v50  ;;  %4610 = vmatprep.mubr.f32.mxu0 %v12102_v3 }
 0x255   : > { %2296 = vmatmul.mubr.f32.vlgmr.msra.gmra.mrb[0].mxu1 %v11997_v21  ;;  %v12106_v21 = vld [vmem:[#allocation37_spill] sm:$0xff] }
 0x256   : > { %5814 = vmatpush1.bf16.msra.mxu1 %v12099_v5  ;;  %2302 = vmatprep.mubr.f32.mxu1 %v12004_v14  ;;  %v12108_v5 = vld [vmem:[#allocation9_spill] sm:$0xff]  ;;  %v12110_v14 = vld [vmem:[#allocation42_spill] sm:$0xff] }
 0x257   : > { %5816 = vmatprep.subr.bf16.mxu1 %v12101_v60  ;;  %6394 = vmatpush1.bf16.msra.mxu0 %v12103_v32  ;;  %v12109_v50 = vand.u32 4294901760, %v12108_v5  ;;  %v12116_v32 = vld [vmem:[#allocation60_spill] sm:$0xff] }
 0x258   : > { %6396 = vmatprep.subr.bf16.mxu0 %v12105_v35  ;;  %4613 = vmatmul.mubr.f32.gmra.mrb[2].mxu0 %v12107_v13  ;;  %v12114_v35 = vld [vmem:[#allocation49_spill] sm:$0xff] }
 0x259   : > { %2304 = vmatmul.mubr.f32.gmra.mrb[2].mxu1 %v12006_v62  ;;  %v2457_v60 = vsub.f32 %v12108_v5, %v12109_v50  ;;  %4620 = vmatprep.mubr.f32.mxu0 %v12110_v14  ;;  %v12112_v62 = vld [vmem:[#allocation43_spill] sm:$0xff] }
 0x25a   : > { %5818 = vmatpush1.bf16.msra.mxu1 %v12104_v59  ;;  %2310 = vmatprep.mubr.f32.mxu1 %v12010_v8  ;;  %v12113_v59 = vld [vmem:[#allocation245_spill] sm:$0xff]  ;;  %v12117_v8 = vld [vmem:[#allocation248_spill] sm:$0xff]  ;;  %v12118_v5 = vld [vmem:[#allocation55_spill] sm:$0xff] }
 0x25b   : > { %5820 = vmatprep.subr.bf16.mxu1 %v12106_v21  ;;  %6398 = vmatpush1.bf16.msra.mxu0 %v12111_v29  ;;  %v12115_v21 = vld [vmem:[#allocation59_spill] sm:$0xff]  ;;  %v2458_v50 = vand.u32 4294901760, %v2457_v60  ;;  %v12125_v60 = vld [vmem:[#allocation256_spill] sm:$0xff] }
 0x25c   : > { %6400 = vmatprep.subr.bf16.mxu0 %v12113_v59  ;;  %4623 = vmatmul.mubr.f32.gmra.mrb[4].mxu0 %v12115_v21  ;;  %v12121_v59 = vld [vmem:[#allocation290_spill] sm:$0xff]  ;;  %v12124_v29 = vld [vmem:[#allocation67_spill] sm:$0xff] }
 0x25d   : > { %2312 = vmatmul.mubr.f32.gmra.mrb[4].mxu1 %v12015_v53  ;;  %4630 = vmatprep.mubr.f32.mxu0 %v12116_v32  ;;  %v12119_v53 = vld [vmem:[#allocation250_spill] sm:$0xff] }
 0x25e   : > { %5822 = vmatpush1.bf16.msra.mxu1 %v12112_v62  ;;  %2318 = vmatprep.mubr.f32.mxu1 %v12022_v37  ;;  %v12120_v62 = vld [vmem:[#allocation62_spill] sm:$0xff] }
 0x25f   : > { %5824 = vmatprep.subr.bf16.mxu1 %v12114_v35  ;;  %6402 = vmatpush1.bf16.msra.mxu0 %v12117_v8  ;;  %v12122_v35 = vand.u32 4294901760, %v12030_v31  ;;  %v12123_v37 = vld [vmem:[#allocation254_spill] sm:$0xff]  ;;  %v12132_v31 = vld [vmem:[#allocation91_spill] sm:$0xff] }
 0x260   : > { %6404 = vmatprep.subr.bf16.mxu0 %v12119_v53  ;;  %4633 = vmatmul.mubr.f32.gmra.mrb[6].mxu0 %v12121_v59  ;;  %v12126_v8 = vld [vmem:[#allocation74_spill] sm:$0xff] }
 0x261   : > { %2320 = vmatmul.mubr.f32.gmra.mrb[6].mxu1 %v12025_v4  ;;  %4770 = vmatprep.mubr.f32.mxu0 %v12122_v35  ;;  %v12127_v4 = vld [vmem:[#allocation259_spill] sm:$0xff]  ;;  %v12129_v53 = vld [vmem:[#allocation262_spill] sm:$0xff]  ;;  %v12133_v35 = vld [vmem:[#allocation268_spill] sm:$0xff] }
 0x262   : > { %5826 = vmatpush1.bf16.msra.mxu1 %v12118_v5  ;;  %2459 = vmatprep.mubr.f32.mxu1 %v2458_v50  ;;  %v12128_v5 = vld [vmem:[#allocation79_spill] sm:$0xff]  ;;  %v12131_v50 = vld [vmem:[#allocation265_spill] sm:$0xff] }
 0x263   : > { %5828 = vmatprep.subr.bf16.mxu1 %v12120_v62  ;;  %6406 = vmatpush1.bf16.msra.mxu0 %v12123_v37  ;;  %v12130_v62 = vld [vmem:[#allocation86_spill] sm:$0xff] }
 0x264   : > { %6408 = vmatprep.subr.bf16.mxu0 %v12125_v60  ;;  %v12134_v37 = vld [vmem:[#allocation98_spill] sm:$0xff]  ;;  %v12136_v60 = vld [vmem:[#allocation103_spill] sm:$0xff] }
 0x266   : > { %5830 = vmatpush1.bf16.msra.mxu1 %v12124_v29  ;;  %v12135_v29 = vld [vmem:[#allocation271_spill] sm:$0xff] }
 0x267   : > { %5832 = vmatprep.subr.bf16.mxu1 %v12126_v8  ;;  %6410 = vmatpush1.bf16.msra.mxu0 %v12127_v4  ;;  %v12137_v8 = vld [vmem:[#allocation275_spill] sm:$0xff]  ;;  %v12138_v4 = vld [vmem:[#allocation110_spill] sm:$0xff] }
 0x268   : > { %6412 = vmatprep.subr.bf16.mxu0 %v12129_v53  ;;  %v12140_v53 = vld [vmem:[#allocation115_spill] sm:$0xff] }
 0x26a   : > { %5834 = vmatpush1.bf16.msra.mxu1 %v12128_v5  ;;  %v12139_v5 = vld [vmem:[#allocation277_spill] sm:$0xff] }
 0x26b   : > { %5836 = vmatprep.subr.bf16.mxu1 %v12130_v62  ;;  %6414 = vmatpush1.bf16.msra.mxu0 %v12131_v50  ;;  %v12141_v62 = vld [vmem:[#allocation280_spill] sm:$0xff]  ;;  %v12142_v50 = vld [vmem:[#allocation122_spill] sm:$0xff] }
 0x26c   : > { %6416 = vmatprep.subr.bf16.mxu0 %v12133_v35  ;;  %v12144_v35 = vld [vmem:[#allocation127_spill] sm:$0xff] }
 0x26e   : > { %5838 = vmatpush1.bf16.msra.mxu1 %v12132_v31  ;;  %v12143_v31 = vld [vmem:[#allocation283_spill] sm:$0xff] }
 0x26f   : > { %5840 = vmatprep.subr.bf16.mxu1 %v12134_v37  ;;  %6418 = vmatpush1.bf16.msra.mxu0 %v12135_v29  ;;  %v12145_v37 = vld [vmem:[#allocation286_spill] sm:$0xff] }
 0x270   : > { %6420 = vmatprep.subr.bf16.mxu0 %v12137_v8  ;;  %v12146_v29 = vld [vmem:[#allocation134_spill] sm:$0xff]  ;;  %v12148_v8 = vld [vmem:[#allocation139_spill] sm:$0xff] }
 0x272   : > { %5842 = vmatpush1.bf16.msra.mxu1 %v12136_v60  ;;  %v12147_v60 = vld [vmem:[#allocation289_spill] sm:$0xff] }
 0x273   : > { %5844 = vmatprep.subr.bf16.mxu1 %v12138_v4  ;;  %6422 = vmatpush1.bf16.msra.mxu0 %v12139_v5  ;;  %v12149_v4 = vld [vmem:[#allocation291_spill] sm:$0xff]  ;;  %v12150_v5 = vld [vmem:[#allocation146_spill] sm:$0xff] }
 0x274   : > { %6424 = vmatprep.subr.bf16.mxu0 %v12141_v62  ;;  %v12152_v62 = vld [vmem:[#allocation151_spill] sm:$0xff] }
 0x276   : > { %5846 = vmatpush1.bf16.msra.mxu1 %v12140_v53  ;;  %v12151_v53 = vld [vmem:[#allocation294_spill] sm:$0xff] }
 0x277   : > { %5848 = vmatprep.subr.bf16.mxu1 %v12142_v50  ;;  %6426 = vmatpush1.bf16.msra.mxu0 %v12143_v31  ;;  %v12153_v50 = vld [vmem:[#allocation297_spill] sm:$0xff]  ;;  %v12154_v31 = vld [vmem:[#allocation158_spill] sm:$0xff] }
 0x278   : > { %6428 = vmatprep.subr.bf16.mxu0 %v12145_v37  ;;  %v12156_v37 = vld [vmem:[#allocation163_spill] sm:$0xff] }
 0x27a   : > { %5850 = vmatpush1.bf16.msra.mxu1 %v12144_v35  ;;  %v12155_v35 = vld [vmem:[#allocation300_spill] sm:$0xff] }
 0x27b   : > { %5852 = vmatprep.subr.bf16.mxu1 %v12146_v29  ;;  %6430 = vmatpush1.bf16.msra.mxu0 %v12147_v60  ;;  %v12157_v29 = vld [vmem:[#allocation303_spill] sm:$0xff]  ;;  %v12158_v60 = vld [vmem:[#allocation170_spill] sm:$0xff] }
 0x27c   : > { %6432 = vmatprep.subr.bf16.mxu0 %v12149_v4 }
 0x27e   : > { %5854 = vmatpush1.bf16.msra.mxu1 %v12148_v8  ;;  %v12159_v8 = vld [vmem:[#allocation13_spill] sm:$0xff] }
 0x27f   : > { %5856 = vmatprep.subr.bf16.mxu1 %v12150_v5  ;;  %6434 = vmatpush1.bf16.msra.mxu0 %v12151_v53  ;;  %v12160_v4 = vand.u32 4294901760, %v12159_v8  ;;  %v12162_v53 = vand.u32 4294901760, %v12161_v28 }
 0x280   : > { %6436 = vmatprep.subr.bf16.mxu0 %v12153_v50  ;;  %v12164_v50 = vld [vmem:[#allocation20_spill] sm:$0xff] }
 0x281   : > { %v2522_v5 = vsub.f32 %v12159_v8, %v12160_v4  ;;  %v12171_v4 = vld [vmem:[#allocation310_spill] sm:$0xff]  ;;  %v12172_v8 = vld [vmem:[#allocation27_spill] sm:$0xff] }
 0x282   : > { %5858 = vmatpush1.bf16.msra.mxu1 %v12152_v62  ;;  %v2534_v62 = vsub.f32 %v12161_v28, %v12162_v53  ;;  %v12173_v53 = vand.u32 4294901760, %v12172_v8  ;;  %v12174_v28 = vld [vmem:[#allocation31_spill] sm:$0xff] }
 0x283   : > { %5860 = vmatprep.subr.bf16.mxu1 %v12154_v31  ;;  %6438 = vmatpush1.bf16.msra.mxu0 %v12155_v35  ;;  %v12165_v31 = vand.u32 4294901760, %v12164_v50  ;;  %v12175_v47 = vand.u32 4294901760, %v12174_v28  ;;  %v2523_v23 = vand.u32 4294901760, %v2522_v5 }
 0x284   : > { %6440 = vmatprep.subr.bf16.mxu0 %v12157_v29 }
 0x285   : > { %v2528_v35 = vsub.f32 %v12164_v50, %v12165_v31  ;;  %v2552_v31 = vsub.f32 %v12174_v28, %v12175_v47  ;;  %v12176_v50 = vld [vmem:[#allocation33_spill] sm:$0xff] }
 0x286   : > { %5862 = vmatpush1.bf16.msra.mxu1 %v12156_v37  ;;  %v12167_v37 = vand.u32 4294901760, %v12166_v20  ;;  %v12177_v40 = vand.u32 4294901760, %v12176_v50 }
 0x287   : > { %5864 = vmatprep.subr.bf16.mxu1 %v12158_v60  ;;  %6442 = vmatpush1.bf16.msra.mxu0 %v12163_v27  ;;  %v12169_v60 = vand.u32 4294901760, %v12168_v11  ;;  %v2558_v27 = vsub.f32 %v12172_v8, %v12173_v53  ;;  %v12182_v53 = vand.u32 4294901760, %v11989_v42  ;;  %v12183_v8 = vand.u32 4294901760, %v11990_v0 }
 0x288   : > { %v2540_v29 = vsub.f32 %v12166_v20, %v12167_v37  ;;  %6444 = vmatprep.subr.bf16.mxu0 %v12171_v4  ;;  %v2564_v37 = vsub.f32 %v12176_v50, %v12177_v40  ;;  %v12178_v20 = vld [vmem:[#allocation182_spill] sm:$0xff]  ;;  %v2529_v47 = vand.u32 4294901760, %v2528_v35  ;;  %v12185_v40 = vld [vmem:[#allocation317_spill] sm:$0xff]  ;;  %v2553_v5 = vand.u32 4294901760, %v2552_v31 }
 0x289   : > { %v2546_v52 = vsub.f32 %v12168_v11, %v12169_v60  ;;  %v2535_v60 = vand.u32 4294901760, %v2534_v62  ;;  %v12179_v11 = vld [vmem:[#allocation11_spill] sm:$0xff]  ;;  %v6451_v15 = vpack.c.bf16 %v12183_v8, %v12182_v53  ;;  %v12186_v50 = vld [vmem:[#allocation38_spill] sm:$0xff]  ;;  %v12193_v53 = vld [vmem:[#allocation44_spill] sm:$0xff] }
 0x28a   : > { %5866 = vmatpush1.bf16.msra.mxu1 %v12170_v49  ;;  %v12180_v49 = vand.u32 4294901760, %v12179_v11  ;;  %v2541_v28 = vand.u32 4294901760, %v2540_v29  ;;  %v2565_v62 = vand.u32 4294901760, %v2564_v37  ;;  %v12187_v51 = vand.u32 4294901760, %v12186_v50  ;;  %v12191_v29 = vld [vmem:[#allocation205_spill] sm:$0xff]  ;;  %v12195_v37 = vld [vmem:[#allocation320_spill] sm:$0xff] }
 0x28b   : > { %5868 = vmatprep.subr.bf16.mxu1 %v12178_v20  ;;  %6446 = vmatpush1.bf16.msra.mxu0 %v12181_v2  ;;  %v2547_v6 = vand.u32 4294901760, %v2546_v52  ;;  %v2559_v20 = vand.u32 4294901760, %v2558_v27  ;;  %v5875_v42 = vpack.c.bf16 %v2535_v60, %v2523_v23  ;;  %v12189_v2 = vld [vmem:[#allocation39_spill] sm:$0xff]  ;;  %v12192_v52 = vand.u32 4294901760, %v12191_v29  ;;  %v12198_v60 = vld [vmem:[#allocation45_spill] sm:$0xff] }
 0x28c   : > { %v2463_v4 = vsub.f32 %v12179_v11, %v12180_v49  ;;  %6448 = vmatprep.subr.bf16.mxu0 %v12185_v40  ;;  %v2570_v49 = vsub.f32 %v12186_v50, %v12187_v51  ;;  %v12188_v11 = vld [vmem:[#allocation194_spill] sm:$0xff]  ;;  %v12190_v0 = vand.u32 4294901760, %v12189_v2  ;;  %v12194_v27 = vand.u32 4294901760, %v12193_v53 }
 0x28d   : > { %v5877_v40 = vpack.c.bf16 %v2541_v28, %v2529_v47  ;;  %v12196_v51 = vand.u32 4294901760, %v11991_v54  ;;  %v12199_v50 = vand.u32 4294901760, %v12198_v60  ;;  %v12204_v28 = vand.u32 4294901760, %v11994_v12 }
 0x28e   : > { %5870 = vmatpush1.bf16.msra.mxu1 %v12184_v48  ;;  %v2582_v35 = vsub.f32 %v12189_v2, %v12190_v0  ;;  %v2473_v48 = vsub.f32 %v12191_v29, %v12192_v52  ;;  %v2464_v8 = vand.u32 4294901760, %v2463_v4  ;;  %v2576_v31 = vsub.f32 %v12193_v53, %v12194_v27  ;;  %v12200_v2 = vld [vmem:[#allocation209_spill] sm:$0xff]  ;;  %v12202_v52 = vld [vmem:[#allocation199_spill] sm:$0xff] }
 0x28f   : > { %5872 = vmatprep.subr.bf16.mxu1 %v12188_v11  ;;  %6450 = vmatpush1.bf16.msra.mxu0 %v12195_v37  ;;  %v12197_v11 = vand.u32 4294901760, %v11992_v61  ;;  %v2588_v0 = vsub.f32 %v12198_v60, %v12199_v50  ;;  %v12201_v7 = vand.u32 4294901760, %v12200_v2  ;;  %v5879_v27 = vpack.c.bf16 %v2559_v20, %v2547_v6  ;;  %v12207_v60 = vld [vmem:[#allocation51_spill] sm:$0xff] }
 0x290   : > { %6452 = vmatprep.subr.bf16.mxu0 %v6451_v15  ;;  %v12203_v29 = vand.u32 4294901760, %v11993_v16  ;;  %v5881_v47 = vpack.c.bf16 %v2565_v62, %v2553_v5  ;;  %v2571_v61 = vand.u32 4294901760, %v2570_v49  ;;  %v12208_v53 = vand.u32 4294901760, %v12207_v60 }
 0x291   : > { %v6453_v23 = vpack.c.bf16 %v12197_v11, %v12196_v51  ;;  %v2479_v4 = vsub.f32 %v12200_v2, %v12201_v7  ;;  %v2583_v51 = vand.u32 4294901760, %v2582_v35  ;;  %v12205_v11 = vld [vmem:[#allocation50_spill] sm:$0xff]  ;;  %v12209_v15 = vand.u32 4294901760, %v12097_v56  ;;  %v12216_v56 = vld [vmem:[#allocation56_spill] sm:$0xff] }
 0x292   : > { %5874 = vmatpush1.bf16.msra.mxu1 %v12202_v52  ;;  %v6455_v54 = vpack.c.bf16 %v12204_v28, %v12203_v29  ;;  %v12206_v37 = vand.u32 4294901760, %v12205_v11  ;;  %v2606_v7 = vsub.f32 %v12207_v60, %v12208_v53  ;;  %v2474_v52 = vand.u32 4294901760, %v2473_v48 }
 0x293   : > { %5876 = vmatprep.subr.bf16.mxu1 %v5875_v42  ;;  %4774 = vmatmul.mubr.f32.vlgmr.msra.gmra.mrb[0].mxu0 %v12209_v15  ;;  %v12210_v6 = vand.u32 4294901760, %v11998_v57  ;;  %v12211_v16 = vand.u32 4294901760, %v11999_v10  ;;  %v12212_v20 = vand.u32 4294901760, %v12001_v38  ;;  %v12213_v5 = vand.u32 4294901760, %v12002_v25  ;;  %v12214_v42 = vld [vmem:[#allocation213_spill] sm:$0xff] }
 0x294   : > { %v2594_v50 = vsub.f32 %v12205_v11, %v12206_v37  ;;  %v2577_v49 = vand.u32 4294901760, %v2576_v31  ;;  %v12215_v35 = vand.u32 4294901760, %v12214_v42  ;;  %6454 = vmatpush1.bf16.msra.mxu0 %v6453_v23  ;;  %v2589_v48 = vand.u32 4294901760, %v2588_v0  ;;  %v12218_v10 = vld [vmem:[#allocation217_spill] sm:$0xff]  ;;  %v12224_v23 = vld [vmem:[#allocation63_spill] sm:$0xff] }
 0x295   : > { %v6457_v12 = vpack.c.bf16 %v12211_v16, %v12210_v6  ;;  %v6459_v62 = vpack.c.bf16 %v12213_v5, %v12212_v20  ;;  %2465 = vmatmul.mubr.f32.vlgmr.msra.gmra.mrb[0].mxu1 %v2464_v8  ;;  %v12217_v53 = vand.u32 4294901760, %v12216_v56  ;;  %v2480_v37 = vand.u32 4294901760, %v2479_v4  ;;  %6456 = vmatprep.subr.bf16.mxu0 %v6455_v54  ;;  %v12220_v25 = vld [vmem:[#allocation57_spill] sm:$0xff] }
 0x296   : > { %v2489_v29 = vsub.f32 %v12214_v42, %v12215_v35  ;;  %v12219_v28 = vand.u32 4294901760, %v12218_v10  ;;  %5878 = vmatpush1.bf16.msra.mxu1 %v5877_v40  ;;  %v12221_v31 = vand.u32 4294901760, %v12220_v25  ;;  %v12222_v6 = vld [vmem:[#allocation61_spill] sm:$0xff]  ;;  %v12225_v0 = vand.u32 4294901760, %v12224_v23  ;;  %2475 = vmatprep.mubr.f32.mxu1 %v2474_v52 }
 0x297   : > { %v2600_v57 = vsub.f32 %v12216_v56, %v12217_v53  ;;  %v12223_v16 = vand.u32 4294901760, %v12222_v6  ;;  %5880 = vmatprep.subr.bf16.mxu1 %v5879_v27  ;;  %v5883_v4 = vpack.c.bf16 %v2583_v51, %v2571_v61  ;;  %v12226_v5 = vand.u32 4294901760, %v12013_v22  ;;  %v12230_v42 = vld [vmem:[#allocation69_spill] sm:$0xff] }
 0x298   : > { %v2495_v38 = vsub.f32 %v12218_v10, %v12219_v28  ;;  %v2612_v15 = vsub.f32 %v12220_v25, %v12221_v31  ;;  %v2630_v20 = vsub.f32 %v12224_v23, %v12225_v0  ;;  %v12227_v35 = vand.u32 4294901760, %v12012_v41  ;;  %v12228_v28 = vld [vmem:[#allocation68_spill] sm:$0xff]  ;;  %v12233_v61 = vld [vmem:[#allocation221_spill] sm:$0xff]  ;;  %6458 = vmatpush1.bf16.msra.mxu0 %v6457_v12 }
 0x299   : > { %v2618_v8 = vsub.f32 %v12222_v6, %v12223_v16  ;;  %v2595_v54 = vand.u32 4294901760, %v2594_v50  ;;  %v2607_v53 = vand.u32 4294901760, %v2606_v7  ;;  %v12229_v31 = vand.u32 4294901760, %v12228_v28  ;;  %2481 = vmatmul.mubr.f32.gmra.mrb[2].mxu1 %v2480_v37  ;;  %v12235_v52 = vld [vmem:[#allocation225_spill] sm:$0xff]  ;;  %6460 = vmatprep.subr.bf16.mxu0 %v6459_v62  ;;  %v12241_v37 = vld [vmem:[#allocation75_spill] sm:$0xff] }
 0x29a   : > { %v6461_v40 = vpack.c.bf16 %v12227_v35, %v12226_v5  ;;  %v12231_v16 = vand.u32 4294901760, %v12230_v42  ;;  %v12232_v0 = vand.u32 4294901760, %v12102_v3  ;;  %v2490_v27 = vand.u32 4294901760, %v2489_v29  ;;  %5882 = vmatpush1.bf16.msra.mxu1 %v5881_v47 }
 0x29b   : > { %v2624_v10 = vsub.f32 %v12228_v28, %v12229_v31  ;;  %v12234_v22 = vand.u32 4294901760, %v12233_v61  ;;  %v5885_v51 = vpack.c.bf16 %v2589_v48, %v2577_v49  ;;  %v2601_v50 = vand.u32 4294901760, %v2600_v57  ;;  %5884 = vmatprep.subr.bf16.mxu1 %v5883_v4  ;;  %v12239_v49 = vld [vmem:[#allocation73_spill] sm:$0xff] }
 0x29c   : > { %v2636_v2 = vsub.f32 %v12230_v42, %v12231_v16  ;;  %4782 = vmatprep.mubr.f32.mxu0 %v12232_v0  ;;  %v2496_v7 = vand.u32 4294901760, %v2495_v38  ;;  %v12236_v5 = vand.u32 4294901760, %v12235_v52  ;;  %v12237_v31 = vand.u32 4294901760, %v12018_v45  ;;  %2491 = vmatprep.mubr.f32.mxu1 %v2490_v27 }
 0x29d   : > { %v2505_v41 = vsub.f32 %v12233_v61, %v12234_v22  ;;  %v12238_v3 = vand.u32 4294901760, %v12017_v44  ;;  %v2613_v16 = vand.u32 4294901760, %v2612_v15  ;;  %v2619_v0 = vand.u32 4294901760, %v2618_v8  ;;  %6462 = vmatpush1.bf16.msra.mxu0 %v6461_v40  ;;  %v12252_v40 = vld [vmem:[#allocation251_spill] sm:$0xff]  ;;  %v12298_v61 = vld [vmem:[#allocation117_spill] sm:$0xff] }
 0x29e   : > { %v2511_v35 = vsub.f32 %v12235_v52, %v12236_v5  ;;  %v2631_v42 = vand.u32 4294901760, %v2630_v20  ;;  %v5887_v12 = vpack.c.bf16 %v2607_v53, %v2595_v54  ;;  %v12240_v48 = vand.u32 4294901760, %v12239_v49  ;;  %v12246_v20 = vld [vmem:[#allocation249_spill] sm:$0xff]  ;;  %v12248_v53 = vld [vmem:[#allocation80_spill] sm:$0xff]  ;;  %2497 = vmatmul.mubr.f32.gmra.mrb[4].mxu1 %v2496_v7 }
 0x29f   : > { %v6463_v29 = vpack.c.bf16 %v12238_v3, %v12237_v31  ;;  %v12242_v38 = vand.u32 4294901760, %v12241_v37  ;;  %v12243_v47 = vand.u32 4294901760, %v12107_v13  ;;  %v2625_v45 = vand.u32 4294901760, %v2624_v10  ;;  %v12250_v3 = vld [vmem:[#allocation81_spill] sm:$0xff]  ;;  %5886 = vmatpush1.bf16.msra.mxu1 %v5885_v51 }
 0x2a0   : > { %v2642_v57 = vsub.f32 %v12239_v49, %v12240_v48  ;;  %v2637_v62 = vand.u32 4294901760, %v2636_v2  ;;  %v12244_v44 = vand.u32 4294901760, %v12110_v14  ;;  %v2506_v15 = vand.u32 4294901760, %v2505_v41  ;;  %5888 = vmatprep.subr.bf16.mxu1 %v5887_v12 }
 0x2a1   : > { %v2654_v22 = vsub.f32 %v12241_v37, %v12242_v38  ;;  %4786 = vmatmul.mubr.f32.gmra.mrb[2].mxu0 %v12243_v47  ;;  %v12245_v8 = vand.u32 4294901760, %v8724_v34  ;;  %v12247_v4 = vand.u32 4294901760, %v12246_v20  ;;  %v12249_v5 = vand.u32 4294901760, %v12248_v53  ;;  %6464 = vmatprep.subr.bf16.mxu0 %v6463_v29  ;;  %v12254_v34 = vld [vmem:[#allocation252_spill] sm:$0xff]  ;;  %v12263_v29 = vld [vmem:[#allocation255_spill] sm:$0xff] }
 0x2a2   : > { %4794 = vmatprep.mubr.f32.mxu0 %v12244_v44  ;;  %v12251_v13 = vand.u32 4294901760, %v12250_v3  ;;  %v2512_v2 = vand.u32 4294901760, %v2511_v35  ;;  %v5889_v14 = vpack.c.bf16 %v2613_v16, %v2601_v50  ;;  %v5891_v27 = vpack.c.bf16 %v2631_v42, %v2619_v0  ;;  %v12261_v50 = vld [vmem:[#allocation253_spill] sm:$0xff]  ;;  %2507 = vmatprep.mubr.f32.mxu1 %v2506_v15 }
 0x2a3   : > { %v6465_v54 = vpack.c.bf16 %v12247_v4, %v12245_v8  ;;  %v2648_v31 = vsub.f32 %v12248_v53, %v12249_v5  ;;  %v12253_v41 = vand.u32 4294901760, %v12252_v40  ;;  %v12255_v48 = vand.u32 4294901760, %v12254_v34  ;;  %v12256_v8 = vld [vmem:[#allocation85_spill] sm:$0xff]  ;;  %v12258_v5 = vld [vmem:[#allocation87_spill] sm:$0xff]  ;;  %v12268_v40 = vld [vmem:[#allocation258_spill] sm:$0xff] }
 0x2a4   : > { %v2660_v10 = vsub.f32 %v12250_v3, %v12251_v13  ;;  %v2643_v47 = vand.u32 4294901760, %v2642_v57  ;;  %v2655_v44 = vand.u32 4294901760, %v2654_v22  ;;  %v12257_v20 = vand.u32 4294901760, %v12256_v8  ;;  %v12266_v57 = vld [vmem:[#allocation257_spill] sm:$0xff]  ;;  %2513 = vmatmul.mubr.f32.gmra.mrb[6].mxu1 %v2512_v2 }
 0x2a5   : > { %v6467_v38 = vpack.c.bf16 %v12255_v48, %v12253_v41  ;;  %v12259_v13 = vand.u32 4294901760, %v12258_v5  ;;  %v12260_v51 = vand.u32 4294901760, %v12115_v21  ;;  %v5893_v42 = vpack.c.bf16 %v2637_v62, %v2625_v45  ;;  %6466 = vmatpush1.bf16.msra.mxu0 %v6465_v54  ;;  %v12270_v21 = vld [vmem:[#allocation92_spill] sm:$0xff]  ;;  %5890 = vmatpush1.bf16.msra.mxu1 %v5889_v14  ;;  %v12272_v62 = vld [vmem:[#allocation93_spill] sm:$0xff] }
 0x2a6   : > { %v2666_v4 = vsub.f32 %v12256_v8, %v12257_v20  ;;  %v12262_v35 = vand.u32 4294901760, %v12261_v50  ;;  %v12264_v16 = vand.u32 4294901760, %v12263_v29  ;;  %v12265_v12 = vand.u32 4294901760, %v12116_v32  ;;  %5892 = vmatprep.subr.bf16.mxu1 %v5891_v27  ;;  %v12279_v14 = vld [vmem:[#allocation260_spill] sm:$0xff] }
 0x2a7   : > { %v2678_v7 = vsub.f32 %v12258_v5, %v12259_v13  ;;  %4798 = vmatmul.mubr.f32.gmra.mrb[4].mxu0 %v12260_v51  ;;  %v12267_v22 = vand.u32 4294901760, %v12266_v57  ;;  %v12269_v41 = vand.u32 4294901760, %v12268_v40  ;;  %v2649_v48 = vand.u32 4294901760, %v2648_v31  ;;  %6468 = vmatprep.subr.bf16.mxu0 %v6467_v38  ;;  %v12274_v51 = vld [vmem:[#allocation97_spill] sm:$0xff] }
 0x2a8   : > { %v6469_v0 = vpack.c.bf16 %v12264_v16, %v12262_v35  ;;  %4806 = vmatprep.mubr.f32.mxu0 %v12265_v12  ;;  %v2661_v20 = vand.u32 4294901760, %v2660_v10  ;;  %v12271_v13 = vand.u32 4294901760, %v12270_v21  ;;  %v12273_v15 = vand.u32 4294901760, %v12272_v62  ;;  %v12276_v35 = vld [vmem:[#allocation99_spill] sm:$0xff]  ;;  %v12281_v57 = vld [vmem:[#allocation261_spill] sm:$0xff] }
 0x2a9   : > { %v6471_v34 = vpack.c.bf16 %v12269_v41, %v12267_v22  ;;  %v12275_v54 = vand.u32 4294901760, %v12274_v51  ;;  %v12277_v29 = vand.u32 4294901760, %v12276_v35  ;;  %v5895_v10 = vpack.c.bf16 %v2655_v44, %v2643_v47  ;;  %v12283_v41 = vld [vmem:[#allocation5_spill] sm:$0xff]  ;;  %5894 = vmatpush1.bf16.msra.mxu1 %v5893_v42  ;;  %v12296_v42 = vld [vmem:[#allocation116_spill] sm:$0xff] }
 0x2aa   : > { %v2672_v45 = vsub.f32 %v12270_v21, %v12271_v13  ;;  %v2684_v32 = vsub.f32 %v12272_v62, %v12273_v15  ;;  %v2667_v16 = vand.u32 4294901760, %v2666_v4  ;;  %v2679_v12 = vand.u32 4294901760, %v2678_v7  ;;  %2904 = vmatprep.mubr.f32.mxu1 %v12283_v41  ;;  %v12284_v13 = vld [vmem:[#allocation231_spill] sm:$0xff]  ;;  %6470 = vmatpush1.bf16.msra.mxu0 %v6469_v0  ;;  %v12287_v44 = vld [vmem:[#allocation105_spill] sm:$0xff] }
 0x2ab   : > { %v2690_v50 = vsub.f32 %v12274_v51, %v12275_v54  ;;  %v2702_v31 = vsub.f32 %v12276_v35, %v12277_v29  ;;  %v12278_v2 = vand.u32 4294901760, %v12121_v59  ;;  %v12280_v38 = vand.u32 4294901760, %v12279_v14  ;;  %v12285_v29 = vld [vmem:[#allocation104_spill] sm:$0xff]  ;;  %6472 = vmatprep.subr.bf16.mxu0 %v6471_v34  ;;  %5896 = vmatprep.subr.bf16.mxu1 %v5895_v10 }
 0x2ac   : > { %v12282_v22 = vand.u32 4294901760, %v12281_v57  ;;  %v5897_v15 = vpack.c.bf16 %v2661_v20, %v2649_v48  ;;  %v2673_v54 = vand.u32 4294901760, %v2672_v45  ;;  %v12286_v27 = vand.u32 4294901760, %v12285_v29  ;;  %v12292_v20 = vld [vmem:[#allocation109_spill] sm:$0xff] }
 0x2ad   : > { %4810 = vmatmul.mubr.f32.gmra.mrb[6].mxu0 %v12278_v2  ;;  %v12288_v4 = vand.u32 4294901760, %v12287_v44  ;;  %v12289_v7 = vand.u32 4294901760, %v12042_v19  ;;  %v12290_v2 = vld [vmem:[#allocation264_spill] sm:$0xff]  ;;  %v2685_v57 = vand.u32 4294901760, %v2684_v32  ;;  %v2703_v0 = vand.u32 4294901760, %v2702_v31  ;;  %v12301_v31 = vld [vmem:[#allocation267_spill] sm:$0xff] }
 0x2ae   : > { %v6473_v40 = vpack.c.bf16 %v12282_v22, %v12280_v38  ;;  %5073 = vmatprep.mubr.f32.mxu0 %v12284_v13  ;;  %v2696_v47 = vsub.f32 %v12285_v29, %v12286_v27  ;;  %v12291_v14 = vand.u32 4294901760, %v12290_v2  ;;  %v2691_v22 = vand.u32 4294901760, %v2690_v50  ;;  %v12294_v27 = vld [vmem:[#allocation111_spill] sm:$0xff]  ;;  %5898 = vmatpush1.bf16.msra.mxu1 %v5897_v15 }
 0x2af   : > { %v2708_v59 = vsub.f32 %v12287_v44, %v12288_v4  ;;  %v5899_v48 = vpack.c.bf16 %v2679_v12, %v2667_v16  ;;  %v12293_v45 = vand.u32 4294901760, %v12292_v20  ;;  %v12295_v52 = vand.u32 4294901760, %v12294_v27 }
 0x2b0   : > { %v6475_v38 = vpack.c.bf16 %v12291_v14, %v12289_v7  ;;  %v12297_v34 = vand.u32 4294901760, %v12296_v42  ;;  %v12299_v2 = vand.u32 4294901760, %v12298_v61  ;;  %6474 = vmatpush1.bf16.msra.mxu0 %v6473_v40  ;;  %v12300_v50 = vand.u32 4294901760, %v12046_v39  ;;  %v12307_v40 = vld [vmem:[#allocation121_spill] sm:$0xff] }
 0x2b1   : > { %v2714_v41 = vsub.f32 %v12292_v20, %v12293_v45  ;;  %v2726_v4 = vsub.f32 %v12294_v27, %v12295_v52  ;;  %v12302_v10 = vand.u32 4294901760, %v12301_v31  ;;  %v2697_v12 = vand.u32 4294901760, %v2696_v47  ;;  %v12303_v45 = vld [vmem:[#allocation269_spill] sm:$0xff]  ;;  %v12305_v20 = vld [vmem:[#allocation270_spill] sm:$0xff]  ;;  %5900 = vmatprep.subr.bf16.mxu1 %v5899_v48  ;;  %v12309_v31 = vld [vmem:[#allocation123_spill] sm:$0xff] }
 0x2b2   : > { %v2720_v19 = vsub.f32 %v12296_v42, %v12297_v34  ;;  %v2732_v32 = vsub.f32 %v12298_v61, %v12299_v2  ;;  %v2709_v7 = vand.u32 4294901760, %v2708_v59  ;;  %6476 = vmatprep.subr.bf16.mxu0 %v6475_v38  ;;  %v5901_v14 = vpack.c.bf16 %v2685_v57, %v2673_v54  ;;  %v12312_v57 = vld [vmem:[#allocation273_spill] sm:$0xff]  ;;  %v12314_v48 = vld [vmem:[#allocation128_spill] sm:$0xff] }
 0x2b3   : > { %v6477_v16 = vpack.c.bf16 %v12302_v10, %v12300_v50  ;;  %v5903_v52 = vpack.c.bf16 %v2703_v0, %v2691_v22  ;;  %v12304_v27 = vand.u32 4294901760, %v12303_v45  ;;  %v12306_v34 = vand.u32 4294901760, %v12305_v20 }
 0x2b4   : > { %v2715_v44 = vand.u32 4294901760, %v2714_v41  ;;  %v2727_v2 = vand.u32 4294901760, %v2726_v4  ;;  %v12308_v61 = vand.u32 4294901760, %v12307_v40  ;;  %v12310_v50 = vand.u32 4294901760, %v12309_v31  ;;  %5902 = vmatpush1.bf16.msra.mxu1 %v5901_v14 }
 0x2b5   : > { %v6479_v42 = vpack.c.bf16 %v12306_v34, %v12304_v27  ;;  %v2721_v15 = vand.u32 4294901760, %v2720_v19  ;;  %v2733_v59 = vand.u32 4294901760, %v2732_v32  ;;  %6478 = vmatpush1.bf16.msra.mxu0 %v6477_v16  ;;  %v5905_v54 = vpack.c.bf16 %v2709_v7, %v2697_v12  ;;  %v12316_v27 = vld [vmem:[#allocation129_spill] sm:$0xff]  ;;  %v12322_v7 = vld [vmem:[#allocation135_spill] sm:$0xff]  ;;  %5904 = vmatprep.subr.bf16.mxu1 %v5903_v52 }
 0x2b6   : > { %v2738_v39 = vsub.f32 %v12307_v40, %v12308_v61  ;;  %v2750_v47 = vsub.f32 %v12309_v31, %v12310_v50  ;;  %v12311_v38 = vand.u32 4294901760, %v12054_v46  ;;  %v12313_v22 = vand.u32 4294901760, %v12312_v57  ;;  %v12320_v16 = vld [vmem:[#allocation133_spill] sm:$0xff] }
 0x2b7   : > { %v12315_v20 = vand.u32 4294901760, %v12314_v48  ;;  %v12317_v4 = vand.u32 4294901760, %v12316_v27  ;;  %6480 = vmatprep.subr.bf16.mxu0 %v6479_v42  ;;  %v12318_v19 = vand.u32 4294901760, %v12057_v9  ;;  %v12319_v32 = vand.u32 4294901760, %v11869_v24 }
 0x2b8   : > { %v6481_v0 = vpack.c.bf16 %v12313_v22, %v12311_v38  ;;  %v12321_v46 = vand.u32 4294901760, %v12320_v16  ;;  %v12323_v45 = vand.u32 4294901760, %v12322_v7  ;;  %v5907_v50 = vpack.c.bf16 %v2727_v2, %v2715_v44  ;;  %5906 = vmatpush1.bf16.msra.mxu1 %v5905_v54 }
 0x2b9   : > { %v2744_v41 = vsub.f32 %v12314_v48, %v12315_v20  ;;  %v2756_v61 = vsub.f32 %v12316_v27, %v12317_v4  ;;  %v6483_v10 = vpack.c.bf16 %v12319_v32, %v12318_v19  ;;  %v2739_v38 = vand.u32 4294901760, %v2738_v39  ;;  %v12326_v4 = vld [vmem:[#allocation140_spill] sm:$0xff] }
 0x2ba   : > { %v2762_v12 = vsub.f32 %v12320_v16, %v12321_v46  ;;  %v2774_v34 = vsub.f32 %v12322_v7, %v12323_v45  ;;  %v2751_v57 = vand.u32 4294901760, %v2750_v47  ;;  %v5909_v22 = vpack.c.bf16 %v2733_v59, %v2721_v15  ;;  %6482 = vmatpush1.bf16.msra.mxu0 %v6481_v0  ;;  %v12330_v15 = vld [vmem:[#allocation141_spill] sm:$0xff]  ;;  %5908 = vmatprep.subr.bf16.mxu1 %v5907_v50  ;;  %v12334_v46 = vld [vmem:[#allocation147_spill] sm:$0xff] }
 0x2bb   : > { %v12324_v42 = vand.u32 4294901760, %v12060_v58  ;;  %v12325_v9 = vand.u32 4294901760, %v11877_v33  ;;  %v2745_v14 = vand.u32 4294901760, %v2744_v41  ;;  %v2757_v20 = vand.u32 4294901760, %v2756_v61  ;;  %6484 = vmatprep.subr.bf16.mxu0 %v6483_v10  ;;  %v12332_v0 = vld [vmem:[#allocation145_spill] sm:$0xff] }
 0x2bc   : > { %v12327_v19 = vand.u32 4294901760, %v12326_v4  ;;  %v12328_v52 = vand.u32 4294901760, %v12064_v43  ;;  %v12329_v44 = vand.u32 4294901760, %v12063_v55  ;;  %v2763_v39 = vand.u32 4294901760, %v2762_v12  ;;  %5910 = vmatpush1.bf16.msra.mxu1 %v5909_v22 }
 0x2bd   : > { %v6485_v24 = vpack.c.bf16 %v12325_v9, %v12324_v42  ;;  %v2775_v47 = vand.u32 4294901760, %v2774_v34  ;;  %v12331_v58 = vand.u32 4294901760, %v12330_v15  ;;  %v5911_v59 = vpack.c.bf16 %v2751_v57, %v2739_v38 }
 0x2be   : > { %v2768_v32 = vsub.f32 %v12326_v4, %v12327_v19  ;;  %v6487_v2 = vpack.c.bf16 %v12329_v44, %v12328_v52  ;;  %v12333_v41 = vand.u32 4294901760, %v12332_v0  ;;  %v12335_v54 = vand.u32 4294901760, %v12334_v46  ;;  %v12340_v19 = vld [vmem:[#allocation152_spill] sm:$0xff] }
 0x2bf   : > { %v2780_v33 = vsub.f32 %v12330_v15, %v12331_v58  ;;  %6486 = vmatpush1.bf16.msra.mxu0 %v6485_v24  ;;  %v5913_v43 = vpack.c.bf16 %v2757_v20, %v2745_v14  ;;  %v12336_v55 = vand.u32 4294901760, %v11902_v63  ;;  %v12337_v12 = vand.u32 4294901760, %v11903_v26  ;;  %v12342_v14 = vld [vmem:[#allocation153_spill] sm:$0xff]  ;;  %5912 = vmatprep.subr.bf16.mxu1 %v5911_v59 }
 0x2c0   : > { %v2786_v61 = vsub.f32 %v12332_v0, %v12333_v41  ;;  %v2798_v10 = vsub.f32 %v12334_v46, %v12335_v54  ;;  %v12338_v34 = vand.u32 4294901760, %v11908_v30  ;;  %v12339_v50 = vand.u32 4294901760, %v11909_v36  ;;  %6488 = vmatprep.subr.bf16.mxu0 %v6487_v2  ;;  %v12344_v30 = vld [vmem:[#allocation157_spill] sm:$0xff] }
 0x2c1   : > { %v6489_v45 = vpack.c.bf16 %v12337_v12, %v12336_v55  ;;  %v2769_v57 = vand.u32 4294901760, %v2768_v32  ;;  %v5915_v42 = vpack.c.bf16 %v2775_v47, %v2763_v39  ;;  %v2781_v9 = vand.u32 4294901760, %v2780_v33  ;;  %v12346_v32 = vld [vmem:[#allocation159_spill] sm:$0xff]  ;;  %v12348_v39 = vld [vmem:[#allocation164_spill] sm:$0xff]  ;;  %v12350_v41 = vld [vmem:[#allocation165_spill] sm:$0xff]  ;;  %5914 = vmatpush1.bf16.msra.mxu1 %v5913_v43 }
 0x2c2   : > { %v6491_v38 = vpack.c.bf16 %v12339_v50, %v12338_v34  ;;  %v12341_v52 = vand.u32 4294901760, %v12340_v19  ;;  %v12343_v20 = vand.u32 4294901760, %v12342_v14  ;;  %v2787_v26 = vand.u32 4294901760, %v2786_v61  ;;  %v12354_v12 = vld [vmem:[#allocation169_spill] sm:$0xff] }
 0x2c3   : > { %v2799_v44 = vand.u32 4294901760, %v2798_v10  ;;  %v12345_v58 = vand.u32 4294901760, %v12344_v30  ;;  %v12347_v22 = vand.u32 4294901760, %v12346_v32  ;;  %v12349_v47 = vand.u32 4294901760, %v12348_v39  ;;  %6490 = vmatpush1.bf16.msra.mxu0 %v6489_v45  ;;  %5916 = vmatprep.subr.bf16.mxu1 %v5915_v42 }
 0x2c4   : > { %v2792_v24 = vsub.f32 %v12340_v19, %v12341_v52  ;;  %v2804_v63 = vsub.f32 %v12342_v14, %v12343_v20  ;;  %v12351_v54 = vand.u32 4294901760, %v12350_v41  ;;  %v12352_v59 = vand.u32 4294901760, %v11806_v17  ;;  %v12356_v52 = vld [vmem:[#allocation171_spill] sm:$0xff]  ;;  %6492 = vmatprep.subr.bf16.mxu0 %v6491_v38 }
 0x2c5   : > { %v2810_v36 = vsub.f32 %v12344_v30, %v12345_v58  ;;  %v2822_v2 = vsub.f32 %v12346_v32, %v12347_v22  ;;  %v2816_v33 = vsub.f32 %v12348_v39, %v12349_v47  ;;  %v12353_v61 = vand.u32 4294901760, %v8884_v18  ;;  %v12361_v32 = vld [vmem:[#allocation295_spill] sm:$0xff] }
 0x2c6   : > { %v2828_v55 = vsub.f32 %v12350_v41, %v12351_v54  ;;  %v12355_v34 = vand.u32 4294901760, %v12354_v12  ;;  %v12357_v20 = vand.u32 4294901760, %v12356_v52  ;;  %v5917_v22 = vpack.c.bf16 %v2781_v9, %v2769_v57  ;;  %v12359_v54 = vld [vmem:[#allocation293_spill] sm:$0xff] }
 0x2c7   : > { %v6493_v10 = vpack.c.bf16 %v12353_v61, %v12352_v59  ;;  %v12358_v47 = vand.u32 4294901760, %v11807_v1  ;;  %v12360_v45 = vand.u32 4294901760, %v12359_v54  ;;  %v2793_v17 = vand.u32 4294901760, %v2792_v24  ;;  %v12365_v1 = vld [vmem:[#allocation176_spill] sm:$0xff]  ;;  %v12367_v24 = vld [vmem:[#allocation177_spill] sm:$0xff] }
 0x2c8   : > { %v2834_v50 = vsub.f32 %v12354_v12, %v12355_v34  ;;  %v2846_v58 = vsub.f32 %v12356_v52, %v12357_v20  ;;  %v2805_v39 = vand.u32 4294901760, %v2804_v63  ;;  %v5919_v18 = vpack.c.bf16 %v2799_v44, %v2787_v26  ;;  %v12363_v12 = vld [vmem:[#allocation296_spill] sm:$0xff]  ;;  %5918 = vmatpush1.bf16.msra.mxu1 %v5917_v22  ;;  %v12369_v44 = vld [vmem:[#allocation298_spill] sm:$0xff]  ;;  %v12377_v22 = vld [vmem:[#allocation301_spill] sm:$0xff] }
 0x2c9   : > { %v6495_v41 = vpack.c.bf16 %v12360_v45, %v12358_v47  ;;  %v2811_v59 = vand.u32 4294901760, %v2810_v36  ;;  %v2823_v61 = vand.u32 4294901760, %v2822_v2  ;;  %v12362_v34 = vand.u32 4294901760, %v12361_v32  ;;  %6494 = vmatpush1.bf16.msra.mxu0 %v6493_v10  ;;  %v12371_v32 = vld [vmem:[#allocation299_spill] sm:$0xff] }
 0x2ca   : > { %v12364_v30 = vand.u32 4294901760, %v12363_v12  ;;  %v2817_v20 = vand.u32 4294901760, %v2816_v33  ;;  %v2829_v43 = vand.u32 4294901760, %v2828_v55  ;;  %v2835_v38 = vand.u32 4294901760, %v2834_v50  ;;  %5920 = vmatprep.subr.bf16.mxu1 %v5919_v18  ;;  %v12373_v55 = vld [vmem:[#allocation181_spill] sm:$0xff]  ;;  %v12375_v50 = vld [vmem:[#allocation183_spill] sm:$0xff] }
 0x2cb   : > { %v2847_v57 = vand.u32 4294901760, %v2846_v58  ;;  %v12366_v9 = vand.u32 4294901760, %v12365_v1  ;;  %v12368_v63 = vand.u32 4294901760, %v12367_v24  ;;  %6496 = vmatprep.subr.bf16.mxu0 %v6495_v41  ;;  %v5921_v26 = vpack.c.bf16 %v2805_v39, %v2793_v17  ;;  %v12379_v39 = vld [vmem:[#allocation302_spill] sm:$0xff]  ;;  %v12381_v18 = vld [vmem:[#allocation304_spill] sm:$0xff] }
 0x2cc   : > { %v6497_v14 = vpack.c.bf16 %v12364_v30, %v12362_v34  ;;  %v12370_v36 = vand.u32 4294901760, %v12369_v44  ;;  %v12372_v30 = vand.u32 4294901760, %v12371_v32  ;;  %v5923_v33 = vpack.c.bf16 %v2823_v61, %v2811_v59  ;;  %v12383_v61 = vld [vmem:[#allocation305_spill] sm:$0xff] }
 0x2cd   : > { %v2840_v47 = vsub.f32 %v12365_v1, %v12366_v9  ;;  %v2852_v42 = vsub.f32 %v12367_v24, %v12368_v63  ;;  %v12374_v10 = vand.u32 4294901760, %v12373_v55  ;;  %v12376_v58 = vand.u32 4294901760, %v12375_v50  ;;  %5922 = vmatpush1.bf16.msra.mxu1 %v5921_v26  ;;  %v12391_v26 = vld [vmem:[#allocation195_spill] sm:$0xff] }
 0x2ce   : > { %v6499_v2 = vpack.c.bf16 %v12372_v30, %v12370_v36  ;;  %v5925_v45 = vpack.c.bf16 %v2829_v43, %v2817_v20  ;;  %6498 = vmatpush1.bf16.msra.mxu0 %v6497_v14  ;;  %v12378_v41 = vand.u32 4294901760, %v12377_v22  ;;  %v12380_v17 = vand.u32 4294901760, %v12379_v39  ;;  %v12385_v30 = vld [vmem:[#allocation188_spill] sm:$0xff]  ;;  %v12387_v14 = vld [vmem:[#allocation189_spill] sm:$0xff]  ;;  %5924 = vmatprep.subr.bf16.mxu1 %v5923_v33 }
 0x2cf   : > { %v2858_v12 = vsub.f32 %v12373_v55, %v12374_v10  ;;  %v2870_v54 = vsub.f32 %v12375_v50, %v12376_v58  ;;  %v5927_v9 = vpack.c.bf16 %v2847_v57, %v2835_v38  ;;  %v2841_v63 = vand.u32 4294901760, %v2840_v47  ;;  %v12389_v57 = vld [vmem:[#allocation193_spill] sm:$0xff]  ;;  %v12399_v33 = vld [vmem:[#allocation312_spill] sm:$0xff] }
 0x2d0   : > { %v6501_v34 = vpack.c.bf16 %v12380_v17, %v12378_v41  ;;  %v2853_v44 = vand.u32 4294901760, %v2852_v42  ;;  %6500 = vmatprep.subr.bf16.mxu0 %v6499_v2  ;;  %v12382_v59 = vand.u32 4294901760, %v12381_v18  ;;  %v12384_v36 = vand.u32 4294901760, %v12383_v61  ;;  %v12393_v17 = vld [vmem:[#allocation307_spill] sm:$0xff] }
 0x2d1   : > { %v12386_v10 = vand.u32 4294901760, %v12385_v30  ;;  %v12388_v43 = vand.u32 4294901760, %v12387_v14  ;;  %v2859_v22 = vand.u32 4294901760, %v2858_v12  ;;  %v2871_v38 = vand.u32 4294901760, %v2870_v54  ;;  %5926 = vmatpush1.bf16.msra.mxu1 %v5925_v45 }
 0x2d2   : > { %v6503_v32 = vpack.c.bf16 %v12384_v36, %v12382_v59  ;;  %v12390_v47 = vand.u32 4294901760, %v12389_v57  ;;  %v12392_v2 = vand.u32 4294901760, %v12391_v26  ;;  %6502 = vmatpush1.bf16.msra.mxu0 %v6501_v34  ;;  %v5929_v39 = vpack.c.bf16 %v2853_v44, %v2841_v63  ;;  %v12395_v59 = vld [vmem:[#allocation309_spill] sm:$0xff]  ;;  %5928 = vmatprep.subr.bf16.mxu1 %v5927_v9 }
 0x2d3   : > { %v2864_v20 = vsub.f32 %v12385_v30, %v12386_v10  ;;  %v2876_v58 = vsub.f32 %v12387_v14, %v12388_v43  ;;  %v12394_v18 = vand.u32 4294901760, %v12393_v17  ;;  %v12396_v61 = vand.u32 4294901760, %v12395_v59  ;;  %v12397_v10 = vld [vmem:[#allocation311_spill] sm:$0xff]  ;;  %v12403_v34 = vld [vmem:[#allocation201_spill] sm:$0xff] }
 0x2d4   : > { %v2882_v42 = vsub.f32 %v12389_v57, %v12390_v47  ;;  %v2894_v41 = vsub.f32 %v12391_v26, %v12392_v2  ;;  %v12398_v43 = vand.u32 4294901760, %v12397_v10  ;;  %v12400_v12 = vand.u32 4294901760, %v12399_v33  ;;  %6504 = vmatprep.subr.bf16.mxu0 %v6503_v32  ;;  %v12401_v57 = vld [vmem:[#allocation200_spill] sm:$0xff] }
 0x2d5   : > { %v6505_v36 = vpack.c.bf16 %v12396_v61, %v12394_v18  ;;  %v2865_v14 = vand.u32 4294901760, %v2864_v20  ;;  %v2877_v47 = vand.u32 4294901760, %v2876_v58  ;;  %v12402_v30 = vand.u32 4294901760, %v12401_v57  ;;  %v12405_v61 = vld [vmem:[#allocation313_spill] sm:$0xff]  ;;  %5930 = vmatpush1.bf16.msra.mxu1 %v5929_v39  ;;  %v12409_v58 = vld [vmem:[#allocation318_spill] sm:$0xff] }
 0x2d6   : > { %v6507_v54 = vpack.c.bf16 %v12400_v12, %v12398_v43  ;;  %v12404_v63 = vand.u32 4294901760, %v12403_v34  ;;  %v5931_v17 = vpack.c.bf16 %v2871_v38, %v2859_v22  ;;  %v2883_v18 = vand.u32 4294901760, %v2882_v42  ;;  %v12407_v43 = vld [vmem:[#allocation315_spill] sm:$0xff]  ;;  %v12413_v22 = vld [vmem:[#allocation321_spill] sm:$0xff]  ;;  %v12415_v42 = vld [vmem:[#allocation322_spill] sm:$0xff] }
 0x2d7   : > { %v2888_v2 = vsub.f32 %v12401_v57, %v12402_v30  ;;  %v2895_v59 = vand.u32 4294901760, %v2894_v41  ;;  %6506 = vmatpush1.bf16.msra.mxu0 %v6505_v36  ;;  %v12406_v10 = vand.u32 4294901760, %v12405_v61  ;;  %v12408_v45 = vand.u32 4294901760, %v12407_v43  ;;  %v12411_v30 = vld [vmem:[#allocation319_spill] sm:$0xff]  ;;  %v12419_v61 = vld [vmem:[#allocation8_spill] sm:$0xff] }
 0x2d8   : > { %v2900_v44 = vsub.f32 %v12403_v34, %v12404_v63  ;;  %6508 = vmatprep.subr.bf16.mxu0 %v6507_v54  ;;  %v5933_v20 = vpack.c.bf16 %v2877_v47, %v2865_v14  ;;  %v12410_v33 = vand.u32 4294901760, %v12409_v58  ;;  %v12412_v12 = vand.u32 4294901760, %v12411_v30  ;;  %5932 = vmatprep.subr.bf16.mxu1 %v5931_v17  ;;  %v12417_v14 = vld [vmem:[#allocation13_spill] sm:$0xff]  ;;  %v12418_v54 = vld [vmem:[#allocation15_spill] sm:$0xff]  ;;  %v12424_v43 = vld [vmem:[#allocation308_spill] sm:$0xff] }
 0x2d9   : > { %v6509_v32 = vpack.c.bf16 %v12408_v45, %v12406_v10  ;;  %v2889_v26 = vand.u32 4294901760, %v2888_v2  ;;  %v5935_v9 = vpack.c.bf16 %v2895_v59, %v2883_v18  ;;  %v12414_v38 = vand.u32 4294901760, %v12413_v22  ;;  %v12420_v2 = vld [vmem:[#allocation20_spill] sm:$0xff]  ;;  %v12422_v18 = vld [vmem:[#allocation26_spill] sm:$0xff]  ;;  %v12423_v59 = vld [vmem:[#allocation27_spill] sm:$0xff] }
 0x2da   : > { %v6511_v57 = vpack.c.bf16 %v12412_v12, %v12410_v33  ;;  %v2901_v63 = vand.u32 4294901760, %v2900_v44  ;;  %v12416_v41 = vand.u32 4294901760, %v12415_v42  ;;  %5934 = vmatpush1.bf16.msra.mxu1 %v5933_v20  ;;  %v5939_v47 = vpack.c.bf16 %v12418_v54, %v12417_v14  ;;  %v12421_v44 = vld [vmem:[#allocation21_spill] sm:$0xff]  ;;  %v12425_v45 = vld [vmem:[#allocation7_spill] sm:$0xff]  ;;  %v12430_v33 = vld [vmem:[#allocation38_spill] sm:$0xff] }
 0x2db   : > { %6510 = vmatpush1.bf16.msra.mxu0 %v6509_v32  ;;  %5936 = vmatprep.subr.bf16.mxu1 %v5935_v9  ;;  %v5941_v17 = vpack.c.bf16 %v12421_v44, %v12420_v2  ;;  %v5943_v10 = vpack.c.bf16 %v12423_v59, %v12422_v18  ;;  %v12428_v32 = vld [vmem:[#allocation31_spill] sm:$0xff]  ;;  %v12429_v20 = vld [vmem:[#allocation33_spill] sm:$0xff]  ;;  %v12434_v22 = vld [vmem:[#allocation236_spill] sm:$0xff]  ;;  %v5951_v14 = vpack.c.bf16 %v12207_v60, %v12205_v11 }
 0x2dc   : > { %v6513_v36 = vpack.c.bf16 %v12416_v41, %v12414_v38  ;;  %6512 = vmatprep.subr.bf16.mxu0 %v6511_v57  ;;  %v5937_v39 = vpack.c.bf16 %v2901_v63, %v2889_v26  ;;  %v12426_v57 = vld [vmem:[#allocation228_spill] sm:$0xff]  ;;  %v5945_v58 = vpack.c.bf16 %v12429_v20, %v12428_v32  ;;  %v12431_v30 = vld [vmem:[#allocation39_spill] sm:$0xff]  ;;  %v12433_v9 = vld [vmem:[#allocation17_spill] sm:$0xff]  ;;  %v5953_v18 = vpack.c.bf16 %v12220_v25, %v12216_v56 }
 0x2dd   : > { %v12427_v26 = vld [vmem:[#allocation232_spill] sm:$0xff]  ;;  %v5947_v12 = vpack.c.bf16 %v12431_v30, %v12430_v33  ;;  %v12432_v63 = vld [vmem:[#allocation203_spill] sm:$0xff]  ;;  %v12436_v42 = vld [vmem:[#allocation238_spill] sm:$0xff]  ;;  %v5955_v60 = vpack.c.bf16 %v12224_v23, %v12222_v6  ;;  %v5959_v25 = vpack.c.bf16 %v12241_v37, %v12239_v49  ;;  %v5961_v33 = vpack.c.bf16 %v12250_v3, %v12248_v53 }
 0x2de   : > { %5938 = vmatpush1.bf16.msra.mxu1 %v5937_v39  ;;  %v12435_v38 = vld [vmem:[#allocation208_spill] sm:$0xff]  ;;  %v12439_v54 = vld [vmem:[#allocation22_spill] sm:$0xff]  ;;  %v12445_v11 = vld [vmem:[#allocation47_spill] sm:$0xff]  ;;  %v5965_v37 = vpack.c.bf16 %v12272_v62, %v12270_v21 }
 0x2df   : > { %6514 = vmatpush1.bf16.msra.mxu0 %v6513_v36  ;;  %5940 = vmatprep.subr.bf16.mxu1 %v5939_v47  ;;  %v12437_v41 = vld [vmem:[#allocation44_spill] sm:$0xff]  ;;  %v12438_v36 = vld [vmem:[#allocation45_spill] sm:$0xff]  ;;  %v12442_v2 = vld [vmem:[#allocation242_spill] sm:$0xff] }
 0x2e0   : > { %6516 = vmatprep.subr.bf16.mxu0 %v12419_v61  ;;  %v5949_v39 = vpack.c.bf16 %v12438_v36, %v12437_v41  ;;  %v12440_v47 = vld [vmem:[#allocation212_spill] sm:$0xff]  ;;  %v12446_v59 = vld [vmem:[#allocation219_spill] sm:$0xff]  ;;  %v12451_v32 = vld [vmem:[#allocation69_spill] sm:$0xff]  ;;  %v5977_v36 = vpack.c.bf16 %v12316_v27, %v12314_v48 }
 0x2e1   : > { %2906 = vmatmul.mubr.f32.vlgmr.msra.gmra.mrb[0].mxu1 %v12425_v45  ;;  %v12441_v61 = vld [vmem:[#allocation24_spill] sm:$0xff]  ;;  %v5957_v56 = vpack.c.bf16 %v12451_v32, %v12228_v28  ;;  %v12452_v6 = vld [vmem:[#allocation323_spill] sm:$0xff]  ;;  %v12453_v23 = vld [vmem:[#allocation9_spill] sm:$0xff]  ;;  %v5963_v28 = vpack.c.bf16 %v12258_v5, %v12256_v8 }
 0x2e2   : > { %5075 = vmatmul.mubr.f32.vlgmr.msra.gmra.mrb[0].mxu0 %v12424_v43  ;;  %5942 = vmatpush1.bf16.msra.mxu1 %v5941_v17  ;;  %v12443_v44 = vld [vmem:[#allocation216_spill] sm:$0xff]  ;;  %v12444_v17 = vld [vmem:[#allocation245_spill] sm:$0xff]  ;;  %v12454_v20 = vld [vmem:[#allocation254_spill] sm:$0xff] }
 0x2e3   : > { %6518 = vmatpush1.bf16.msra.mxu0 %v12426_v57  ;;  %5944 = vmatprep.subr.bf16.mxu1 %v5943_v10  ;;  %v12447_v10 = vld [vmem:[#allocation52_spill] sm:$0xff]  ;;  %v12456_v30 = vld [vmem:[#allocation259_spill] sm:$0xff]  ;;  %v12457_v49 = vld [vmem:[#allocation262_spill] sm:$0xff] }
 0x2e4   : > { %6520 = vmatprep.subr.bf16.mxu0 %v12427_v26  ;;  %2912 = vmatprep.mubr.f32.mxu1 %v12432_v63  ;;  %v12448_v45 = vld [vmem:[#allocation248_spill] sm:$0xff]  ;;  %v12450_v26 = vld [vmem:[#allocation250_spill] sm:$0xff]  ;;  %v12460_v3 = vld [vmem:[#allocation105_spill] sm:$0xff] }
 0x2e5   : > { %5081 = vmatprep.mubr.f32.mxu0 %v12433_v9  ;;  %2914 = vmatmul.mubr.f32.gmra.mrb[2].mxu1 %v12435_v38  ;;  %v12449_v57 = vld [vmem:[#allocation224_spill] sm:$0xff]  ;;  %v5969_v8 = vpack.c.bf16 %v12460_v3, %v12285_v29  ;;  %v12461_v5 = vld [vmem:[#allocation109_spill] sm:$0xff]  ;;  %v12462_v63 = vld [vmem:[#allocation111_spill] sm:$0xff] }
 0x2e6   : > { %5946 = vmatpush1.bf16.msra.mxu1 %v5945_v58  ;;  %5083 = vmatmul.mubr.f32.gmra.mrb[2].mxu0 %v12439_v54  ;;  %v12455_v58 = vld [vmem:[#allocation256_spill] sm:$0xff]  ;;  %v12463_v38 = vld [vmem:[#allocation271_spill] sm:$0xff]  ;;  %v12467_v41 = vld [vmem:[#allocation277_spill] sm:$0xff] }
 0x2e7   : > { %6522 = vmatpush1.bf16.msra.mxu0 %v12434_v22  ;;  %5948 = vmatprep.subr.bf16.mxu1 %v5947_v12  ;;  %v12458_v12 = vld [vmem:[#allocation265_spill] sm:$0xff]  ;;  %v12459_v53 = vld [vmem:[#allocation268_spill] sm:$0xff]  ;;  %v5971_v22 = vpack.c.bf16 %v12462_v63, %v12461_v5  ;;  %v12464_v21 = vld [vmem:[#allocation275_spill] sm:$0xff] }
 0x2e8   : > { %6524 = vmatprep.subr.bf16.mxu0 %v12436_v42  ;;  %2920 = vmatprep.mubr.f32.mxu1 %v12440_v47  ;;  %v12465_v62 = vld [vmem:[#allocation116_spill] sm:$0xff]  ;;  %v12466_v42 = vld [vmem:[#allocation117_spill] sm:$0xff]  ;;  %v12470_v47 = vld [vmem:[#allocation286_spill] sm:$0xff] }
 0x2e9   : > { %5089 = vmatprep.mubr.f32.mxu0 %v12441_v61  ;;  %2922 = vmatmul.mubr.f32.gmra.mrb[4].mxu1 %v12443_v44  ;;  %v12468_v29 = vld [vmem:[#allocation280_spill] sm:$0xff]  ;;  %v12472_v48 = vld [vmem:[#allocation291_spill] sm:$0xff]  ;;  %v12473_v27 = vld [vmem:[#allocation153_spill] sm:$0xff] }
 0x2ea   : > { %5950 = vmatpush1.bf16.msra.mxu1 %v5949_v39  ;;  %5091 = vmatmul.mubr.f32.gmra.mrb[4].mxu0 %v12445_v11  ;;  %v5979_v39 = vpack.c.bf16 %v12322_v7, %v12320_v16  ;;  %v5985_v16 = vpack.c.bf16 %v12473_v27, %v12340_v19  ;;  %v12474_v7 = vld [vmem:[#allocation157_spill] sm:$0xff]  ;;  %v12475_v44 = vld [vmem:[#allocation159_spill] sm:$0xff]  ;;  %v12483_v32 = vld [vmem:[#allocation306_spill] sm:$0xff] }
 0x2eb   : > { %6526 = vmatpush1.bf16.msra.mxu0 %v12442_v2  ;;  %5952 = vmatprep.subr.bf16.mxu1 %v5951_v14  ;;  %v12469_v14 = vld [vmem:[#allocation283_spill] sm:$0xff]  ;;  %v12471_v2 = vld [vmem:[#allocation289_spill] sm:$0xff] }
 0x2ec   : > { %6528 = vmatprep.subr.bf16.mxu0 %v12444_v17  ;;  %2928 = vmatprep.mubr.f32.mxu1 %v12446_v59  ;;  %v5987_v17 = vpack.c.bf16 %v12475_v44, %v12474_v7  ;;  %v12482_v19 = vld [vmem:[#allocation303_spill] sm:$0xff] }
 0x2ed   : > { %5097 = vmatprep.mubr.f32.mxu0 %v12447_v10  ;;  %2930 = vmatmul.mubr.f32.gmra.mrb[6].mxu1 %v12449_v57  ;;  %v5993_v57 = vpack.c.bf16 %v12367_v24, %v12365_v1  ;;  %v12490_v1 = vld [vmem:[#allocation317_spill] sm:$0xff]  ;;  %v12491_v24 = vld [vmem:[#allocation200_spill] sm:$0xff] }
 0x2ee   : > { %5954 = vmatpush1.bf16.msra.mxu1 %v5953_v18  ;;  %5099 = vmatmul.mubr.f32.gmra.mrb[6].mxu0 %v12452_v6  ;;  %v12476_v18 = vld [vmem:[#allocation294_spill] sm:$0xff] }
 0x2ef   : > { %6530 = vmatpush1.bf16.msra.mxu0 %v12448_v45  ;;  %5956 = vmatprep.subr.bf16.mxu1 %v5955_v60  ;;  %v12479_v60 = vld [vmem:[#allocation165_spill] sm:$0xff]  ;;  %v12481_v45 = vld [vmem:[#allocation300_spill] sm:$0xff] }
 0x2f0   : > { %6532 = vmatprep.subr.bf16.mxu0 %v12450_v26  ;;  %3130 = vmatprep.mubr.f32.mxu1 %v12453_v23  ;;  %v5995_v26 = vpack.c.bf16 %v12375_v50, %v12373_v55  ;;  %v12486_v23 = vld [vmem:[#allocation189_spill] sm:$0xff]  ;;  %v6001_v55 = vpack.c.bf16 %v12403_v34, %v12491_v24  ;;  %v12492_v50 = vld [vmem:[#allocation320_spill] sm:$0xff] }
 0x2f1   : > { %5234 = vmatprep.mubr.f32.mxu0 %v12284_v13  ;;  %v5967_v13 = vpack.c.bf16 %v12276_v35, %v12274_v51  ;;  %v5973_v51 = vpack.c.bf16 %v12466_v42, %v12465_v62  ;;  %v5975_v35 = vpack.c.bf16 %v12309_v31, %v12307_v40  ;;  %v5981_v40 = vpack.c.bf16 %v12330_v15, %v12326_v4  ;;  %v12477_v4 = vld [vmem:[#allocation297_spill] sm:$0xff]  ;;  %v12478_v15 = vld [vmem:[#allocation164_spill] sm:$0xff] }
 0x2f2   : > { %5958 = vmatpush1.bf16.msra.mxu1 %v5957_v56  ;;  %v5983_v31 = vpack.c.bf16 %v12334_v46, %v12332_v0  ;;  %v5989_v0 = vpack.c.bf16 %v12479_v60, %v12478_v15  ;;  %v12480_v46 = vld [vmem:[#allocation169_spill] sm:$0xff]  ;;  %v12484_v56 = vld [vmem:[#allocation310_spill] sm:$0xff] }
 0x2f3   : > { %6534 = vmatpush1.bf16.msra.mxu0 %v12454_v20  ;;  %5960 = vmatprep.subr.bf16.mxu1 %v5959_v25  ;;  %v5991_v59 = vpack.c.bf16 %v12356_v52, %v12480_v46  ;;  %v12485_v25 = vld [vmem:[#allocation188_spill] sm:$0xff]  ;;  %v12487_v20 = vld [vmem:[#allocation193_spill] sm:$0xff] }
 0x2f4   : > { %6536 = vmatprep.subr.bf16.mxu0 %v12455_v58  ;;  %v5997_v52 = vpack.c.bf16 %v12486_v23, %v12485_v25  ;;  %v12488_v58 = vld [vmem:[#allocation195_spill] sm:$0xff]  ;;  %v12496_v34 = vld [vmem:[#allocation213_spill] sm:$0xff] }
 0x2f6   : > { %5962 = vmatpush1.bf16.msra.mxu1 %v5961_v33  ;;  %v5999_v33 = vpack.c.bf16 %v12488_v58, %v12487_v20 }
 0x2f7   : > { %6538 = vmatpush1.bf16.msra.mxu0 %v12456_v30  ;;  %5964 = vmatprep.subr.bf16.mxu1 %v5963_v28  ;;  %v12489_v28 = vld [vmem:[#allocation314_spill] sm:$0xff]  ;;  %v12493_v30 = vld [vmem:[#allocation11_spill] sm:$0xff] }
 0x2f8   : > { %6540 = vmatprep.subr.bf16.mxu0 %v12457_v49  ;;  %v12494_v49 = vld [vmem:[#allocation205_spill] sm:$0xff] }
 0x2fa   : > { %5966 = vmatpush1.bf16.msra.mxu1 %v5965_v37  ;;  %v12495_v37 = vld [vmem:[#allocation209_spill] sm:$0xff] }
 0x2fb   : > { %6542 = vmatpush1.bf16.msra.mxu0 %v12458_v12  ;;  %5968 = vmatprep.subr.bf16.mxu1 %v5967_v13  ;;  %v12497_v13 = vld [vmem:[#allocation217_spill] sm:$0xff]  ;;  %v844_v12 = vld [vmem:[%s624_s4] sm:$0x3] }
 0x2fc   : > { %6544 = vmatprep.subr.bf16.mxu0 %v12459_v53 }
 0x2fe   : > { %5970 = vmatpush1.bf16.msra.mxu1 %v5969_v8 }
 0x2ff   : > { %6546 = vmatpush1.bf16.msra.mxu0 %v12463_v38  ;;  %5972 = vmatprep.subr.bf16.mxu1 %v5971_v22 }
 0x300   : > { %6548 = vmatprep.subr.bf16.mxu0 %v12464_v21 }
 0x302   : > { %5974 = vmatpush1.bf16.msra.mxu1 %v5973_v51 }
 0x303   : > { %6550 = vmatpush1.bf16.msra.mxu0 %v12467_v41  ;;  %5976 = vmatprep.subr.bf16.mxu1 %v5975_v35 }
 0x304   : > { %6552 = vmatprep.subr.bf16.mxu0 %v12468_v29 }
 0x306   : > { %5978 = vmatpush1.bf16.msra.mxu1 %v5977_v36 }
 0x307   : > { %6554 = vmatpush1.bf16.msra.mxu0 %v12469_v14  ;;  %5980 = vmatprep.subr.bf16.mxu1 %v5979_v39 }
 0x308   : > { %6556 = vmatprep.subr.bf16.mxu0 %v12470_v47 }
 0x30a   : > { %5982 = vmatpush1.bf16.msra.mxu1 %v5981_v40 }
 0x30b   : > { %6558 = vmatpush1.bf16.msra.mxu0 %v12471_v2  ;;  %5984 = vmatprep.subr.bf16.mxu1 %v5983_v31 }
 0x30c   : > { %6560 = vmatprep.subr.bf16.mxu0 %v12472_v48 }
 0x30e   : > { %5986 = vmatpush1.bf16.msra.mxu1 %v5985_v16 }
 0x30f   : > { %6562 = vmatpush1.bf16.msra.mxu0 %v12476_v18  ;;  %5988 = vmatprep.subr.bf16.mxu1 %v5987_v17 }
 0x310   : > { %6564 = vmatprep.subr.bf16.mxu0 %v12477_v4 }
 0x312   : > { %5990 = vmatpush1.bf16.msra.mxu1 %v5989_v0 }
 0x313   : > { %6566 = vmatpush1.bf16.msra.mxu0 %v12481_v45  ;;  %5992 = vmatprep.subr.bf16.mxu1 %v5991_v59 }
 0x314   : > { %6568 = vmatprep.subr.bf16.mxu0 %v12482_v19 }
 0x316   : > { %5994 = vmatpush1.bf16.msra.mxu1 %v5993_v57 }
 0x317   : > { %6570 = vmatpush1.bf16.msra.mxu0 %v12483_v32  ;;  %5996 = vmatprep.subr.bf16.mxu1 %v5995_v26 }
 0x318   : > { %6572 = vmatprep.subr.bf16.mxu0 %v12484_v56 }
 0x31a   : > { %5998 = vmatpush1.bf16.msra.mxu1 %v5997_v52 }
 0x31b   : > { %6574 = vmatpush1.bf16.msra.mxu0 %v12489_v28  ;;  %6000 = vmatprep.subr.bf16.mxu1 %v5999_v33 }
 0x31c   : > { %6576 = vmatprep.subr.bf16.mxu0 %v12490_v1 }
 0x31e   : > { %6002 = vmatpush1.bf16.msra.mxu1 %v6001_v55 }
 0x31f   : > { %6578 = vmatpush1.bf16.msra.mxu0 %v12492_v50 }
 0x321   : > { %3133 = vmatmul.mubr.f32.vlgmr.msra.gmra.mrb[0].mxu1 %v12493_v30 }
 0x322   : > { %5236 = vmatmul.mubr.f32.vlgmr.msra.gmra.mrb[0].mxu0 %v12424_v43  ;;  %3140 = vmatprep.mubr.f32.mxu1 %v12494_v49  ;;  %v12498_v43 = vld [vmem:[#allocation221_spill] sm:$0xff] }
 0x323   : > { %5242 = vmatprep.mubr.f32.mxu0 %v12433_v9  ;;  %v12499_v9 = vld [vmem:[#allocation225_spill] sm:$0xff] }
 0x325   : > { %3143 = vmatmul.mubr.f32.gmra.mrb[2].mxu1 %v12495_v37 }
 0x326   : > { %5244 = vmatmul.mubr.f32.gmra.mrb[2].mxu0 %v12439_v54  ;;  %3150 = vmatprep.mubr.f32.mxu1 %v12496_v34  ;;  %v846_v54 = vlaneseq }
 0x327   : > { %5250 = vmatprep.mubr.f32.mxu0 %v12441_v61 }
 0x328   : > { %v847_v61 = vshrl.u32 %v846_v54, 7 }
 0x329   : > { %3153 = vmatmul.mubr.f32.gmra.mrb[4].mxu1 %v12497_v13 }
 0x32a   : > { %5252 = vmatmul.mubr.f32.gmra.mrb[4].mxu0 %v12445_v11  ;;  %3160 = vmatprep.mubr.f32.mxu1 %v12498_v43  ;;  %v848_v11 = vsub.s32 0, %v847_v61  ;;  %v852_v53 = vsub.s32 1, %v847_v61 }
 0x32b   : > { %5258 = vmatprep.mubr.f32.mxu0 %v12447_v10 }
 0x32c   : > { %v849_v3 = vrot.slane %v844_v12, %v848_v11  ;;  %v853_v10 = vrot.slane %v844_v12, %v852_v53 }
 0x32d   : > { %3163 = vmatmul.mubr.f32.gmra.mrb[6].mxu1 %v12499_v9 }
 0x32e   : > { %5260 = vmatmul.mubr.f32.gmra.mrb[6].mxu0 %v12452_v6 }
 0x3f4   : > { %v3134_v6 = vpop.f32.mrb[0].mxu1 }
 0x3f5   : > { %v5237_v8 = vpop.f32.mrb[0].mxu0  ;;  %v6579_v63 = vadd.f32 %v3134_v6, %v849_v3  ;;  %v3136_v22 = vpop.f32.mrb[1].mxu1 }
 0x3f6   : > { %v5239_v5 = vpop.f32.mrb[1].mxu0  ;;  %v6581_v38 = vadd.f32 %v3136_v22, %v853_v10 }
 0x3f7   : > { %v6580_v21 = vadd.f32 %v6579_v63, %v5237_v8 }
 0x3f8   : > { %v6582_v42 = vadd.f32 %v6581_v38, %v5239_v5  ;;  %v3144_v51 = vpop.f32.mrb[2].mxu1 }
 0x3f9   : > { %v5245_v62 = vpop.f32.mrb[2].mxu0  ;;  %5266 = vst [vmem:[%s10308_s6] sm:$0xff] %v6580_v21  ;;  %v6583_v41 = vadd.f32 %v3144_v51, %v849_v3  ;;  %v3146_v29 = vpop.f32.mrb[3].mxu1 }
 0x3fa   : > { %v5247_v35 = vpop.f32.mrb[3].mxu0  ;;  %5267 = vst [vmem:[%s10308_s6 + $0x8] sm:$0xff] %v6582_v42  ;;  %v6585_v36 = vadd.f32 %v3146_v29, %v853_v10 }
 0x3fb   : > { %v6584_v39 = vadd.f32 %v6583_v41, %v5245_v62 }
 0x3fc   : > { %v6586_v47 = vadd.f32 %v6585_v36, %v5247_v35  ;;  %v3154_v40 = vpop.f32.mrb[4].mxu1 }
 0x3fd   : > { %v5253_v14 = vpop.f32.mrb[4].mxu0  ;;  %5268 = vst [vmem:[%s10308_s6 + $0x10] sm:$0xff] %v6584_v39  ;;  %v6587_v2 = vadd.f32 %v3154_v40, %v849_v3  ;;  %v3156_v48 = vpop.f32.mrb[5].mxu1 }
 0x3fe   : > { %v5255_v31 = vpop.f32.mrb[5].mxu0  ;;  %5269 = vst [vmem:[%s10308_s6 + $0x18] sm:$0xff] %v6586_v47  ;;  %v6589_v27 = vadd.f32 %v3156_v48, %v853_v10 }
 0x3ff   : > { %v6588_v16 = vadd.f32 %v6587_v2, %v5253_v14 }
 0x400   : > { %v6590_v44 = vadd.f32 %v6589_v27, %v5255_v31  ;;  %v3164_v17 = vpop.f32.mrb[6].mxu1  ;;  %5280 = sbr.rel (!%p6860_p6) target bundleno = 1039 (0x40f), region = 59  ;;  %v5299_v59 = vld [vmem:[%s10308_s6] sm:$0xff] (%p6860_p6) }
 0x401   : > { %v5261_v7 = vpop.f32.mrb[6].mxu0  ;;  %5270 = vst [vmem:[%s10308_s6 + $0x20] sm:$0xff] %v6588_v16  ;;  %v6591_v4 = vadd.f32 %v3164_v17, %v849_v3  ;;  %v3166_v15 = vpop.f32.mrb[7].mxu1  ;;  %v5301_v45 = vld [vmem:[%s10308_s6 + $0x8] sm:$0xff] (%p6860_p6)  ;;  %5300 = vst [vmem:[%s5286_s7] sm:$0xff] (%p6860_p6), %v5299_v59 }
 0x402   : > { %v5263_v18 = vpop.f32.mrb[7].mxu0  ;;  %5271 = vst [vmem:[%s10308_s6 + $0x28] sm:$0xff] %v6590_v44  ;;  %v6593_v60 = vadd.f32 %v3166_v15, %v853_v10  ;;  %5302 = vst [vmem:[%s5286_s7 + $0x8] sm:$0xff] (%p6860_p6), %v5301_v45 }
 0x403   : > { %v6592_v0 = vadd.f32 %v6591_v4, %v5261_v7 }
 0x404   : > { %v6594_v46 = vadd.f32 %v6593_v60, %v5263_v18  ;;  %v5303_v19 = vld [vmem:[%s10308_s6 + $0x10] sm:$0xff] (%p6860_p6) }
 0x405   : > { %5272 = vst [vmem:[%s10308_s6 + $0x30] sm:$0xff] %v6592_v0  ;;  %v5305_v57 = vld [vmem:[%s10308_s6 + $0x18] sm:$0xff] (%p6860_p6)  ;;  %5304 = vst [vmem:[%s5286_s7 + $0x30] sm:$0xff] (%p6860_p6), %v5303_v19 }
 0x406   : > { %5273 = vst [vmem:[%s10308_s6 + $0x38] sm:$0xff] %v6594_v46  ;;  %5306 = vst [vmem:[%s5286_s7 + $0x38] sm:$0xff] (%p6860_p6), %v5305_v57 }
 0x408   : > { %v5307_v26 = vld [vmem:[%s10308_s6 + $0x20] sm:$0xff] }
 0x409   : > { %v5309_v32 = vld [vmem:[%s10308_s6 + $0x28] sm:$0xff]  ;;  %5308 = vst [vmem:[%s5286_s7 + $0x60] sm:$0xff] %v5307_v26 }
 0x40a   : > { %5310 = vst [vmem:[%s5286_s7 + $0x68] sm:$0xff] %v5309_v32 }
 0x40c   : > { %v5311_v56 = vld [vmem:[%s10308_s6 + $0x30] sm:$0xff] }
 0x40d   : > { %v5313_v25 = vld [vmem:[%s10308_s6 + $0x38] sm:$0xff]  ;;  %5312 = vst [vmem:[%s5286_s7 + $0x90] sm:$0xff] %v5311_v56 }
 0x40e   : > { %5314 = vst [vmem:[%s5286_s7 + $0x98] sm:$0xff] %v5313_v25 }
 0x40f PF: > { %s13_s16 = sadd.s32 1, %s6803_s16   ;;  %s12500_s12 = smov %s6791_s13 }
 0x410   : > { %p10_p12 = scmp.ge.s32.totalorder %s13_s16, 5   ;;  %s12501_s13 = smov %s6865_s22 }
 0x411   : > { %s12502_s14 = smov %s6799_s15  ;;  %s12503_s15 = smov %s12505_s17 }
 0x412   :  { %12 = sbr.rel (!%p10_p12) target bundleno = 3 (0x3), region = 119 }

</bundles_post_ra>
